<compile_context>
chip_gen: v7x
topology: tpu7x:2x2x1
jax: 0.10.0
libtpu: 0.0.40
codegen_flags: <defaults>
</compile_context>

<pallas_src>
import functools
import numpy as np
import jax
import jax.numpy as jnp
from jax.experimental import pallas as pl
from jax.experimental.pallas import tpu as pltpu

COMPUTE_DTYPE = jnp.bfloat16      # operand dtype; accumulation is fp32
LN_EPS = 1e-5
TOKEN_TILE = 256                  # token-dim tile cap (multiple of 8)
DH_TILE_CAP = 1024                # MLP hidden-dim tile cap (multiple of 128)
VMEM_LIMIT = 48 * 1024 * 1024     # scoped VMEM: > v5e/v6e defaults, < v7x phys


def _round_up(x, m):
    return (x + m - 1) // m * m


def _m_tiles(M, cap=TOKEN_TILE):
    """Pick (tile_m, padded_M); use >=2 tiles whenever M >= 16 (v7x dual TC)."""
    if M <= cap:
        if M >= 16:
            tm = _round_up((M + 1) // 2, 8)
            return tm, 2 * tm
        return M, M
    return cap, _round_up(M, cap)


def _dh_tile(Dh, cap=DH_TILE_CAP):
    """Tile the MLP hidden dim so w1/w2 blocks stream instead of staying
    fully resident (v7x 64 MiB / v5e 16 MiB VMEM)."""
    if Dh <= cap:
        return Dh
    for t in range(cap, 127, -128):
        if Dh % t == 0:
            return t
    return Dh


def _pad_rows(x2, Mp):
    M = x2.shape[0]
    if Mp == M:
        return x2
    return jnp.pad(x2, ((0, Mp - M), (0, 0)))


def _params(n_parallel, n_arbitrary=0):
    return pltpu.CompilerParams(
        dimension_semantics=("parallel",) * n_parallel
                            + ("arbitrary",) * n_arbitrary,
        vmem_limit_bytes=VMEM_LIMIT)


def _pick_window_block(nW, Bn):
    """Largest window-block dividing nW, preferring >=2 grid steps (dual TC)."""
    for c in (64, 32, 16, 8, 4, 2, 1):
        if nW % c == 0 and Bn // c >= 2:
            return c
    for c in (64, 32, 16, 8, 4, 2, 1):
        if nW % c == 0:
            return c
    return 1


# --------------------------------------------------------------------------
# Pallas kernels
# --------------------------------------------------------------------------
def _matmul_bias_kernel(x_ref, w_ref, b_ref, o_ref):
    acc = jnp.dot(x_ref[...], w_ref[...], preferred_element_type=jnp.float32)
    o_ref[...] = (acc + b_ref[...]).astype(o_ref.dtype)


def _ln_matmul_kernel(x_ref, g_ref, b_ref, w_ref, bias_ref, o_ref):
    x = x_ref[...].astype(jnp.float32)
    mu = jnp.mean(x, axis=-1, keepdims=True)
    var = jnp.mean(jnp.square(x - mu), axis=-1, keepdims=True)
    xn = (x - mu) * jax.lax.rsqrt(var + LN_EPS) * g_ref[...] + b_ref[...]
    acc = jnp.dot(xn.astype(COMPUTE_DTYPE), w_ref[...],
                  preferred_element_type=jnp.float32)
    o_ref[...] = (acc + bias_ref[...]).astype(o_ref.dtype)


def _add_ln_mlp_kernel(s_ref, a_ref, g_ref, b_ref, w1_ref, b1_ref,
                       w2_ref, b2_ref, o_ref, acc_ref, xn_ref):
    # grid = (token tiles, Dh tiles); Dh is the reduction axis (innermost).
    k = pl.program_id(1)

    @pl.when(k == 0)
    def _():
        r = s_ref[...].astype(jnp.float32) + a_ref[...].astype(jnp.float32)
        mu = jnp.mean(r, axis=-1, keepdims=True)
        var = jnp.mean(jnp.square(r - mu), axis=-1, keepdims=True)
        xn = (r - mu) * jax.lax.rsqrt(var + LN_EPS) * g_ref[...] + b_ref[...]
        xn_ref[...] = xn.astype(COMPUTE_DTYPE)
        acc_ref[...] = r + b2_ref[...]          # residual + final bias (once)

    h = jnp.dot(xn_ref[...], w1_ref[...],
                preferred_element_type=jnp.float32) + b1_ref[...]
    # TODO(synk): PyTorch nn.GELU default is exact erf; tanh-approx used here.
    h = jax.nn.gelu(h, approximate=True)
    acc_ref[...] += jnp.dot(h.astype(COMPUTE_DTYPE), w2_ref[...],
                            preferred_element_type=jnp.float32)

    @pl.when(k == pl.num_programs(1) - 1)
    def _():
        o_ref[...] = acc_ref[...].astype(o_ref.dtype)


def _window_attn_proj_kernel(qkv_ref, rpb_ref, mask_ref, pw_ref, pb_ref, o_ref):
    # qkv block: (wb, Np, 3C) bf16, columns (3, heads, d)-major, q pre-scaled.
    # rpb: (heads, Np, Np) bf16; mask: (wb, Np, Np) bf16 (pad cols = -1e9).
    # pw: (C, C) bf16 output projection; output block: (wb, Np, C) lane-dense.
    wb, Np, threeC = qkv_ref.shape
    heads = rpb_ref.shape[0]
    C = threeC // 3
    d = C // heads
    mask = mask_ref[...].astype(jnp.float32)
    acc = jnp.zeros((wb * Np, C), jnp.float32) + pb_ref[...]
    for h in range(heads):
        q = qkv_ref[:, :, h * d:(h + 1) * d]
        k = qkv_ref[:, :, C + h * d:C + (h + 1) * d]
        v = qkv_ref[:, :, 2 * C + h * d:2 * C + (h + 1) * d]
        s = jnp.einsum("bnd,bmd->bnm", q, k,
                       preferred_element_type=jnp.float32)
        s = s + rpb_ref[h][None, :, :].astype(jnp.float32) + mask
        s = s - jnp.max(s, axis=-1, keepdims=True)
        p = jnp.exp(s)
        p = p * pl.reciprocal(jnp.sum(p, axis=-1, keepdims=True), approx=True)
        oh = jnp.einsum("bnm,bmd->bnd", p.astype(COMPUTE_DTYPE), v,
                        preferred_element_type=jnp.float32)
        # Fused output projection: proj(concat_h o_h) = sum_h o_h @ Wp[h*d:(h+1)*d]
        acc = acc + jnp.dot(oh.reshape(wb * Np, d).astype(COMPUTE_DTYPE),
                            pw_ref[h * d:(h + 1) * d, :],
                            preferred_element_type=jnp.float32)
    o_ref[...] = acc.reshape(wb, Np, C).astype(o_ref.dtype)


def _pool_ln_head_kernel(x_ref, g_ref, b_ref, w_ref, bias_ref, o_ref):
    x = x_ref[...].astype(jnp.float32)            # (B, L, C)
    p = jnp.mean(x, axis=1)                       # global average pool
    mu = jnp.mean(p, axis=-1, keepdims=True)
    var = jnp.mean(jnp.square(p - mu), axis=-1, keepdims=True)
    pn = (p - mu) * jax.lax.rsqrt(var + LN_EPS) * g_ref[...] + b_ref[...]
    acc = jnp.dot(pn.astype(COMPUTE_DTYPE), w_ref[...],
                  preferred_element_type=jnp.float32)
    o_ref[...] = acc + bias_ref[...]


# --------------------------------------------------------------------------
# Kernel wrappers
# --------------------------------------------------------------------------
def linear(x, w, b=None):
    lead = x.shape[:-1]
    K = x.shape[-1]
    N = w.shape[-1]
    x2 = x.reshape(-1, K).astype(COMPUTE_DTYPE)
    M = x2.shape[0]
    tm, Mp = _m_tiles(M)
    x2 = _pad_rows(x2, Mp)
    bias = (b if b is not None else jnp.zeros((N,), jnp.float32))
    out = pl.pallas_call(
        _matmul_bias_kernel,
        out_shape=jax.ShapeDtypeStruct((Mp, N), COMPUTE_DTYPE),
        grid=(Mp // tm,),
        in_specs=[pl.BlockSpec((tm, K), lambda i: (i, 0)),
                  pl.BlockSpec((K, N), lambda i: (0, 0)),
                  pl.BlockSpec((1, N), lambda i: (0, 0))],
        out_specs=pl.BlockSpec((tm, N), lambda i: (i, 0)),
        compiler_params=_params(1),
        cost_estimate=pl.CostEstimate(
            flops=2 * Mp * K * N, transcendentals=0,
            bytes_accessed=2 * (Mp * K + K * N + Mp * N)),
    )(x2, w, bias.reshape(1, N).astype(jnp.float32))
    return out[:M].reshape(lead + (N,))


def ln_linear(x, g, b, w, bias):
    lead = x.shape[:-1]
    C = x.shape[-1]
    N = w.shape[-1]
    x2 = x.reshape(-1, C).astype(COMPUTE_DTYPE)
    M = x2.shape[0]
    tm, Mp = _m_tiles(M)
    x2 = _pad_rows(x2, Mp)
    out = pl.pallas_call(
        _ln_matmul_kernel,
        out_shape=jax.ShapeDtypeStruct((Mp, N), COMPUTE_DTYPE),
        grid=(Mp // tm,),
        in_specs=[pl.BlockSpec((tm, C), lambda i: (i, 0)),
                  pl.BlockSpec((1, C), lambda i: (0, 0)),
                  pl.BlockSpec((1, C), lambda i: (0, 0)),
                  pl.BlockSpec((C, N), lambda i: (0, 0)),
                  pl.BlockSpec((1, N), lambda i: (0, 0))],
        out_specs=pl.BlockSpec((tm, N), lambda i: (i, 0)),
        compiler_params=_params(1),
        cost_estimate=pl.CostEstimate(
            flops=2 * Mp * C * N, transcendentals=0,
            bytes_accessed=2 * (Mp * C + C * N + Mp * N)),
    )(x2, g.reshape(1, C), b.reshape(1, C), w, bias.reshape(1, N))
    return out[:M].reshape(lead + (N,))


def add_ln_mlp(shortcut, attn, g, b, w1, b1, w2, b2):
    """out = r + MLP(LN(r)) with r = shortcut + attn, fused in one kernel."""
    lead = shortcut.shape[:-1]
    C = shortcut.shape[-1]
    Dh = w1.shape[-1]
    s2 = shortcut.reshape(-1, C).astype(COMPUTE_DTYPE)
    a2 = attn.reshape(-1, C).astype(COMPUTE_DTYPE)
    M = s2.shape[0]
    tm, Mp = _m_tiles(M)
    s2 = _pad_rows(s2, Mp)
    a2 = _pad_rows(a2, Mp)
    tdh = _dh_tile(Dh)
    out = pl.pallas_call(
        _add_ln_mlp_kernel,
        out_shape=jax.ShapeDtypeStruct((Mp, C), COMPUTE_DTYPE),
        grid=(Mp // tm, Dh // tdh),
        in_specs=[pl.BlockSpec((tm, C), lambda i, k: (i, 0)),
                  pl.BlockSpec((tm, C), lambda i, k: (i, 0)),
                  pl.BlockSpec((1, C), lambda i, k: (0, 0)),
                  pl.BlockSpec((1, C), lambda i, k: (0, 0)),
                  pl.BlockSpec((C, tdh), lambda i, k: (0, k)),
                  pl.BlockSpec((1, tdh), lambda i, k: (0, k)),
                  pl.BlockSpec((tdh, C), lambda i, k: (k, 0)),
                  pl.BlockSpec((1, C), lambda i, k: (0, 0))],
        out_specs=pl.BlockSpec((tm, C), lambda i, k: (i, 0)),
        scratch_shapes=[pltpu.VMEM((tm, C), jnp.float32),
                        pltpu.VMEM((tm, C), COMPUTE_DTYPE)],
        input_output_aliases={0: 0},              # residual stream in place
        compiler_params=_params(1, 1),
        cost_estimate=pl.CostEstimate(
            flops=4 * Mp * C * Dh, transcendentals=Mp * Dh,
            bytes_accessed=2 * (3 * Mp * C + 2 * C * Dh)),
    )(s2, a2, g.reshape(1, C), b.reshape(1, C), w1, b1.reshape(1, Dh),
      w2, b2.reshape(1, C))
    return out[:M].reshape(lead + (C,))


def window_attention_proj(qkv, rpb, mask, proj_w, proj_b):
    """qkv: (Bn, Np, 3C) bf16; rpb: (heads, Np, Np); mask: (nW, Np, Np).
    Returns proj(window attention(qkv)) as a lane-dense (Bn, Np, C) tensor."""
    Bn, Np, threeC = qkv.shape
    C = threeC // 3
    heads = rpb.shape[0]
    d = C // heads
    nW = mask.shape[0]
    wb = _pick_window_block(nW, Bn)
    n_mask = nW // wb
    if n_mask == 1:
        mask_map = lambda i: (0, 0, 0)
    else:
        mask_map = lambda i: (i % n_mask, 0, 0)
    return pl.pallas_call(
        _window_attn_proj_kernel,
        out_shape=jax.ShapeDtypeStruct((Bn, Np, C), COMPUTE_DTYPE),
        grid=(Bn // wb,),
        in_specs=[pl.BlockSpec((wb, Np, threeC), lambda i: (i, 0, 0)),
                  pl.BlockSpec((heads, Np, Np), lambda i: (0, 0, 0)),
                  pl.BlockSpec((wb, Np, Np), mask_map),
                  pl.BlockSpec((C, C), lambda i: (0, 0)),
                  pl.BlockSpec((1, C), lambda i: (0, 0))],
        out_specs=pl.BlockSpec((wb, Np, C), lambda i: (i, 0, 0)),
        compiler_params=_params(1),
        cost_estimate=pl.CostEstimate(
            flops=4 * Bn * heads * Np * Np * d + 2 * Bn * Np * C * C,
            transcendentals=Bn * heads * Np * Np,
            bytes_accessed=2 * Bn * Np * (threeC + C)
                           + 2 * (heads + nW) * Np * Np + 2 * C * C),
    )(qkv, rpb, mask, proj_w, proj_b.reshape(1, C).astype(jnp.float32))


def pool_ln_head(x, g, b, w, bias):
    B, L, C = x.shape
    N = w.shape[-1]
    return pl.pallas_call(
        _pool_ln_head_kernel,
        out_shape=jax.ShapeDtypeStruct((B, N), jnp.float32),
        grid=(1,),
        in_specs=[pl.BlockSpec((B, L, C), lambda i: (0, 0, 0)),
                  pl.BlockSpec((1, C), lambda i: (0, 0)),
                  pl.BlockSpec((1, C), lambda i: (0, 0)),
                  pl.BlockSpec((C, N), lambda i: (0, 0)),
                  pl.BlockSpec((1, N), lambda i: (0, 0))],
        out_specs=pl.BlockSpec((B, N), lambda i: (0, 0)),
        compiler_params=pltpu.CompilerParams(
            dimension_semantics=("arbitrary",),
            vmem_limit_bytes=VMEM_LIMIT),
    )(x.astype(COMPUTE_DTYPE), g.reshape(1, C), b.reshape(1, C),
      w, bias.reshape(1, N))


# --------------------------------------------------------------------------
# Model glue (reshapes / rolls / window partition stay in plain JAX)
# --------------------------------------------------------------------------
def _window_partition(x, ws):
    B, H, W, C = x.shape
    nH, nW = H // ws, W // ws
    xw = x.reshape(B, nH, ws, nW, ws, C)
    return jnp.transpose(xw, (0, 1, 3, 2, 4, 5)).reshape(B * nH * nW, ws * ws, C)


def _window_reverse(xw, ws, H, W, B):
    nH, nW = H // ws, W // ws
    x = xw.reshape(B, nH, nW, ws, ws, -1)
    return jnp.transpose(x, (0, 1, 3, 2, 4, 5)).reshape(B, H, W, -1)


def swin_block(x, p, res, ws):
    H, W = res
    B, L, C = x.shape
    shift = p["shift_size"]
    N = ws * ws
    Np = p["n_pad"]

    shortcut = x
    xs = x.reshape(B, H, W, C)
    if shift > 0:
        xs = jnp.roll(xs, shift=(-shift, -shift), axis=(1, 2))
    xw = _window_partition(xs, ws)                       # (Bn, N, C)
    xw = jnp.pad(xw, ((0, 0), (0, Np - N), (0, 0)))      # single token pad

    # fused LN1 + qkv projection; qkv columns are (3, heads, d)-major and the
    # q-scale is pre-folded into the weights, so no transpose is needed.
    qkv = ln_linear(xw, p["norm1_g"], p["norm1_b"], p["qkv_w"], p["qkv_b"])

    # head-batched window attention with the output projection fused in;
    # output comes back lane-dense as (Bn, Np, C).
    o = window_attention_proj(qkv, p["rel_bias"], p["attn_mask"],
                              p["proj_w"], p["proj_b"])
    o = o[:, :N, :]
    xa = _window_reverse(o, ws, H, W, B)
    if shift > 0:
        xa = jnp.roll(xa, shift=(shift, shift), axis=(1, 2))
    xa = xa.reshape(B, L, C)

    # fused (shortcut + attn) residual + LN2 + MLP + residual
    return add_ln_mlp(shortcut, xa, p["norm2_g"], p["norm2_b"],
                      p["mlp_w1"], p["mlp_b1"], p["mlp_w2"], p["mlp_b2"])


def patch_merging(x, p, res):
    H, W = res
    B, L, C = x.shape
    h2, w2 = H // 2, W // 2
    # 'b (h hs w ws) c -> b (h w) (ws hs c)', hs=ws=2
    x = x.reshape(B, h2, 2, w2, 2, C)
    x = jnp.transpose(x, (0, 1, 3, 4, 2, 5)).reshape(B, h2 * w2, 4 * C)
    return ln_linear(x, p["norm_g"], p["norm_b"], p["w"], p["b_zero"])


def swin_forward(params, x):
    B, C, H, W = x.shape
    ps = params["patch_size"]
    h, w = H // ps, W // ps
    # 'b c (h p1) (w p2) -> b (h w) (p1 p2 c)'
    x = x.reshape(B, C, h, ps, w, ps)
    x = jnp.transpose(x, (0, 2, 4, 3, 5, 1)).reshape(B, h * w, ps * ps * C)
    x = linear(x, params["patch_embed"]["w"], params["patch_embed"]["b"])
    # ape=False, drop=0.0 -> identity

    for layer in params["layers"]:
        res = layer["input_resolution"]
        for blk in layer["blocks"]:
            x = swin_block(x, blk, res, layer["window_size"])
        if layer["patch_merging"] is not None:
            x = patch_merging(x, layer["patch_merging"], res)

    return pool_ln_head(x, params["head_norm_g"], params["head_norm_b"],
                        params["head_w"], params["head_b"])


# --------------------------------------------------------------------------
# Deterministic parameter construction (weights bf16, LN/bias fp32)
# --------------------------------------------------------------------------
def _linear_params(key, in_dim, out_dim, bias=True):
    w = jax.random.normal(key, (in_dim, out_dim), jnp.float32) * 0.02
    b = jnp.zeros((out_dim,), jnp.float32) if bias else None
    return w, b


def _relative_position_index(ws):
    coords = np.stack(np.meshgrid(np.arange(ws), np.arange(ws), indexing="ij"))
    cf = coords.reshape(2, -1)
    rel = (cf[:, :, None] - cf[:, None, :]).transpose(1, 2, 0).astype(np.int64)
    rel[:, :, 0] += ws - 1
    rel[:, :, 1] += ws - 1
    rel[:, :, 0] *= 2 * ws - 1
    return rel.sum(-1)                                   # np (N, N)


def _build_attn_mask(res, ws, shift, Np):
    """(nW, Np, Np) bf16: shifted-window mask plus -1e9 on padded keys."""
    H, W = res
    N = ws * ws
    nW = (H // ws) * (W // ws)
    if shift > 0:
        img_mask = np.zeros((H, W), np.float32)
        cnt = 0
        for hsl in (slice(0, -ws), slice(-ws, -shift), slice(-shift, None)):
            for wsl in (slice(0, -ws), slice(-ws, -shift), slice(-shift, None)):
                img_mask[hsl, wsl] = cnt
                cnt += 1
        mw = img_mask.reshape(H // ws, ws, W // ws, ws)
        mw = mw.transpose(0, 2, 1, 3).reshape(nW, N)
        am = mw[:, None, :] - mw[:, :, None]
        am = np.where(am != 0, -100.0, 0.0).astype(np.float32)
    else:
        am = np.zeros((nW, N, N), np.float32)
    out = np.zeros((nW, Np, Np), np.float32)
    out[:, :N, :N] = am
    out[:, :, N:] = -1e9                                  # mask padded keys
    return jnp.asarray(out).astype(COMPUTE_DTYPE)


def init_swin_params(key, *, image_size, channels, patch_size, dim, depths,
                     num_heads, mlp_ratio, window_size, num_classes):
    keys = iter(jax.random.split(key, 256))
    nk = lambda: next(keys)

    pr = (image_size // patch_size, image_size // patch_size)
    patch_dim = channels * patch_size * patch_size
    params = {"patch_size": patch_size}

    w, b = _linear_params(nk(), patch_dim, dim)
    params["patch_embed"] = {"w": w.astype(COMPUTE_DTYPE), "b": b}

    num_layers = len(depths)
    dims = [dim * 2 ** i for i in range(num_layers)]
    resolutions = [(pr[0] // 2 ** i, pr[1] // 2 ** i) for i in range(num_layers)]

    ws = window_size
    N = ws * ws
    Np = _round_up(N, 16)          # bf16 sublane packing (e.g. 49 -> 64)
    rel_index = _relative_position_index(ws)

    layers = []
    for li in range(num_layers):
        d_, res, heads = dims[li], resolutions[li], num_heads[li]
        hd = d_ // heads
        blocks = []
        for bi in range(depths[li]):
            shift = 0 if bi % 2 == 0 else ws // 2
            qkv_w, qkv_b = _linear_params(nk(), d_, 3 * d_)
            # qkv columns are (3, heads, d)-major; fold q-scale into q columns.
            scale = float(hd) ** -0.5
            qkv_w = qkv_w.at[:, :d_].multiply(scale)
            qkv_b = qkv_b.at[:d_].multiply(scale)
            proj_w, proj_b = _linear_params(nk(), d_, d_)
            rpb_table = jax.random.normal(
                nk(), ((2 * ws - 1) ** 2, heads), jnp.float32) * 0.02
            rpb = rpb_table[rel_index.reshape(-1)].reshape(N, N, heads)
            rpb = jnp.transpose(rpb, (2, 0, 1))           # (heads, N, N)
            rpb = jnp.pad(rpb, ((0, 0), (0, Np - N), (0, Np - N)))
            mlp_dim = int(d_ * mlp_ratio)
            mlp_w1, mlp_b1 = _linear_params(nk(), d_, mlp_dim)
            mlp_w2, mlp_b2 = _linear_params(nk(), mlp_dim, d_)
            blk = {
                "shift_size": shift, "num_heads": heads, "n_pad": Np,
                "norm1_g": jnp.ones((d_,), jnp.float32),
                "norm1_b": jnp.zeros((d_,), jnp.float32),
                "norm2_g": jnp.ones((d_,), jnp.float32),
                "norm2_b": jnp.zeros((d_,), jnp.float32),
                "qkv_w": qkv_w.astype(COMPUTE_DTYPE), "qkv_b": qkv_b,
                "proj_w": proj_w.astype(COMPUTE_DTYPE), "proj_b": proj_b,
                "rel_bias": rpb.astype(COMPUTE_DTYPE),
                "attn_mask": _build_attn_mask(res, ws, shift, Np),
                "mlp_w1": mlp_w1.astype(COMPUTE_DTYPE), "mlp_b1": mlp_b1,
                "mlp_w2": mlp_w2.astype(COMPUTE_DTYPE), "mlp_b2": mlp_b2,
            }
            blocks.append(blk)
        layer = {"blocks": blocks, "input_resolution": res, "window_size": ws}
        if li < num_layers - 1:
            pm_w, _ = _linear_params(nk(), 4 * d_, 2 * d_, bias=False)
            layer["patch_merging"] = {
                "norm_g": jnp.ones((4 * d_,), jnp.float32),
                "norm_b": jnp.zeros((4 * d_,), jnp.float32),
                "w": pm_w.astype(COMPUTE_DTYPE),
                "b_zero": jnp.zeros((2 * d_,), jnp.float32),
            }
        else:
            layer["patch_merging"] = None
        layers.append(layer)
    params["layers"] = layers

    params["head_norm_g"] = jnp.ones((dims[-1],), jnp.float32)
    params["head_norm_b"] = jnp.zeros((dims[-1],), jnp.float32)
    hw, hb = _linear_params(nk(), dims[-1], num_classes)
    params["head_w"] = hw.astype(COMPUTE_DTYPE)
    params["head_b"] = hb
    return params


# --------------------------------------------------------------------------
if __name__ == "__main__":
    key = jax.random.PRNGKey(0)
    kx, kp = jax.random.split(key)

    # Small config: image 16x16, patch 4 -> 4x4 tokens, dims (16, 32),
    # depths (2, 2), heads (2, 4), window 2, 10 classes.
    x = jax.random.normal(kx, (2, 3, 16, 16), jnp.float32)
    params = init_swin_params(
        kp, image_size=16, channels=3, patch_size=4, dim=16,
        depths=(2, 2), num_heads=(2, 4), mlp_ratio=4, window_size=2,
        num_classes=10)

    fwd = jax.jit(functools.partial(swin_forward, params))
    out = jax.block_until_ready(fwd(x))
    assert out.shape == (2, 10), out.shape
    assert bool(jnp.all(jnp.isfinite(out)))
    print("KERNEL_OK")
</pallas_src>

<mosaic_0001>
module attributes {stable_mosaic.version = 11 : i64} {
  func.func @_matmul_bias_kernel(%arg0: i32, %arg1: memref<16x48xbf16, #tpu.memory_space<vmem>>, %arg2: memref<48x16xbf16, #tpu.memory_space<vmem>>, %arg3: memref<1x16xf32, #tpu.memory_space<vmem>>, %arg4: memref<16x16xbf16, #tpu.memory_space<vmem>>) attributes {dimension_semantics = [#tpu.dimension_semantics<parallel>], iteration_bounds = array<i64: 2>, scalar_prefetch = 0 : i64, scratch_operands = 0 : i64, tpu.core_type = #tpu.core_type<tc>, window_params = [{transform_indices = @transform_0, window_bounds = array<i64: 16, 48>}, {pipeline_mode = #tpu.pipeline_mode<synchronous>, transform_indices = @transform_1, window_bounds = array<i64: 48, 16>}, {pipeline_mode = #tpu.pipeline_mode<synchronous>, transform_indices = @transform_2, window_bounds = array<i64: 1, 16>}, {transform_indices = @transform_3, window_bounds = array<i64: 16, 16>}]} {
    %c0 = arith.constant 0 : index
    %c0_0 = arith.constant 0 : index
    %0 = vector.load %arg1[%c0, %c0_0] : memref<16x48xbf16, #tpu.memory_space<vmem>>, vector<16x48xbf16>
    %c0_1 = arith.constant 0 : index
    %c0_2 = arith.constant 0 : index
    %1 = vector.load %arg2[%c0_1, %c0_2] : memref<48x16xbf16, #tpu.memory_space<vmem>>, vector<48x16xbf16>
    %cst = arith.constant dense<0.000000e+00> : vector<16x16xf32>
    %2 = tpu.matmul %0, %1, %cst {dimension_numbers = #tpu.dot_dimension_numbers<[1], [0], [0], [1], [0, 0, 1, 1], [], []>} : vector<16x48xbf16>, vector<48x16xbf16>, vector<16x16xf32> -> vector<16x16xf32>
    %c0_3 = arith.constant 0 : index
    %c0_4 = arith.constant 0 : index
    %3 = vector.load %arg3[%c0_3, %c0_4] : memref<1x16xf32, #tpu.memory_space<vmem>>, vector<1x16xf32>
    %4 = vector.broadcast %3 : vector<1x16xf32> to vector<16x16xf32>
    %5 = arith.addf %2, %4 : vector<16x16xf32>
    %6 = arith.truncf %5 : vector<16x16xf32> to vector<16x16xbf16>
    %c0_5 = arith.constant 0 : index
    %c0_6 = arith.constant 0 : index
    %7 = vector.load %arg4[%c0_5, %c0_6] : memref<16x16xbf16, #tpu.memory_space<vmem>>, vector<16x16xbf16>
    tpu.vector_store %arg4[%c0_5, %c0_6], %6 {strides = array<i32>} : memref<16x16xbf16, #tpu.memory_space<vmem>>, vector<16x16xbf16>,
    return
  }
  func.func @transform_0(%arg0: i32) -> (i32, i32) {
    %c0_i32 = arith.constant 0 : i32
    %c0_i32_0 = arith.constant 0 : i32
    return %arg0, %c0_i32 : i32, i32
  }
  func.func @transform_1(%arg0: i32) -> (i32, i32) {
    %c0_i32 = arith.constant 0 : i32
    %c0_i32_0 = arith.constant 0 : i32
    %c0_i32_1 = arith.constant 0 : i32
    return %c0_i32, %c0_i32_0 : i32, i32
  }
  func.func @transform_2(%arg0: i32) -> (i32, i32) {
    %c0_i32 = arith.constant 0 : i32
    %c0_i32_0 = arith.constant 0 : i32
    %c0_i32_1 = arith.constant 0 : i32
    return %c0_i32, %c0_i32_0 : i32, i32
  }
  func.func @transform_3(%arg0: i32) -> (i32, i32) {
    %c0_i32 = arith.constant 0 : i32
    %c0_i32_0 = arith.constant 0 : i32
    return %arg0, %c0_i32 : i32, i32
  }
}

module attributes {stable_mosaic.version = 11 : i64} {
  func.func @_window_attn_proj_kernel(%arg0: i32, %arg1: memref<4x16x48xbf16, #tpu.memory_space<vmem>>, %arg2: memref<2x16x16xbf16, #tpu.memory_space<vmem>>, %arg3: memref<4x16x16xbf16, #tpu.memory_space<vmem>>, %arg4: memref<16x16xbf16, #tpu.memory_space<vmem>>, %arg5: memref<1x16xf32, #tpu.memory_space<vmem>>, %arg6: memref<4x16x16xbf16, #tpu.memory_space<vmem>>) attributes {dimension_semantics = [#tpu.dimension_semantics<parallel>], iteration_bounds = array<i64: 2>, scalar_prefetch = 0 : i64, scratch_operands = 0 : i64, tpu.core_type = #tpu.core_type<tc>, window_params = [{transform_indices = @transform_0, window_bounds = array<i64: 4, 16, 48>}, {pipeline_mode = #tpu.pipeline_mode<synchronous>, transform_indices = @transform_1, window_bounds = array<i64: 2, 16, 16>}, {pipeline_mode = #tpu.pipeline_mode<synchronous>, transform_indices = @transform_2, window_bounds = array<i64: 4, 16, 16>}, {pipeline_mode = #tpu.pipeline_mode<synchronous>, transform_indices = @transform_3, window_bounds = array<i64: 16, 16>}, {pipeline_mode = #tpu.pipeline_mode<synchronous>, transform_indices = @transform_4, window_bounds = array<i64: 1, 16>}, {transform_indices = @transform_5, window_bounds = array<i64: 4, 16, 16>}]} {
    %c0 = arith.constant 0 : index
    %c0_0 = arith.constant 0 : index
    %c0_1 = arith.constant 0 : index
    %0 = vector.load %arg3[%c0, %c0_0, %c0_1] : memref<4x16x16xbf16, #tpu.memory_space<vmem>>, vector<4x16x16xbf16>
    %1 = arith.extf %0 : vector<4x16x16xbf16> to vector<4x16x16xf32>
    %cst = arith.constant 0.000000e+00 : f32
    %2 = vector.broadcast %cst : f32 to vector<64x16xf32>
    %c0_2 = arith.constant 0 : index
    %c0_3 = arith.constant 0 : index
    %3 = vector.load %arg5[%c0_2, %c0_3] : memref<1x16xf32, #tpu.memory_space<vmem>>, vector<1x16xf32>
    %4 = vector.broadcast %3 : vector<1x16xf32> to vector<64x16xf32>
    %5 = arith.addf %2, %4 : vector<64x16xf32>
    %c0_4 = arith.constant 0 : index
    %c0_5 = arith.constant 0 : index
    %c0_6 = arith.constant 0 : index
    %6 = vector.load %arg1[%c0_4, %c0_5, %c0_6] : memref<4x16x48xbf16, #tpu.memory_space<vmem>>, vector<4x16x8xbf16>
    %c0_7 = arith.constant 0 : index
    %c0_8 = arith.constant 0 : index
    %c16 = arith.constant 16 : index
    %7 = vector.load %arg1[%c0_7, %c0_8, %c16] : memref<4x16x48xbf16, #tpu.memory_space<vmem>>, vector<4x16x8xbf16>
    %c0_9 = arith.constant 0 : index
    %c0_10 = arith.constant 0 : index
    %c32 = arith.constant 32 : index
    %8 = vector.load %arg1[%c0_9, %c0_10, %c32] : memref<4x16x48xbf16, #tpu.memory_space<vmem>>, vector<4x16x8xbf16>
    "tpu.trace_start"() <{level = 10 : i32, message = "bnd,bmd->bnm"}> : () -> ()
    %cst_11 = arith.constant dense<0.000000e+00> : vector<4x16x16xf32>
    %9 = tpu.matmul %6, %7, %cst_11 {dimension_numbers = #tpu.dot_dimension_numbers<[2], [2], [1], [1], [0, 0, 0, 1, 1, 1], [0], [0]>} : vector<4x16x8xbf16>, vector<4x16x8xbf16>, vector<4x16x16xf32> -> vector<4x16x16xf32>
    "tpu.trace_stop"() : () -> ()
    %c0_12 = arith.constant 0 : index
    %c0_13 = arith.constant 0 : index
    %c0_14 = arith.constant 0 : index
    %10 = vector.load %arg2[%c0_12, %c0_13, %c0_14] : memref<2x16x16xbf16, #tpu.memory_space<vmem>>, vector<1x16x16xbf16>
    %11 = vector.shape_cast %10 : vector<1x16x16xbf16> to vector<16x16xbf16>
    %12 = vector.shape_cast %11 : vector<16x16xbf16> to vector<1x16x16xbf16>
    %13 = arith.extf %12 : vector<1x16x16xbf16> to vector<1x16x16xf32>
    %14 = vector.broadcast %13 : vector<1x16x16xf32> to vector<4x16x16xf32>
    %15 = arith.addf %9, %14 : vector<4x16x16xf32>
    %16 = arith.addf %15, %1 : vector<4x16x16xf32>
    %cst_15 = arith.constant dense<0xFF800000> : vector<4x16xf32>
    %17 = vector.multi_reduction <maximumf>, %16, %cst_15 [2] : vector<4x16x16xf32> to vector<4x16xf32>
    %18 = vector.shape_cast %17 : vector<4x16xf32> to vector<4x16x1xf32>
    %19 = vector.broadcast %18 : vector<4x16x1xf32> to vector<4x16x16xf32>
    %20 = arith.subf %16, %19 : vector<4x16x16xf32>
    %21 = math.exp %20 : vector<4x16x16xf32>
    %cst_16 = arith.constant dense<0.000000e+00> : vector<4x16xf32>
    %22 = vector.multi_reduction <add>, %21, %cst_16 [2] : vector<4x16x16xf32> to vector<4x16xf32>
    %23 = vector.shape_cast %22 : vector<4x16xf32> to vector<4x16x1xf32>
    %24 = tpu.reciprocal %23 {approx = true} : vector<4x16x1xf32> -> vector<4x16x1xf32>
    %25 = vector.broadcast %24 : vector<4x16x1xf32> to vector<4x16x16xf32>
    %26 = arith.mulf %21, %25 : vector<4x16x16xf32>
    %27 = arith.truncf %26 : vector<4x16x16xf32> to vector<4x16x16xbf16>
    "tpu.trace_start"() <{level = 10 : i32, message = "bnm,bmd->bnd"}> : () -> ()
    %cst_17 = arith.constant dense<0.000000e+00> : vector<4x16x8xf32>
    %28 = tpu.matmul %27, %8, %cst_17 {dimension_numbers = #tpu.dot_dimension_numbers<[2], [1], [1], [2], [0, 0, 0, 1, 1, 2], [0], [0]>} : vector<4x16x16xbf16>, vector<4x16x8xbf16>, vector<4x16x8xf32> -> vector<4x16x8xf32>
    "tpu.trace_stop"() : () -> ()
    %29 = vector.shape_cast %28 : vector<4x16x8xf32> to vector<64x8xf32>
    %30 = arith.truncf %29 : vector<64x8xf32> to vector<64x8xbf16>
    %c0_18 = arith.constant 0 : index
    %c0_19 = arith.constant 0 : index
    %31 = vector.load %arg4[%c0_18, %c0_19] : memref<16x16xbf16, #tpu.memory_space<vmem>>, vector<8x16xbf16>
    %cst_20 = arith.constant dense<0.000000e+00> : vector<64x16xf32>
    %32 = tpu.matmul %30, %31, %cst_20 {dimension_numbers = #tpu.dot_dimension_numbers<[1], [0], [0], [1], [0, 0, 1, 1], [], []>} : vector<64x8xbf16>, vector<8x16xbf16>, vector<64x16xf32> -> vector<64x16xf32>
    %33 = arith.addf %5, %32 : vector<64x16xf32>
    %c0_21 = arith.constant 0 : index
    %c0_22 = arith.constant 0 : index
    %c8 = arith.constant 8 : index
    %34 = vector.load %arg1[%c0_21, %c0_22, %c8] : memref<4x16x48xbf16, #tpu.memory_space<vmem>>, vector<4x16x8xbf16>
    %c0_23 = arith.constant 0 : index
    %c0_24 = arith.constant 0 : index
    %c24 = arith.constant 24 : index
    %35 = vector.load %arg1[%c0_23, %c0_24, %c24] : memref<4x16x48xbf16, #tpu.memory_space<vmem>>, vector<4x16x8xbf16>
    %c0_25 = arith.constant 0 : index
    %c0_26 = arith.constant 0 : index
    %c40 = arith.constant 40 : index
    %36 = vector.load %arg1[%c0_25, %c0_26, %c40] : memref<4x16x48xbf16, #tpu.memory_space<vmem>>, vector<4x16x8xbf16>
    "tpu.trace_start"() <{level = 10 : i32, message = "bnd,bmd->bnm"}> : () -> ()
    %cst_27 = arith.constant dense<0.000000e+00> : vector<4x16x16xf32>
    %37 = tpu.matmul %34, %35, %cst_27 {dimension_numbers = #tpu.dot_dimension_numbers<[2], [2], [1], [1], [0, 0, 0, 1, 1, 1], [0], [0]>} : vector<4x16x8xbf16>, vector<4x16x8xbf16>, vector<4x16x16xf32> -> vector<4x16x16xf32>
    "tpu.trace_stop"() : () -> ()
    %c1 = arith.constant 1 : index
    %c0_28 = arith.constant 0 : index
    %c0_29 = arith.constant 0 : index
    %38 = vector.load %arg2[%c1, %c0_28, %c0_29] : memref<2x16x16xbf16, #tpu.memory_space<vmem>>, vector<1x16x16xbf16>
    %39 = vector.shape_cast %38 : vector<1x16x16xbf16> to vector<16x16xbf16>
    %40 = vector.shape_cast %39 : vector<16x16xbf16> to vector<1x16x16xbf16>
    %41 = arith.extf %40 : vector<1x16x16xbf16> to vector<1x16x16xf32>
    %42 = vector.broadcast %41 : vector<1x16x16xf32> to vector<4x16x16xf32>
    %43 = arith.addf %37, %42 : vector<4x16x16xf32>
    %44 = arith.addf %43, %1 : vector<4x16x16xf32>
    %cst_30 = arith.constant dense<0xFF800000> : vector<4x16xf32>
    %45 = vector.multi_reduction <maximumf>, %44, %cst_30 [2] : vector<4x16x16xf32> to vector<4x16xf32>
    %46 = vector.shape_cast %45 : vector<4x16xf32> to vector<4x16x1xf32>
    %47 = vector.broadcast %46 : vector<4x16x1xf32> to vector<4x16x16xf32>
    %48 = arith.subf %44, %47 : vector<4x16x16xf32>
    %49 = math.exp %48 : vector<4x16x16xf32>
    %cst_31 = arith.constant dense<0.000000e+00> : vector<4x16xf32>
    %50 = vector.multi_reduction <add>, %49, %cst_31 [2] : vector<4x16x16xf32> to vector<4x16xf32>
    %51 = vector.shape_cast %50 : vector<4x16xf32> to vector<4x16x1xf32>
    %52 = tpu.reciprocal %51 {approx = true} : vector<4x16x1xf32> -> vector<4x16x1xf32>
    %53 = vector.broadcast %52 : vector<4x16x1xf32> to vector<4x16x16xf32>
    %54 = arith.mulf %49, %53 : vector<4x16x16xf32>
    %55 = arith.truncf %54 : vector<4x16x16xf32> to vector<4x16x16xbf16>
    "tpu.trace_start"() <{level = 10 : i32, message = "bnm,bmd->bnd"}> : () -> ()
    %cst_32 = arith.constant dense<0.000000e+00> : vector<4x16x8xf32>
    %56 = tpu.matmul %55, %36, %cst_32 {dimension_numbers = #tpu.dot_dimension_numbers<[2], [1], [1], [2], [0, 0, 0, 1, 1, 2], [0], [0]>} : vector<4x16x16xbf16>, vector<4x16x8xbf16>, vector<4x16x8xf32> -> vector<4x16x8xf32>
    "tpu.trace_stop"() : () -> ()
    %57 = vector.shape_cast %56 : vector<4x16x8xf32> to vector<64x8xf32>
    %58 = arith.truncf %57 : vector<64x8xf32> to vector<64x8xbf16>
    %c8_33 = arith.constant 8 : index
    %c0_34 = arith.constant 0 : index
    %59 = vector.load %arg4[%c8_33, %c0_34] : memref<16x16xbf16, #tpu.memory_space<vmem>>, vector<8x16xbf16>
    %cst_35 = arith.constant dense<0.000000e+00> : vector<64x16xf32>
    %60 = tpu.matmul %58, %59, %cst_35 {dimension_numbers = #tpu.dot_dimension_numbers<[1], [0], [0], [1], [0, 0, 1, 1], [], []>} : vector<64x8xbf16>, vector<8x16xbf16>, vector<64x16xf32> -> vector<64x16xf32>
    %61 = arith.addf %33, %60 : vector<64x16xf32>
    %62 = vector.shape_cast %61 : vector<64x16xf32> to vector<4x16x16xf32>
    %63 = arith.truncf %62 : vector<4x16x16xf32> to vector<4x16x16xbf16>
    %c0_36 = arith.constant 0 : index
    %c0_37 = arith.constant 0 : index
    %c0_38 = arith.constant 0 : index
    %64 = vector.load %arg6[%c0_36, %c0_37, %c0_38] : memref<4x16x16xbf16, #tpu.memory_space<vmem>>, vector<4x16x16xbf16>
    tpu.vector_store %arg6[%c0_36, %c0_37, %c0_38], %63 {strides = array<i32>} : memref<4x16x16xbf16, #tpu.memory_space<vmem>>, vector<4x16x16xbf16>,
    return
  }
  func.func @transform_0(%arg0: i32) -> (i32, i32, i32) {
    %c0_i32 = arith.constant 0 : i32
    %c0_i32_0 = arith.constant 0 : i32
    %c0_i32_1 = arith.constant 0 : i32
    return %arg0, %c0_i32, %c0_i32_0 : i32, i32, i32
  }
  func.func @transform_1(%arg0: i32) -> (i32, i32, i32) {
    %c0_i32 = arith.constant 0 : i32
    %c0_i32_0 = arith.constant 0 : i32
    %c0_i32_1 = arith.constant 0 : i32
    %c0_i32_2 = arith.constant 0 : i32
    return %c0_i32, %c0_i32_0, %c0_i32_1 : i32, i32, i32
  }
  func.func @transform_2(%arg0: i32) -> (i32, i32, i32) {
    %c0_i32 = arith.constant 0 : i32
    %c0_i32_0 = arith.constant 0 : i32
    %c0_i32_1 = arith.constant 0 : i32
    %c0_i32_2 = arith.constant 0 : i32
    return %c0_i32, %c0_i32_0, %c0_i32_1 : i32, i32, i32
  }
  func.func @transform_3(%arg0: i32) -> (i32, i32) {
    %c0_i32 = arith.constant 0 : i32
    %c0_i32_0 = arith.constant 0 : i32
    %c0_i32_1 = arith.constant 0 : i32
    return %c0_i32, %c0_i32_0 : i32, i32
  }
  func.func @transform_4(%arg0: i32) -> (i32, i32) {
    %c0_i32 = arith.constant 0 : i32
    %c0_i32_0 = arith.constant 0 : i32
    %c0_i32_1 = arith.constant 0 : i32
    return %c0_i32, %c0_i32_0 : i32, i32
  }
  func.func @transform_5(%arg0: i32) -> (i32, i32, i32) {
    %c0_i32 = arith.constant 0 : i32
    %c0_i32_0 = arith.constant 0 : i32
    %c0_i32_1 = arith.constant 0 : i32
    return %arg0, %c0_i32, %c0_i32_0 : i32, i32, i32
  }
}

module attributes {stable_mosaic.version = 11 : i64} {
  func.func @_ln_matmul_kernel(%arg0: i32, %arg1: memref<64x16xbf16, #tpu.memory_space<vmem>>, %arg2: memref<1x16xf32, #tpu.memory_space<vmem>>, %arg3: memref<1x16xf32, #tpu.memory_space<vmem>>, %arg4: memref<16x48xbf16, #tpu.memory_space<vmem>>, %arg5: memref<1x48xf32, #tpu.memory_space<vmem>>, %arg6: memref<64x48xbf16, #tpu.memory_space<vmem>>) attributes {dimension_semantics = [#tpu.dimension_semantics<parallel>], iteration_bounds = array<i64: 2>, scalar_prefetch = 0 : i64, scratch_operands = 0 : i64, tpu.core_type = #tpu.core_type<tc>, window_params = [{transform_indices = @transform_0, window_bounds = array<i64: 64, 16>}, {pipeline_mode = #tpu.pipeline_mode<synchronous>, transform_indices = @transform_1, window_bounds = array<i64: 1, 16>}, {pipeline_mode = #tpu.pipeline_mode<synchronous>, transform_indices = @transform_2, window_bounds = array<i64: 1, 16>}, {pipeline_mode = #tpu.pipeline_mode<synchronous>, transform_indices = @transform_3, window_bounds = array<i64: 16, 48>}, {pipeline_mode = #tpu.pipeline_mode<synchronous>, transform_indices = @transform_4, window_bounds = array<i64: 1, 48>}, {transform_indices = @transform_5, window_bounds = array<i64: 64, 48>}]} {
    %c0 = arith.constant 0 : index
    %c0_0 = arith.constant 0 : index
    %0 = vector.load %arg1[%c0, %c0_0] : memref<64x16xbf16, #tpu.memory_space<vmem>>, vector<64x16xbf16>
    %1 = arith.extf %0 : vector<64x16xbf16> to vector<64x16xf32>
    %cst = arith.constant dense<0.000000e+00> : vector<64xf32>
    %2 = vector.multi_reduction <add>, %1, %cst [1] : vector<64x16xf32> to vector<64xf32>
    %3 = vector.shape_cast %2 : vector<64xf32> to vector<64x1xf32>
    %cst_1 = arith.constant 1.600000e+01 : f32
    %4 = vector.broadcast %cst_1 : f32 to vector<64x1xf32>
    %5 = arith.divf %3, %4 : vector<64x1xf32>
    %6 = vector.broadcast %5 : vector<64x1xf32> to vector<64x16xf32>
    %7 = arith.subf %1, %6 : vector<64x16xf32>
    %8 = arith.mulf %7, %7 : vector<64x16xf32>
    %cst_2 = arith.constant dense<0.000000e+00> : vector<64xf32>
    %9 = vector.multi_reduction <add>, %8, %cst_2 [1] : vector<64x16xf32> to vector<64xf32>
    %10 = vector.shape_cast %9 : vector<64xf32> to vector<64x1xf32>
    %cst_3 = arith.constant 1.600000e+01 : f32
    %11 = vector.broadcast %cst_3 : f32 to vector<64x1xf32>
    %12 = arith.divf %10, %11 : vector<64x1xf32>
    %13 = vector.broadcast %5 : vector<64x1xf32> to vector<64x16xf32>
    %14 = arith.subf %1, %13 : vector<64x16xf32>
    %cst_4 = arith.constant 9.99999974E-6 : f32
    %15 = vector.broadcast %cst_4 : f32 to vector<64x1xf32>
    %16 = arith.addf %12, %15 : vector<64x1xf32>
    %17 = math.rsqrt %16 : vector<64x1xf32>
    %18 = vector.broadcast %17 : vector<64x1xf32> to vector<64x16xf32>
    %19 = arith.mulf %14, %18 : vector<64x16xf32>
    %c0_5 = arith.constant 0 : index
    %c0_6 = arith.constant 0 : index
    %20 = vector.load %arg2[%c0_5, %c0_6] : memref<1x16xf32, #tpu.memory_space<vmem>>, vector<1x16xf32>
    %21 = vector.broadcast %20 : vector<1x16xf32> to vector<64x16xf32>
    %22 = arith.mulf %19, %21 : vector<64x16xf32>
    %c0_7 = arith.constant 0 : index
    %c0_8 = arith.constant 0 : index
    %23 = vector.load %arg3[%c0_7, %c0_8] : memref<1x16xf32, #tpu.memory_space<vmem>>, vector<1x16xf32>
    %24 = vector.broadcast %23 : vector<1x16xf32> to vector<64x16xf32>
    %25 = arith.addf %22, %24 : vector<64x16xf32>
    %26 = arith.truncf %25 : vector<64x16xf32> to vector<64x16xbf16>
    %c0_9 = arith.constant 0 : index
    %c0_10 = arith.constant 0 : index
    %27 = vector.load %arg4[%c0_9, %c0_10] : memref<16x48xbf16, #tpu.memory_space<vmem>>, vector<16x48xbf16>
    %cst_11 = arith.constant dense<0.000000e+00> : vector<64x48xf32>
    %28 = tpu.matmul %26, %27, %cst_11 {dimension_numbers = #tpu.dot_dimension_numbers<[1], [0], [0], [1], [0, 0, 1, 1], [], []>} : vector<64x16xbf16>, vector<16x48xbf16>, vector<64x48xf32> -> vector<64x48xf32>
    %c0_12 = arith.constant 0 : index
    %c0_13 = arith.constant 0 : index
    %29 = vector.load %arg5[%c0_12, %c0_13] : memref<1x48xf32, #tpu.memory_space<vmem>>, vector<1x48xf32>
    %30 = vector.broadcast %29 : vector<1x48xf32> to vector<64x48xf32>
    %31 = arith.addf %28, %30 : vector<64x48xf32>
    %32 = arith.truncf %31 : vector<64x48xf32> to vector<64x48xbf16>
    %c0_14 = arith.constant 0 : index
    %c0_15 = arith.constant 0 : index
    %33 = vector.load %arg6[%c0_14, %c0_15] : memref<64x48xbf16, #tpu.memory_space<vmem>>, vector<64x48xbf16>
    tpu.vector_store %arg6[%c0_14, %c0_15], %32 {strides = array<i32>} : memref<64x48xbf16, #tpu.memory_space<vmem>>, vector<64x48xbf16>,
    return
  }
  func.func @transform_0(%arg0: i32) -> (i32, i32) {
    %c0_i32 = arith.constant 0 : i32
    %c0_i32_0 = arith.constant 0 : i32
    return %arg0, %c0_i32 : i32, i32
  }
  func.func @transform_1(%arg0: i32) -> (i32, i32) {
    %c0_i32 = arith.constant 0 : i32
    %c0_i32_0 = arith.constant 0 : i32
    %c0_i32_1 = arith.constant 0 : i32
    return %c0_i32, %c0_i32_0 : i32, i32
  }
  func.func @transform_2(%arg0: i32) -> (i32, i32) {
    %c0_i32 = arith.constant 0 : i32
    %c0_i32_0 = arith.constant 0 : i32
    %c0_i32_1 = arith.constant 0 : i32
    return %c0_i32, %c0_i32_0 : i32, i32
  }
  func.func @transform_3(%arg0: i32) -> (i32, i32) {
    %c0_i32 = arith.constant 0 : i32
    %c0_i32_0 = arith.constant 0 : i32
    %c0_i32_1 = arith.constant 0 : i32
    return %c0_i32, %c0_i32_0 : i32, i32
  }
  func.func @transform_4(%arg0: i32) -> (i32, i32) {
    %c0_i32 = arith.constant 0 : i32
    %c0_i32_0 = arith.constant 0 : i32
    %c0_i32_1 = arith.constant 0 : i32
    return %c0_i32, %c0_i32_0 : i32, i32
  }
  func.func @transform_5(%arg0: i32) -> (i32, i32) {
    %c0_i32 = arith.constant 0 : i32
    %c0_i32_0 = arith.constant 0 : i32
    return %arg0, %c0_i32 : i32, i32
  }
}

module attributes {stable_mosaic.version = 11 : i64} {
  func.func @_add_ln_mlp_kernel(%arg0: i32, %arg1: i32, %arg2: memref<16x16xbf16, #tpu.memory_space<vmem>>, %arg3: memref<16x16xbf16, #tpu.memory_space<vmem>>, %arg4: memref<1x16xf32, #tpu.memory_space<vmem>>, %arg5: memref<1x16xf32, #tpu.memory_space<vmem>>, %arg6: memref<16x64xbf16, #tpu.memory_space<vmem>>, %arg7: memref<1x64xf32, #tpu.memory_space<vmem>>, %arg8: memref<64x16xbf16, #tpu.memory_space<vmem>>, %arg9: memref<1x16xf32, #tpu.memory_space<vmem>>, %arg10: memref<16x16xbf16, #tpu.memory_space<vmem>>, %arg11: memref<16x16xf32, #tpu.memory_space<vmem>>, %arg12: memref<16x16xbf16, #tpu.memory_space<vmem>>) attributes {dimension_semantics = [#tpu.dimension_semantics<parallel>, #tpu.dimension_semantics<arbitrary>], iteration_bounds = array<i64: 2, 1>, scalar_prefetch = 0 : i64, scratch_operands = 2 : i64, tpu.core_type = #tpu.core_type<tc>, window_params = [{transform_indices = @transform_0, window_bounds = array<i64: 16, 16>}, {transform_indices = @transform_1, window_bounds = array<i64: 16, 16>}, {pipeline_mode = #tpu.pipeline_mode<synchronous>, transform_indices = @transform_2, window_bounds = array<i64: 1, 16>}, {pipeline_mode = #tpu.pipeline_mode<synchronous>, transform_indices = @transform_3, window_bounds = array<i64: 1, 16>}, {transform_indices = @transform_4, window_bounds = array<i64: 16, 64>}, {transform_indices = @transform_5, window_bounds = array<i64: 1, 64>}, {transform_indices = @transform_6, window_bounds = array<i64: 64, 16>}, {pipeline_mode = #tpu.pipeline_mode<synchronous>, transform_indices = @transform_7, window_bounds = array<i64: 1, 16>}, {transform_indices = @transform_8, window_bounds = array<i64: 16, 16>}]} {
    %c0_i32 = arith.constant 0 : i32
    %0 = arith.cmpi eq, %arg1, %c0_i32 : i32
    %1 = arith.extui %0 : i1 to i32
    %c0_i32_0 = arith.constant 0 : i32
    %2 = arith.cmpi ne, %1, %c0_i32_0 : i32
    scf.if %2 {
      %c0_19 = arith.constant 0 : index
      %c0_20 = arith.constant 0 : index
      %31 = vector.load %arg2[%c0_19, %c0_20] : memref<16x16xbf16, #tpu.memory_space<vmem>>, vector<16x16xbf16>
      %32 = arith.extf %31 : vector<16x16xbf16> to vector<16x16xf32>
      %c0_21 = arith.constant 0 : index
      %c0_22 = arith.constant 0 : index
      %33 = vector.load %arg3[%c0_21, %c0_22] : memref<16x16xbf16, #tpu.memory_space<vmem>>, vector<16x16xbf16>
      %34 = arith.extf %33 : vector<16x16xbf16> to vector<16x16xf32>
      %35 = arith.addf %32, %34 : vector<16x16xf32>
      %cst_23 = arith.constant dense<0.000000e+00> : vector<16xf32>
      %36 = vector.multi_reduction <add>, %35, %cst_23 [1] : vector<16x16xf32> to vector<16xf32>
      %37 = vector.shape_cast %36 : vector<16xf32> to vector<16x1xf32>
      %cst_24 = arith.constant 1.600000e+01 : f32
      %38 = vector.broadcast %cst_24 : f32 to vector<16x1xf32>
      %39 = arith.divf %37, %38 : vector<16x1xf32>
      %40 = vector.broadcast %39 : vector<16x1xf32> to vector<16x16xf32>
      %41 = arith.subf %35, %40 : vector<16x16xf32>
      %42 = arith.mulf %41, %41 : vector<16x16xf32>
      %cst_25 = arith.constant dense<0.000000e+00> : vector<16xf32>
      %43 = vector.multi_reduction <add>, %42, %cst_25 [1] : vector<16x16xf32> to vector<16xf32>
      %44 = vector.shape_cast %43 : vector<16xf32> to vector<16x1xf32>
      %cst_26 = arith.constant 1.600000e+01 : f32
      %45 = vector.broadcast %cst_26 : f32 to vector<16x1xf32>
      %46 = arith.divf %44, %45 : vector<16x1xf32>
      %47 = vector.broadcast %39 : vector<16x1xf32> to vector<16x16xf32>
      %48 = arith.subf %35, %47 : vector<16x16xf32>
      %cst_27 = arith.constant 9.99999974E-6 : f32
      %49 = vector.broadcast %cst_27 : f32 to vector<16x1xf32>
      %50 = arith.addf %46, %49 : vector<16x1xf32>
      %51 = math.rsqrt %50 : vector<16x1xf32>
      %52 = vector.broadcast %51 : vector<16x1xf32> to vector<16x16xf32>
      %53 = arith.mulf %48, %52 : vector<16x16xf32>
      %c0_28 = arith.constant 0 : index
      %c0_29 = arith.constant 0 : index
      %54 = vector.load %arg4[%c0_28, %c0_29] : memref<1x16xf32, #tpu.memory_space<vmem>>, vector<1x16xf32>
      %55 = vector.broadcast %54 : vector<1x16xf32> to vector<16x16xf32>
      %56 = arith.mulf %53, %55 : vector<16x16xf32>
      %c0_30 = arith.constant 0 : index
      %c0_31 = arith.constant 0 : index
      %57 = vector.load %arg5[%c0_30, %c0_31] : memref<1x16xf32, #tpu.memory_space<vmem>>, vector<1x16xf32>
      %58 = vector.broadcast %57 : vector<1x16xf32> to vector<16x16xf32>
      %59 = arith.addf %56, %58 : vector<16x16xf32>
      %60 = arith.truncf %59 : vector<16x16xf32> to vector<16x16xbf16>
      %c0_32 = arith.constant 0 : index
      %c0_33 = arith.constant 0 : index
      %61 = vector.load %arg12[%c0_32, %c0_33] : memref<16x16xbf16, #tpu.memory_space<vmem>>, vector<16x16xbf16>
      tpu.vector_store %arg12[%c0_32, %c0_33], %60 {strides = array<i32>} : memref<16x16xbf16, #tpu.memory_space<vmem>>, vector<16x16xbf16>,
      %c0_34 = arith.constant 0 : index
      %c0_35 = arith.constant 0 : index
      %62 = vector.load %arg9[%c0_34, %c0_35] : memref<1x16xf32, #tpu.memory_space<vmem>>, vector<1x16xf32>
      %63 = vector.broadcast %62 : vector<1x16xf32> to vector<16x16xf32>
      %64 = arith.addf %35, %63 : vector<16x16xf32>
      %c0_36 = arith.constant 0 : index
      %c0_37 = arith.constant 0 : index
      %65 = vector.load %arg11[%c0_36, %c0_37] : memref<16x16xf32, #tpu.memory_space<vmem>>, vector<16x16xf32>
      tpu.vector_store %arg11[%c0_36, %c0_37], %64 {strides = array<i32>} : memref<16x16xf32, #tpu.memory_space<vmem>>, vector<16x16xf32>,
    } else {
    }
    %c0 = arith.constant 0 : index
    %c0_1 = arith.constant 0 : index
    %3 = vector.load %arg12[%c0, %c0_1] : memref<16x16xbf16, #tpu.memory_space<vmem>>, vector<16x16xbf16>
    %c0_2 = arith.constant 0 : index
    %c0_3 = arith.constant 0 : index
    %4 = vector.load %arg6[%c0_2, %c0_3] : memref<16x64xbf16, #tpu.memory_space<vmem>>, vector<16x64xbf16>
    %cst = arith.constant dense<0.000000e+00> : vector<16x64xf32>
    %5 = tpu.matmul %3, %4, %cst {dimension_numbers = #tpu.dot_dimension_numbers<[1], [0], [0], [1], [0, 0, 1, 1], [], []>} : vector<16x16xbf16>, vector<16x64xbf16>, vector<16x64xf32> -> vector<16x64xf32>
    %c0_4 = arith.constant 0 : index
    %c0_5 = arith.constant 0 : index
    %6 = vector.load %arg7[%c0_4, %c0_5] : memref<1x64xf32, #tpu.memory_space<vmem>>, vector<1x64xf32>
    %7 = vector.broadcast %6 : vector<1x64xf32> to vector<16x64xf32>
    %8 = arith.addf %5, %7 : vector<16x64xf32>
    %9 = arith.mulf %8, %8 : vector<16x64xf32>
    %10 = arith.mulf %8, %9 : vector<16x64xf32>
    %cst_6 = arith.constant 4.471500e-02 : f32
    %11 = vector.broadcast %cst_6 : f32 to vector<16x64xf32>
    %12 = arith.mulf %11, %10 : vector<16x64xf32>
    %13 = arith.addf %8, %12 : vector<16x64xf32>
    %cst_7 = arith.constant 0.797884583 : f32
    %14 = vector.broadcast %cst_7 : f32 to vector<16x64xf32>
    %15 = arith.mulf %14, %13 : vector<16x64xf32>
    %16 = math.tanh %15 : vector<16x64xf32>
    %cst_8 = arith.constant 1.000000e+00 : f32
    %17 = vector.broadcast %cst_8 : f32 to vector<16x64xf32>
    %18 = arith.addf %17, %16 : vector<16x64xf32>
    %cst_9 = arith.constant 5.000000e-01 : f32
    %19 = vector.broadcast %cst_9 : f32 to vector<16x64xf32>
    %20 = arith.mulf %19, %18 : vector<16x64xf32>
    %21 = arith.mulf %8, %20 : vector<16x64xf32>
    %c0_10 = arith.constant 0 : index
    %c0_11 = arith.constant 0 : index
    %22 = vector.load %arg11[%c0_10, %c0_11] : memref<16x16xf32, #tpu.memory_space<vmem>>, vector<16x16xf32>
    %23 = arith.truncf %21 : vector<16x64xf32> to vector<16x64xbf16>
    %c0_12 = arith.constant 0 : index
    %c0_13 = arith.constant 0 : index
    %24 = vector.load %arg8[%c0_12, %c0_13] : memref<64x16xbf16, #tpu.memory_space<vmem>>, vector<64x16xbf16>
    %cst_14 = arith.constant dense<0.000000e+00> : vector<16x16xf32>
    %25 = tpu.matmul %23, %24, %cst_14 {dimension_numbers = #tpu.dot_dimension_numbers<[1], [0], [0], [1], [0, 0, 1, 1], [], []>} : vector<16x64xbf16>, vector<64x16xbf16>, vector<16x16xf32> -> vector<16x16xf32>
    %26 = arith.addf %22, %25 : vector<16x16xf32>
    %c0_15 = arith.constant 0 : index
    %c0_16 = arith.constant 0 : index
    %27 = vector.load %arg11[%c0_15, %c0_16] : memref<16x16xf32, #tpu.memory_space<vmem>>, vector<16x16xf32>
    tpu.vector_store %arg11[%c0_15, %c0_16], %26 {strides = array<i32>} : memref<16x16xf32, #tpu.memory_space<vmem>>, vector<16x16xf32>,
    %c0_i32_17 = arith.constant 0 : i32
    %28 = arith.cmpi eq, %arg1, %c0_i32_17 : i32
    %29 = arith.extui %28 : i1 to i32
    %c0_i32_18 = arith.constant 0 : i32
    %30 = arith.cmpi ne, %29, %c0_i32_18 : i32
    scf.if %30 {
      %c0_19 = arith.constant 0 : index
      %c0_20 = arith.constant 0 : index
      %31 = vector.load %arg11[%c0_19, %c0_20] : memref<16x16xf32, #tpu.memory_space<vmem>>, vector<16x16xf32>
      %32 = arith.truncf %31 : vector<16x16xf32> to vector<16x16xbf16>
      %c0_21 = arith.constant 0 : index
      %c0_22 = arith.constant 0 : index
      %33 = vector.load %arg10[%c0_21, %c0_22] : memref<16x16xbf16, #tpu.memory_space<vmem>>, vector<16x16xbf16>
      tpu.vector_store %arg10[%c0_21, %c0_22], %32 {strides = array<i32>} : memref<16x16xbf16, #tpu.memory_space<vmem>>, vector<16x16xbf16>,
    } else {
    }
    return
  }
  func.func @transform_0(%arg0: i32, %arg1: i32) -> (i32, i32) {
    %c0_i32 = arith.constant 0 : i32
    %c0_i32_0 = arith.constant 0 : i32
    return %arg0, %c0_i32 : i32, i32
  }
  func.func @transform_1(%arg0: i32, %arg1: i32) -> (i32, i32) {
    %c0_i32 = arith.constant 0 : i32
    %c0_i32_0 = arith.constant 0 : i32
    return %arg0, %c0_i32 : i32, i32
  }
  func.func @transform_2(%arg0: i32, %arg1: i32) -> (i32, i32) {
    %c0_i32 = arith.constant 0 : i32
    %c0_i32_0 = arith.constant 0 : i32
    %c0_i32_1 = arith.constant 0 : i32
    return %c0_i32, %c0_i32_0 : i32, i32
  }
  func.func @transform_3(%arg0: i32, %arg1: i32) -> (i32, i32) {
    %c0_i32 = arith.constant 0 : i32
    %c0_i32_0 = arith.constant 0 : i32
    %c0_i32_1 = arith.constant 0 : i32
    return %c0_i32, %c0_i32_0 : i32, i32
  }
  func.func @transform_4(%arg0: i32, %arg1: i32) -> (i32, i32) {
    %c0_i32 = arith.constant 0 : i32
    %c0_i32_0 = arith.constant 0 : i32
    return %c0_i32, %arg1 : i32, i32
  }
  func.func @transform_5(%arg0: i32, %arg1: i32) -> (i32, i32) {
    %c0_i32 = arith.constant 0 : i32
    %c0_i32_0 = arith.constant 0 : i32
    return %c0_i32, %arg1 : i32, i32
  }
  func.func @transform_6(%arg0: i32, %arg1: i32) -> (i32, i32) {
    %c0_i32 = arith.constant 0 : i32
    %c0_i32_0 = arith.constant 0 : i32
    return %arg1, %c0_i32 : i32, i32
  }
  func.func @transform_7(%arg0: i32, %arg1: i32) -> (i32, i32) {
    %c0_i32 = arith.constant 0 : i32
    %c0_i32_0 = arith.constant 0 : i32
    %c0_i32_1 = arith.constant 0 : i32
    return %c0_i32, %c0_i32_0 : i32, i32
  }
  func.func @transform_8(%arg0: i32, %arg1: i32) -> (i32, i32) {
    %c0_i32 = arith.constant 0 : i32
    %c0_i32_0 = arith.constant 0 : i32
    return %arg0, %c0_i32 : i32, i32
  }
}

module attributes {stable_mosaic.version = 11 : i64} {
  func.func @_ln_matmul_kernel(%arg0: i32, %arg1: memref<8x64xbf16, #tpu.memory_space<vmem>>, %arg2: memref<1x64xf32, #tpu.memory_space<vmem>>, %arg3: memref<1x64xf32, #tpu.memory_space<vmem>>, %arg4: memref<64x32xbf16, #tpu.memory_space<vmem>>, %arg5: memref<1x32xf32, #tpu.memory_space<vmem>>, %arg6: memref<8x32xbf16, #tpu.memory_space<vmem>>) attributes {dimension_semantics = [#tpu.dimension_semantics<parallel>], iteration_bounds = array<i64: 1>, scalar_prefetch = 0 : i64, scratch_operands = 0 : i64, tpu.core_type = #tpu.core_type<tc>, window_params = [{transform_indices = @transform_0, window_bounds = array<i64: 8, 64>}, {pipeline_mode = #tpu.pipeline_mode<synchronous>, transform_indices = @transform_1, window_bounds = array<i64: 1, 64>}, {pipeline_mode = #tpu.pipeline_mode<synchronous>, transform_indices = @transform_2, window_bounds = array<i64: 1, 64>}, {pipeline_mode = #tpu.pipeline_mode<synchronous>, transform_indices = @transform_3, window_bounds = array<i64: 64, 32>}, {pipeline_mode = #tpu.pipeline_mode<synchronous>, transform_indices = @transform_4, window_bounds = array<i64: 1, 32>}, {transform_indices = @transform_5, window_bounds = array<i64: 8, 32>}]} {
    %c0 = arith.constant 0 : index
    %c0_0 = arith.constant 0 : index
    %0 = vector.load %arg1[%c0, %c0_0] : memref<8x64xbf16, #tpu.memory_space<vmem>>, vector<8x64xbf16>
    %1 = arith.extf %0 : vector<8x64xbf16> to vector<8x64xf32>
    %cst = arith.constant dense<0.000000e+00> : vector<8xf32>
    %2 = vector.multi_reduction <add>, %1, %cst [1] : vector<8x64xf32> to vector<8xf32>
    %3 = vector.shape_cast %2 : vector<8xf32> to vector<8x1xf32>
    %cst_1 = arith.constant 6.400000e+01 : f32
    %4 = vector.broadcast %cst_1 : f32 to vector<8x1xf32>
    %5 = arith.divf %3, %4 : vector<8x1xf32>
    %6 = vector.broadcast %5 : vector<8x1xf32> to vector<8x64xf32>
    %7 = arith.subf %1, %6 : vector<8x64xf32>
    %8 = arith.mulf %7, %7 : vector<8x64xf32>
    %cst_2 = arith.constant dense<0.000000e+00> : vector<8xf32>
    %9 = vector.multi_reduction <add>, %8, %cst_2 [1] : vector<8x64xf32> to vector<8xf32>
    %10 = vector.shape_cast %9 : vector<8xf32> to vector<8x1xf32>
    %cst_3 = arith.constant 6.400000e+01 : f32
    %11 = vector.broadcast %cst_3 : f32 to vector<8x1xf32>
    %12 = arith.divf %10, %11 : vector<8x1xf32>
    %13 = vector.broadcast %5 : vector<8x1xf32> to vector<8x64xf32>
    %14 = arith.subf %1, %13 : vector<8x64xf32>
    %cst_4 = arith.constant 9.99999974E-6 : f32
    %15 = vector.broadcast %cst_4 : f32 to vector<8x1xf32>
    %16 = arith.addf %12, %15 : vector<8x1xf32>
    %17 = math.rsqrt %16 : vector<8x1xf32>
    %18 = vector.broadcast %17 : vector<8x1xf32> to vector<8x64xf32>
    %19 = arith.mulf %14, %18 : vector<8x64xf32>
    %c0_5 = arith.constant 0 : index
    %c0_6 = arith.constant 0 : index
    %20 = vector.load %arg2[%c0_5, %c0_6] : memref<1x64xf32, #tpu.memory_space<vmem>>, vector<1x64xf32>
    %21 = vector.broadcast %20 : vector<1x64xf32> to vector<8x64xf32>
    %22 = arith.mulf %19, %21 : vector<8x64xf32>
    %c0_7 = arith.constant 0 : index
    %c0_8 = arith.constant 0 : index
    %23 = vector.load %arg3[%c0_7, %c0_8] : memref<1x64xf32, #tpu.memory_space<vmem>>, vector<1x64xf32>
    %24 = vector.broadcast %23 : vector<1x64xf32> to vector<8x64xf32>
    %25 = arith.addf %22, %24 : vector<8x64xf32>
    %26 = arith.truncf %25 : vector<8x64xf32> to vector<8x64xbf16>
    %c0_9 = arith.constant 0 : index
    %c0_10 = arith.constant 0 : index
    %27 = vector.load %arg4[%c0_9, %c0_10] : memref<64x32xbf16, #tpu.memory_space<vmem>>, vector<64x32xbf16>
    %cst_11 = arith.constant dense<0.000000e+00> : vector<8x32xf32>
    %28 = tpu.matmul %26, %27, %cst_11 {dimension_numbers = #tpu.dot_dimension_numbers<[1], [0], [0], [1], [0, 0, 1, 1], [], []>} : vector<8x64xbf16>, vector<64x32xbf16>, vector<8x32xf32> -> vector<8x32xf32>
    %c0_12 = arith.constant 0 : index
    %c0_13 = arith.constant 0 : index
    %29 = vector.load %arg5[%c0_12, %c0_13] : memref<1x32xf32, #tpu.memory_space<vmem>>, vector<1x32xf32>
    %30 = vector.broadcast %29 : vector<1x32xf32> to vector<8x32xf32>
    %31 = arith.addf %28, %30 : vector<8x32xf32>
    %32 = arith.truncf %31 : vector<8x32xf32> to vector<8x32xbf16>
    %c0_14 = arith.constant 0 : index
    %c0_15 = arith.constant 0 : index
    %33 = vector.load %arg6[%c0_14, %c0_15] : memref<8x32xbf16, #tpu.memory_space<vmem>>, vector<8x32xbf16>
    tpu.vector_store %arg6[%c0_14, %c0_15], %32 {strides = array<i32>} : memref<8x32xbf16, #tpu.memory_space<vmem>>, vector<8x32xbf16>,
    return
  }
  func.func @transform_0(%arg0: i32) -> (i32, i32) {
    %c0_i32 = arith.constant 0 : i32
    %c0_i32_0 = arith.constant 0 : i32
    return %arg0, %c0_i32 : i32, i32
  }
  func.func @transform_1(%arg0: i32) -> (i32, i32) {
    %c0_i32 = arith.constant 0 : i32
    %c0_i32_0 = arith.constant 0 : i32
    %c0_i32_1 = arith.constant 0 : i32
    return %c0_i32, %c0_i32_0 : i32, i32
  }
  func.func @transform_2(%arg0: i32) -> (i32, i32) {
    %c0_i32 = arith.constant 0 : i32
    %c0_i32_0 = arith.constant 0 : i32
    %c0_i32_1 = arith.constant 0 : i32
    return %c0_i32, %c0_i32_0 : i32, i32
  }
  func.func @transform_3(%arg0: i32) -> (i32, i32) {
    %c0_i32 = arith.constant 0 : i32
    %c0_i32_0 = arith.constant 0 : i32
    %c0_i32_1 = arith.constant 0 : i32
    return %c0_i32, %c0_i32_0 : i32, i32
  }
  func.func @transform_4(%arg0: i32) -> (i32, i32) {
    %c0_i32 = arith.constant 0 : i32
    %c0_i32_0 = arith.constant 0 : i32
    %c0_i32_1 = arith.constant 0 : i32
    return %c0_i32, %c0_i32_0 : i32, i32
  }
  func.func @transform_5(%arg0: i32) -> (i32, i32) {
    %c0_i32 = arith.constant 0 : i32
    %c0_i32_0 = arith.constant 0 : i32
    return %arg0, %c0_i32 : i32, i32
  }
}

module attributes {stable_mosaic.version = 11 : i64} {
  func.func @_ln_matmul_kernel(%arg0: i32, %arg1: memref<16x32xbf16, #tpu.memory_space<vmem>>, %arg2: memref<1x32xf32, #tpu.memory_space<vmem>>, %arg3: memref<1x32xf32, #tpu.memory_space<vmem>>, %arg4: memref<32x96xbf16, #tpu.memory_space<vmem>>, %arg5: memref<1x96xf32, #tpu.memory_space<vmem>>, %arg6: memref<16x96xbf16, #tpu.memory_space<vmem>>) attributes {dimension_semantics = [#tpu.dimension_semantics<parallel>], iteration_bounds = array<i64: 2>, scalar_prefetch = 0 : i64, scratch_operands = 0 : i64, tpu.core_type = #tpu.core_type<tc>, window_params = [{transform_indices = @transform_0, window_bounds = array<i64: 16, 32>}, {pipeline_mode = #tpu.pipeline_mode<synchronous>, transform_indices = @transform_1, window_bounds = array<i64: 1, 32>}, {pipeline_mode = #tpu.pipeline_mode<synchronous>, transform_indices = @transform_2, window_bounds = array<i64: 1, 32>}, {pipeline_mode = #tpu.pipeline_mode<synchronous>, transform_indices = @transform_3, window_bounds = array<i64: 32, 96>}, {pipeline_mode = #tpu.pipeline_mode<synchronous>, transform_indices = @transform_4, window_bounds = array<i64: 1, 96>}, {transform_indices = @transform_5, window_bounds = array<i64: 16, 96>}]} {
    %c0 = arith.constant 0 : index
    %c0_0 = arith.constant 0 : index
    %0 = vector.load %arg1[%c0, %c0_0] : memref<16x32xbf16, #tpu.memory_space<vmem>>, vector<16x32xbf16>
    %1 = arith.extf %0 : vector<16x32xbf16> to vector<16x32xf32>
    %cst = arith.constant dense<0.000000e+00> : vector<16xf32>
    %2 = vector.multi_reduction <add>, %1, %cst [1] : vector<16x32xf32> to vector<16xf32>
    %3 = vector.shape_cast %2 : vector<16xf32> to vector<16x1xf32>
    %cst_1 = arith.constant 3.200000e+01 : f32
    %4 = vector.broadcast %cst_1 : f32 to vector<16x1xf32>
    %5 = arith.divf %3, %4 : vector<16x1xf32>
    %6 = vector.broadcast %5 : vector<16x1xf32> to vector<16x32xf32>
    %7 = arith.subf %1, %6 : vector<16x32xf32>
    %8 = arith.mulf %7, %7 : vector<16x32xf32>
    %cst_2 = arith.constant dense<0.000000e+00> : vector<16xf32>
    %9 = vector.multi_reduction <add>, %8, %cst_2 [1] : vector<16x32xf32> to vector<16xf32>
    %10 = vector.shape_cast %9 : vector<16xf32> to vector<16x1xf32>
    %cst_3 = arith.constant 3.200000e+01 : f32
    %11 = vector.broadcast %cst_3 : f32 to vector<16x1xf32>
    %12 = arith.divf %10, %11 : vector<16x1xf32>
    %13 = vector.broadcast %5 : vector<16x1xf32> to vector<16x32xf32>
    %14 = arith.subf %1, %13 : vector<16x32xf32>
    %cst_4 = arith.constant 9.99999974E-6 : f32
    %15 = vector.broadcast %cst_4 : f32 to vector<16x1xf32>
    %16 = arith.addf %12, %15 : vector<16x1xf32>
    %17 = math.rsqrt %16 : vector<16x1xf32>
    %18 = vector.broadcast %17 : vector<16x1xf32> to vector<16x32xf32>
    %19 = arith.mulf %14, %18 : vector<16x32xf32>
    %c0_5 = arith.constant 0 : index
    %c0_6 = arith.constant 0 : index
    %20 = vector.load %arg2[%c0_5, %c0_6] : memref<1x32xf32, #tpu.memory_space<vmem>>, vector<1x32xf32>
    %21 = vector.broadcast %20 : vector<1x32xf32> to vector<16x32xf32>
    %22 = arith.mulf %19, %21 : vector<16x32xf32>
    %c0_7 = arith.constant 0 : index
    %c0_8 = arith.constant 0 : index
    %23 = vector.load %arg3[%c0_7, %c0_8] : memref<1x32xf32, #tpu.memory_space<vmem>>, vector<1x32xf32>
    %24 = vector.broadcast %23 : vector<1x32xf32> to vector<16x32xf32>
    %25 = arith.addf %22, %24 : vector<16x32xf32>
    %26 = arith.truncf %25 : vector<16x32xf32> to vector<16x32xbf16>
    %c0_9 = arith.constant 0 : index
    %c0_10 = arith.constant 0 : index
    %27 = vector.load %arg4[%c0_9, %c0_10] : memref<32x96xbf16, #tpu.memory_space<vmem>>, vector<32x96xbf16>
    %cst_11 = arith.constant dense<0.000000e+00> : vector<16x96xf32>
    %28 = tpu.matmul %26, %27, %cst_11 {dimension_numbers = #tpu.dot_dimension_numbers<[1], [0], [0], [1], [0, 0, 1, 1], [], []>} : vector<16x32xbf16>, vector<32x96xbf16>, vector<16x96xf32> -> vector<16x96xf32>
    %c0_12 = arith.constant 0 : index
    %c0_13 = arith.constant 0 : index
    %29 = vector.load %arg5[%c0_12, %c0_13] : memref<1x96xf32, #tpu.memory_space<vmem>>, vector<1x96xf32>
    %30 = vector.broadcast %29 : vector<1x96xf32> to vector<16x96xf32>
    %31 = arith.addf %28, %30 : vector<16x96xf32>
    %32 = arith.truncf %31 : vector<16x96xf32> to vector<16x96xbf16>
    %c0_14 = arith.constant 0 : index
    %c0_15 = arith.constant 0 : index
    %33 = vector.load %arg6[%c0_14, %c0_15] : memref<16x96xbf16, #tpu.memory_space<vmem>>, vector<16x96xbf16>
    tpu.vector_store %arg6[%c0_14, %c0_15], %32 {strides = array<i32>} : memref<16x96xbf16, #tpu.memory_space<vmem>>, vector<16x96xbf16>,
    return
  }
  func.func @transform_0(%arg0: i32) -> (i32, i32) {
    %c0_i32 = arith.constant 0 : i32
    %c0_i32_0 = arith.constant 0 : i32
    return %arg0, %c0_i32 : i32, i32
  }
  func.func @transform_1(%arg0: i32) -> (i32, i32) {
    %c0_i32 = arith.constant 0 : i32
    %c0_i32_0 = arith.constant 0 : i32
    %c0_i32_1 = arith.constant 0 : i32
    return %c0_i32, %c0_i32_0 : i32, i32
  }
  func.func @transform_2(%arg0: i32) -> (i32, i32) {
    %c0_i32 = arith.constant 0 : i32
    %c0_i32_0 = arith.constant 0 : i32
    %c0_i32_1 = arith.constant 0 : i32
    return %c0_i32, %c0_i32_0 : i32, i32
  }
  func.func @transform_3(%arg0: i32) -> (i32, i32) {
    %c0_i32 = arith.constant 0 : i32
    %c0_i32_0 = arith.constant 0 : i32
    %c0_i32_1 = arith.constant 0 : i32
    return %c0_i32, %c0_i32_0 : i32, i32
  }
  func.func @transform_4(%arg0: i32) -> (i32, i32) {
    %c0_i32 = arith.constant 0 : i32
    %c0_i32_0 = arith.constant 0 : i32
    %c0_i32_1 = arith.constant 0 : i32
    return %c0_i32, %c0_i32_0 : i32, i32
  }
  func.func @transform_5(%arg0: i32) -> (i32, i32) {
    %c0_i32 = arith.constant 0 : i32
    %c0_i32_0 = arith.constant 0 : i32
    return %arg0, %c0_i32 : i32, i32
  }
}

module attributes {stable_mosaic.version = 11 : i64} {
  func.func @_window_attn_proj_kernel(%arg0: i32, %arg1: memref<1x16x96xbf16, #tpu.memory_space<vmem>>, %arg2: memref<4x16x16xbf16, #tpu.memory_space<vmem>>, %arg3: memref<1x16x16xbf16, #tpu.memory_space<vmem>>, %arg4: memref<32x32xbf16, #tpu.memory_space<vmem>>, %arg5: memref<1x32xf32, #tpu.memory_space<vmem>>, %arg6: memref<1x16x32xbf16, #tpu.memory_space<vmem>>) attributes {dimension_semantics = [#tpu.dimension_semantics<parallel>], iteration_bounds = array<i64: 2>, scalar_prefetch = 0 : i64, scratch_operands = 0 : i64, tpu.core_type = #tpu.core_type<tc>, window_params = [{transform_indices = @transform_0, window_bounds = array<i64: 1, 16, 96>}, {pipeline_mode = #tpu.pipeline_mode<synchronous>, transform_indices = @transform_1, window_bounds = array<i64: 4, 16, 16>}, {pipeline_mode = #tpu.pipeline_mode<synchronous>, transform_indices = @transform_2, window_bounds = array<i64: 1, 16, 16>}, {pipeline_mode = #tpu.pipeline_mode<synchronous>, transform_indices = @transform_3, window_bounds = array<i64: 32, 32>}, {pipeline_mode = #tpu.pipeline_mode<synchronous>, transform_indices = @transform_4, window_bounds = array<i64: 1, 32>}, {transform_indices = @transform_5, window_bounds = array<i64: 1, 16, 32>}]} {
    %c0 = arith.constant 0 : index
    %c0_0 = arith.constant 0 : index
    %c0_1 = arith.constant 0 : index
    %0 = vector.load %arg3[%c0, %c0_0, %c0_1] : memref<1x16x16xbf16, #tpu.memory_space<vmem>>, vector<1x16x16xbf16>
    %1 = arith.extf %0 : vector<1x16x16xbf16> to vector<1x16x16xf32>
    %cst = arith.constant 0.000000e+00 : f32
    %2 = vector.broadcast %cst : f32 to vector<16x32xf32>
    %c0_2 = arith.constant 0 : index
    %c0_3 = arith.constant 0 : index
    %3 = vector.load %arg5[%c0_2, %c0_3] : memref<1x32xf32, #tpu.memory_space<vmem>>, vector<1x32xf32>
    %4 = vector.broadcast %3 : vector<1x32xf32> to vector<16x32xf32>
    %5 = arith.addf %2, %4 : vector<16x32xf32>
    %c0_4 = arith.constant 0 : index
    %c0_5 = arith.constant 0 : index
    %c0_6 = arith.constant 0 : index
    %6 = vector.load %arg1[%c0_4, %c0_5, %c0_6] : memref<1x16x96xbf16, #tpu.memory_space<vmem>>, vector<1x16x8xbf16>
    %c0_7 = arith.constant 0 : index
    %c0_8 = arith.constant 0 : index
    %c32 = arith.constant 32 : index
    %7 = vector.load %arg1[%c0_7, %c0_8, %c32] : memref<1x16x96xbf16, #tpu.memory_space<vmem>>, vector<1x16x8xbf16>
    %c0_9 = arith.constant 0 : index
    %c0_10 = arith.constant 0 : index
    %c64 = arith.constant 64 : index
    %8 = vector.load %arg1[%c0_9, %c0_10, %c64] : memref<1x16x96xbf16, #tpu.memory_space<vmem>>, vector<1x16x8xbf16>
    "tpu.trace_start"() <{level = 10 : i32, message = "bnd,bmd->bnm"}> : () -> ()
    %cst_11 = arith.constant dense<0.000000e+00> : vector<1x16x16xf32>
    %9 = tpu.matmul %6, %7, %cst_11 {dimension_numbers = #tpu.dot_dimension_numbers<[2], [2], [1], [1], [0, 0, 0, 1, 1, 1], [0], [0]>} : vector<1x16x8xbf16>, vector<1x16x8xbf16>, vector<1x16x16xf32> -> vector<1x16x16xf32>
    "tpu.trace_stop"() : () -> ()
    %c0_12 = arith.constant 0 : index
    %c0_13 = arith.constant 0 : index
    %c0_14 = arith.constant 0 : index
    %10 = vector.load %arg2[%c0_12, %c0_13, %c0_14] : memref<4x16x16xbf16, #tpu.memory_space<vmem>>, vector<1x16x16xbf16>
    %11 = vector.shape_cast %10 : vector<1x16x16xbf16> to vector<16x16xbf16>
    %12 = vector.shape_cast %11 : vector<16x16xbf16> to vector<1x16x16xbf16>
    %13 = arith.extf %12 : vector<1x16x16xbf16> to vector<1x16x16xf32>
    %14 = arith.addf %9, %13 : vector<1x16x16xf32>
    %15 = arith.addf %14, %1 : vector<1x16x16xf32>
    %cst_15 = arith.constant dense<0xFF800000> : vector<1x16xf32>
    %16 = vector.multi_reduction <maximumf>, %15, %cst_15 [2] : vector<1x16x16xf32> to vector<1x16xf32>
    %17 = vector.shape_cast %16 : vector<1x16xf32> to vector<1x16x1xf32>
    %18 = vector.broadcast %17 : vector<1x16x1xf32> to vector<1x16x16xf32>
    %19 = arith.subf %15, %18 : vector<1x16x16xf32>
    %20 = math.exp %19 : vector<1x16x16xf32>
    %cst_16 = arith.constant dense<0.000000e+00> : vector<1x16xf32>
    %21 = vector.multi_reduction <add>, %20, %cst_16 [2] : vector<1x16x16xf32> to vector<1x16xf32>
    %22 = vector.shape_cast %21 : vector<1x16xf32> to vector<1x16x1xf32>
    %23 = tpu.reciprocal %22 {approx = true} : vector<1x16x1xf32> -> vector<1x16x1xf32>
    %24 = vector.broadcast %23 : vector<1x16x1xf32> to vector<1x16x16xf32>
    %25 = arith.mulf %20, %24 : vector<1x16x16xf32>
    %26 = arith.truncf %25 : vector<1x16x16xf32> to vector<1x16x16xbf16>
    "tpu.trace_start"() <{level = 10 : i32, message = "bnm,bmd->bnd"}> : () -> ()
    %cst_17 = arith.constant dense<0.000000e+00> : vector<1x16x8xf32>
    %27 = tpu.matmul %26, %8, %cst_17 {dimension_numbers = #tpu.dot_dimension_numbers<[2], [1], [1], [2], [0, 0, 0, 1, 1, 2], [0], [0]>} : vector<1x16x16xbf16>, vector<1x16x8xbf16>, vector<1x16x8xf32> -> vector<1x16x8xf32>
    "tpu.trace_stop"() : () -> ()
    %28 = vector.shape_cast %27 : vector<1x16x8xf32> to vector<16x8xf32>
    %29 = arith.truncf %28 : vector<16x8xf32> to vector<16x8xbf16>
    %c0_18 = arith.constant 0 : index
    %c0_19 = arith.constant 0 : index
    %30 = vector.load %arg4[%c0_18, %c0_19] : memref<32x32xbf16, #tpu.memory_space<vmem>>, vector<8x32xbf16>
    %cst_20 = arith.constant dense<0.000000e+00> : vector<16x32xf32>
    %31 = tpu.matmul %29, %30, %cst_20 {dimension_numbers = #tpu.dot_dimension_numbers<[1], [0], [0], [1], [0, 0, 1, 1], [], []>} : vector<16x8xbf16>, vector<8x32xbf16>, vector<16x32xf32> -> vector<16x32xf32>
    %32 = arith.addf %5, %31 : vector<16x32xf32>
    %c0_21 = arith.constant 0 : index
    %c0_22 = arith.constant 0 : index
    %c8 = arith.constant 8 : index
    %33 = vector.load %arg1[%c0_21, %c0_22, %c8] : memref<1x16x96xbf16, #tpu.memory_space<vmem>>, vector<1x16x8xbf16>
    %c0_23 = arith.constant 0 : index
    %c0_24 = arith.constant 0 : index
    %c40 = arith.constant 40 : index
    %34 = vector.load %arg1[%c0_23, %c0_24, %c40] : memref<1x16x96xbf16, #tpu.memory_space<vmem>>, vector<1x16x8xbf16>
    %c0_25 = arith.constant 0 : index
    %c0_26 = arith.constant 0 : index
    %c72 = arith.constant 72 : index
    %35 = vector.load %arg1[%c0_25, %c0_26, %c72] : memref<1x16x96xbf16, #tpu.memory_space<vmem>>, vector<1x16x8xbf16>
    "tpu.trace_start"() <{level = 10 : i32, message = "bnd,bmd->bnm"}> : () -> ()
    %cst_27 = arith.constant dense<0.000000e+00> : vector<1x16x16xf32>
    %36 = tpu.matmul %33, %34, %cst_27 {dimension_numbers = #tpu.dot_dimension_numbers<[2], [2], [1], [1], [0, 0, 0, 1, 1, 1], [0], [0]>} : vector<1x16x8xbf16>, vector<1x16x8xbf16>, vector<1x16x16xf32> -> vector<1x16x16xf32>
    "tpu.trace_stop"() : () -> ()
    %c1 = arith.constant 1 : index
    %c0_28 = arith.constant 0 : index
    %c0_29 = arith.constant 0 : index
    %37 = vector.load %arg2[%c1, %c0_28, %c0_29] : memref<4x16x16xbf16, #tpu.memory_space<vmem>>, vector<1x16x16xbf16>
    %38 = vector.shape_cast %37 : vector<1x16x16xbf16> to vector<16x16xbf16>
    %39 = vector.shape_cast %38 : vector<16x16xbf16> to vector<1x16x16xbf16>
    %40 = arith.extf %39 : vector<1x16x16xbf16> to vector<1x16x16xf32>
    %41 = arith.addf %36, %40 : vector<1x16x16xf32>
    %42 = arith.addf %41, %1 : vector<1x16x16xf32>
    %cst_30 = arith.constant dense<0xFF800000> : vector<1x16xf32>
    %43 = vector.multi_reduction <maximumf>, %42, %cst_30 [2] : vector<1x16x16xf32> to vector<1x16xf32>
    %44 = vector.shape_cast %43 : vector<1x16xf32> to vector<1x16x1xf32>
    %45 = vector.broadcast %44 : vector<1x16x1xf32> to vector<1x16x16xf32>
    %46 = arith.subf %42, %45 : vector<1x16x16xf32>
    %47 = math.exp %46 : vector<1x16x16xf32>
    %cst_31 = arith.constant dense<0.000000e+00> : vector<1x16xf32>
    %48 = vector.multi_reduction <add>, %47, %cst_31 [2] : vector<1x16x16xf32> to vector<1x16xf32>
    %49 = vector.shape_cast %48 : vector<1x16xf32> to vector<1x16x1xf32>
    %50 = tpu.reciprocal %49 {approx = true} : vector<1x16x1xf32> -> vector<1x16x1xf32>
    %51 = vector.broadcast %50 : vector<1x16x1xf32> to vector<1x16x16xf32>
    %52 = arith.mulf %47, %51 : vector<1x16x16xf32>
    %53 = arith.truncf %52 : vector<1x16x16xf32> to vector<1x16x16xbf16>
    "tpu.trace_start"() <{level = 10 : i32, message = "bnm,bmd->bnd"}> : () -> ()
    %cst_32 = arith.constant dense<0.000000e+00> : vector<1x16x8xf32>
    %54 = tpu.matmul %53, %35, %cst_32 {dimension_numbers = #tpu.dot_dimension_numbers<[2], [1], [1], [2], [0, 0, 0, 1, 1, 2], [0], [0]>} : vector<1x16x16xbf16>, vector<1x16x8xbf16>, vector<1x16x8xf32> -> vector<1x16x8xf32>
    "tpu.trace_stop"() : () -> ()
    %55 = vector.shape_cast %54 : vector<1x16x8xf32> to vector<16x8xf32>
    %56 = arith.truncf %55 : vector<16x8xf32> to vector<16x8xbf16>
    %c8_33 = arith.constant 8 : index
    %c0_34 = arith.constant 0 : index
    %57 = vector.load %arg4[%c8_33, %c0_34] : memref<32x32xbf16, #tpu.memory_space<vmem>>, vector<8x32xbf16>
    %cst_35 = arith.constant dense<0.000000e+00> : vector<16x32xf32>
    %58 = tpu.matmul %56, %57, %cst_35 {dimension_numbers = #tpu.dot_dimension_numbers<[1], [0], [0], [1], [0, 0, 1, 1], [], []>} : vector<16x8xbf16>, vector<8x32xbf16>, vector<16x32xf32> -> vector<16x32xf32>
    %59 = arith.addf %32, %58 : vector<16x32xf32>
    %c0_36 = arith.constant 0 : index
    %c0_37 = arith.constant 0 : index
    %c16 = arith.constant 16 : index
    %60 = vector.load %arg1[%c0_36, %c0_37, %c16] : memref<1x16x96xbf16, #tpu.memory_space<vmem>>, vector<1x16x8xbf16>
    %c0_38 = arith.constant 0 : index
    %c0_39 = arith.constant 0 : index
    %c48 = arith.constant 48 : index
    %61 = vector.load %arg1[%c0_38, %c0_39, %c48] : memref<1x16x96xbf16, #tpu.memory_space<vmem>>, vector<1x16x8xbf16>
    %c0_40 = arith.constant 0 : index
    %c0_41 = arith.constant 0 : index
    %c80 = arith.constant 80 : index
    %62 = vector.load %arg1[%c0_40, %c0_41, %c80] : memref<1x16x96xbf16, #tpu.memory_space<vmem>>, vector<1x16x8xbf16>
    "tpu.trace_start"() <{level = 10 : i32, message = "bnd,bmd->bnm"}> : () -> ()
    %cst_42 = arith.constant dense<0.000000e+00> : vector<1x16x16xf32>
    %63 = tpu.matmul %60, %61, %cst_42 {dimension_numbers = #tpu.dot_dimension_numbers<[2], [2], [1], [1], [0, 0, 0, 1, 1, 1], [0], [0]>} : vector<1x16x8xbf16>, vector<1x16x8xbf16>, vector<1x16x16xf32> -> vector<1x16x16xf32>
    "tpu.trace_stop"() : () -> ()
    %c2 = arith.constant 2 : index
    %c0_43 = arith.constant 0 : index
    %c0_44 = arith.constant 0 : index
    %64 = vector.load %arg2[%c2, %c0_43, %c0_44] : memref<4x16x16xbf16, #tpu.memory_space<vmem>>, vector<1x16x16xbf16>
    %65 = vector.shape_cast %64 : vector<1x16x16xbf16> to vector<16x16xbf16>
    %66 = vector.shape_cast %65 : vector<16x16xbf16> to vector<1x16x16xbf16>
    %67 = arith.extf %66 : vector<1x16x16xbf16> to vector<1x16x16xf32>
    %68 = arith.addf %63, %67 : vector<1x16x16xf32>
    %69 = arith.addf %68, %1 : vector<1x16x16xf32>
    %cst_45 = arith.constant dense<0xFF800000> : vector<1x16xf32>
    %70 = vector.multi_reduction <maximumf>, %69, %cst_45 [2] : vector<1x16x16xf32> to vector<1x16xf32>
    %71 = vector.shape_cast %70 : vector<1x16xf32> to vector<1x16x1xf32>
    %72 = vector.broadcast %71 : vector<1x16x1xf32> to vector<1x16x16xf32>
    %73 = arith.subf %69, %72 : vector<1x16x16xf32>
    %74 = math.exp %73 : vector<1x16x16xf32>
    %cst_46 = arith.constant dense<0.000000e+00> : vector<1x16xf32>
    %75 = vector.multi_reduction <add>, %74, %cst_46 [2] : vector<1x16x16xf32> to vector<1x16xf32>
    %76 = vector.shape_cast %75 : vector<1x16xf32> to vector<1x16x1xf32>
    %77 = tpu.reciprocal %76 {approx = true} : vector<1x16x1xf32> -> vector<1x16x1xf32>
    %78 = vector.broadcast %77 : vector<1x16x1xf32> to vector<1x16x16xf32>
    %79 = arith.mulf %74, %78 : vector<1x16x16xf32>
    %80 = arith.truncf %79 : vector<1x16x16xf32> to vector<1x16x16xbf16>
    "tpu.trace_start"() <{level = 10 : i32, message = "bnm,bmd->bnd"}> : () -> ()
    %cst_47 = arith.constant dense<0.000000e+00> : vector<1x16x8xf32>
    %81 = tpu.matmul %80, %62, %cst_47 {dimension_numbers = #tpu.dot_dimension_numbers<[2], [1], [1], [2], [0, 0, 0, 1, 1, 2], [0], [0]>} : vector<1x16x16xbf16>, vector<1x16x8xbf16>, vector<1x16x8xf32> -> vector<1x16x8xf32>
    "tpu.trace_stop"() : () -> ()
    %82 = vector.shape_cast %81 : vector<1x16x8xf32> to vector<16x8xf32>
    %83 = arith.truncf %82 : vector<16x8xf32> to vector<16x8xbf16>
    %c16_48 = arith.constant 16 : index
    %c0_49 = arith.constant 0 : index
    %84 = vector.load %arg4[%c16_48, %c0_49] : memref<32x32xbf16, #tpu.memory_space<vmem>>, vector<8x32xbf16>
    %cst_50 = arith.constant dense<0.000000e+00> : vector<16x32xf32>
    %85 = tpu.matmul %83, %84, %cst_50 {dimension_numbers = #tpu.dot_dimension_numbers<[1], [0], [0], [1], [0, 0, 1, 1], [], []>} : vector<16x8xbf16>, vector<8x32xbf16>, vector<16x32xf32> -> vector<16x32xf32>
    %86 = arith.addf %59, %85 : vector<16x32xf32>
    %c0_51 = arith.constant 0 : index
    %c0_52 = arith.constant 0 : index
    %c24 = arith.constant 24 : index
    %87 = vector.load %arg1[%c0_51, %c0_52, %c24] : memref<1x16x96xbf16, #tpu.memory_space<vmem>>, vector<1x16x8xbf16>
    %c0_53 = arith.constant 0 : index
    %c0_54 = arith.constant 0 : index
    %c56 = arith.constant 56 : index
    %88 = vector.load %arg1[%c0_53, %c0_54, %c56] : memref<1x16x96xbf16, #tpu.memory_space<vmem>>, vector<1x16x8xbf16>
    %c0_55 = arith.constant 0 : index
    %c0_56 = arith.constant 0 : index
    %c88 = arith.constant 88 : index
    %89 = vector.load %arg1[%c0_55, %c0_56, %c88] : memref<1x16x96xbf16, #tpu.memory_space<vmem>>, vector<1x16x8xbf16>
    "tpu.trace_start"() <{level = 10 : i32, message = "bnd,bmd->bnm"}> : () -> ()
    %cst_57 = arith.constant dense<0.000000e+00> : vector<1x16x16xf32>
    %90 = tpu.matmul %87, %88, %cst_57 {dimension_numbers = #tpu.dot_dimension_numbers<[2], [2], [1], [1], [0, 0, 0, 1, 1, 1], [0], [0]>} : vector<1x16x8xbf16>, vector<1x16x8xbf16>, vector<1x16x16xf32> -> vector<1x16x16xf32>
    "tpu.trace_stop"() : () -> ()
    %c3 = arith.constant 3 : index
    %c0_58 = arith.constant 0 : index
    %c0_59 = arith.constant 0 : index
    %91 = vector.load %arg2[%c3, %c0_58, %c0_59] : memref<4x16x16xbf16, #tpu.memory_space<vmem>>, vector<1x16x16xbf16>
    %92 = vector.shape_cast %91 : vector<1x16x16xbf16> to vector<16x16xbf16>
    %93 = vector.shape_cast %92 : vector<16x16xbf16> to vector<1x16x16xbf16>
    %94 = arith.extf %93 : vector<1x16x16xbf16> to vector<1x16x16xf32>
    %95 = arith.addf %90, %94 : vector<1x16x16xf32>
    %96 = arith.addf %95, %1 : vector<1x16x16xf32>
    %cst_60 = arith.constant dense<0xFF800000> : vector<1x16xf32>
    %97 = vector.multi_reduction <maximumf>, %96, %cst_60 [2] : vector<1x16x16xf32> to vector<1x16xf32>
    %98 = vector.shape_cast %97 : vector<1x16xf32> to vector<1x16x1xf32>
    %99 = vector.broadcast %98 : vector<1x16x1xf32> to vector<1x16x16xf32>
    %100 = arith.subf %96, %99 : vector<1x16x16xf32>
    %101 = math.exp %100 : vector<1x16x16xf32>
    %cst_61 = arith.constant dense<0.000000e+00> : vector<1x16xf32>
    %102 = vector.multi_reduction <add>, %101, %cst_61 [2] : vector<1x16x16xf32> to vector<1x16xf32>
    %103 = vector.shape_cast %102 : vector<1x16xf32> to vector<1x16x1xf32>
    %104 = tpu.reciprocal %103 {approx = true} : vector<1x16x1xf32> -> vector<1x16x1xf32>
    %105 = vector.broadcast %104 : vector<1x16x1xf32> to vector<1x16x16xf32>
    %106 = arith.mulf %101, %105 : vector<1x16x16xf32>
    %107 = arith.truncf %106 : vector<1x16x16xf32> to vector<1x16x16xbf16>
    "tpu.trace_start"() <{level = 10 : i32, message = "bnm,bmd->bnd"}> : () -> ()
    %cst_62 = arith.constant dense<0.000000e+00> : vector<1x16x8xf32>
    %108 = tpu.matmul %107, %89, %cst_62 {dimension_numbers = #tpu.dot_dimension_numbers<[2], [1], [1], [2], [0, 0, 0, 1, 1, 2], [0], [0]>} : vector<1x16x16xbf16>, vector<1x16x8xbf16>, vector<1x16x8xf32> -> vector<1x16x8xf32>
    "tpu.trace_stop"() : () -> ()
    %109 = vector.shape_cast %108 : vector<1x16x8xf32> to vector<16x8xf32>
    %110 = arith.truncf %109 : vector<16x8xf32> to vector<16x8xbf16>
    %c24_63 = arith.constant 24 : index
    %c0_64 = arith.constant 0 : index
    %111 = vector.load %arg4[%c24_63, %c0_64] : memref<32x32xbf16, #tpu.memory_space<vmem>>, vector<8x32xbf16>
    %cst_65 = arith.constant dense<0.000000e+00> : vector<16x32xf32>
    %112 = tpu.matmul %110, %111, %cst_65 {dimension_numbers = #tpu.dot_dimension_numbers<[1], [0], [0], [1], [0, 0, 1, 1], [], []>} : vector<16x8xbf16>, vector<8x32xbf16>, vector<16x32xf32> -> vector<16x32xf32>
    %113 = arith.addf %86, %112 : vector<16x32xf32>
    %114 = vector.shape_cast %113 : vector<16x32xf32> to vector<1x16x32xf32>
    %115 = arith.truncf %114 : vector<1x16x32xf32> to vector<1x16x32xbf16>
    %c0_66 = arith.constant 0 : index
    %c0_67 = arith.constant 0 : index
    %c0_68 = arith.constant 0 : index
    %116 = vector.load %arg6[%c0_66, %c0_67, %c0_68] : memref<1x16x32xbf16, #tpu.memory_space<vmem>>, vector<1x16x32xbf16>
    tpu.vector_store %arg6[%c0_66, %c0_67, %c0_68], %115 {strides = array<i32>} : memref<1x16x32xbf16, #tpu.memory_space<vmem>>, vector<1x16x32xbf16>,
    return
  }
  func.func @transform_0(%arg0: i32) -> (i32, i32, i32) {
    %c0_i32 = arith.constant 0 : i32
    %c0_i32_0 = arith.constant 0 : i32
    %c0_i32_1 = arith.constant 0 : i32
    return %arg0, %c0_i32, %c0_i32_0 : i32, i32, i32
  }
  func.func @transform_1(%arg0: i32) -> (i32, i32, i32) {
    %c0_i32 = arith.constant 0 : i32
    %c0_i32_0 = arith.constant 0 : i32
    %c0_i32_1 = arith.constant 0 : i32
    %c0_i32_2 = arith.constant 0 : i32
    return %c0_i32, %c0_i32_0, %c0_i32_1 : i32, i32, i32
  }
  func.func @transform_2(%arg0: i32) -> (i32, i32, i32) {
    %c0_i32 = arith.constant 0 : i32
    %c0_i32_0 = arith.constant 0 : i32
    %c0_i32_1 = arith.constant 0 : i32
    %c0_i32_2 = arith.constant 0 : i32
    return %c0_i32, %c0_i32_0, %c0_i32_1 : i32, i32, i32
  }
  func.func @transform_3(%arg0: i32) -> (i32, i32) {
    %c0_i32 = arith.constant 0 : i32
    %c0_i32_0 = arith.constant 0 : i32
    %c0_i32_1 = arith.constant 0 : i32
    return %c0_i32, %c0_i32_0 : i32, i32
  }
  func.func @transform_4(%arg0: i32) -> (i32, i32) {
    %c0_i32 = arith.constant 0 : i32
    %c0_i32_0 = arith.constant 0 : i32
    %c0_i32_1 = arith.constant 0 : i32
    return %c0_i32, %c0_i32_0 : i32, i32
  }
  func.func @transform_5(%arg0: i32) -> (i32, i32, i32) {
    %c0_i32 = arith.constant 0 : i32
    %c0_i32_0 = arith.constant 0 : i32
    %c0_i32_1 = arith.constant 0 : i32
    return %arg0, %c0_i32, %c0_i32_0 : i32, i32, i32
  }
}

module attributes {stable_mosaic.version = 11 : i64} {
  func.func @_add_ln_mlp_kernel(%arg0: i32, %arg1: i32, %arg2: memref<8x32xbf16, #tpu.memory_space<vmem>>, %arg3: memref<8x32xbf16, #tpu.memory_space<vmem>>, %arg4: memref<1x32xf32, #tpu.memory_space<vmem>>, %arg5: memref<1x32xf32, #tpu.memory_space<vmem>>, %arg6: memref<32x128xbf16, #tpu.memory_space<vmem>>, %arg7: memref<1x128xf32, #tpu.memory_space<vmem>>, %arg8: memref<128x32xbf16, #tpu.memory_space<vmem>>, %arg9: memref<1x32xf32, #tpu.memory_space<vmem>>, %arg10: memref<8x32xbf16, #tpu.memory_space<vmem>>, %arg11: memref<8x32xf32, #tpu.memory_space<vmem>>, %arg12: memref<8x32xbf16, #tpu.memory_space<vmem>>) attributes {dimension_semantics = [#tpu.dimension_semantics<parallel>, #tpu.dimension_semantics<arbitrary>], iteration_bounds = array<i64: 1, 1>, scalar_prefetch = 0 : i64, scratch_operands = 2 : i64, tpu.core_type = #tpu.core_type<tc>, window_params = [{transform_indices = @transform_0, window_bounds = array<i64: 8, 32>}, {transform_indices = @transform_1, window_bounds = array<i64: 8, 32>}, {pipeline_mode = #tpu.pipeline_mode<synchronous>, transform_indices = @transform_2, window_bounds = array<i64: 1, 32>}, {pipeline_mode = #tpu.pipeline_mode<synchronous>, transform_indices = @transform_3, window_bounds = array<i64: 1, 32>}, {transform_indices = @transform_4, window_bounds = array<i64: 32, 128>}, {transform_indices = @transform_5, window_bounds = array<i64: 1, 128>}, {transform_indices = @transform_6, window_bounds = array<i64: 128, 32>}, {pipeline_mode = #tpu.pipeline_mode<synchronous>, transform_indices = @transform_7, window_bounds = array<i64: 1, 32>}, {transform_indices = @transform_8, window_bounds = array<i64: 8, 32>}]} {
    %c0_i32 = arith.constant 0 : i32
    %0 = arith.cmpi eq, %arg1, %c0_i32 : i32
    %1 = arith.extui %0 : i1 to i32
    %c0_i32_0 = arith.constant 0 : i32
    %2 = arith.cmpi ne, %1, %c0_i32_0 : i32
    scf.if %2 {
      %c0_19 = arith.constant 0 : index
      %c0_20 = arith.constant 0 : index
      %31 = vector.load %arg2[%c0_19, %c0_20] : memref<8x32xbf16, #tpu.memory_space<vmem>>, vector<8x32xbf16>
      %32 = arith.extf %31 : vector<8x32xbf16> to vector<8x32xf32>
      %c0_21 = arith.constant 0 : index
      %c0_22 = arith.constant 0 : index
      %33 = vector.load %arg3[%c0_21, %c0_22] : memref<8x32xbf16, #tpu.memory_space<vmem>>, vector<8x32xbf16>
      %34 = arith.extf %33 : vector<8x32xbf16> to vector<8x32xf32>
      %35 = arith.addf %32, %34 : vector<8x32xf32>
      %cst_23 = arith.constant dense<0.000000e+00> : vector<8xf32>
      %36 = vector.multi_reduction <add>, %35, %cst_23 [1] : vector<8x32xf32> to vector<8xf32>
      %37 = vector.shape_cast %36 : vector<8xf32> to vector<8x1xf32>
      %cst_24 = arith.constant 3.200000e+01 : f32
      %38 = vector.broadcast %cst_24 : f32 to vector<8x1xf32>
      %39 = arith.divf %37, %38 : vector<8x1xf32>
      %40 = vector.broadcast %39 : vector<8x1xf32> to vector<8x32xf32>
      %41 = arith.subf %35, %40 : vector<8x32xf32>
      %42 = arith.mulf %41, %41 : vector<8x32xf32>
      %cst_25 = arith.constant dense<0.000000e+00> : vector<8xf32>
      %43 = vector.multi_reduction <add>, %42, %cst_25 [1] : vector<8x32xf32> to vector<8xf32>
      %44 = vector.shape_cast %43 : vector<8xf32> to vector<8x1xf32>
      %cst_26 = arith.constant 3.200000e+01 : f32
      %45 = vector.broadcast %cst_26 : f32 to vector<8x1xf32>
      %46 = arith.divf %44, %45 : vector<8x1xf32>
      %47 = vector.broadcast %39 : vector<8x1xf32> to vector<8x32xf32>
      %48 = arith.subf %35, %47 : vector<8x32xf32>
      %cst_27 = arith.constant 9.99999974E-6 : f32
      %49 = vector.broadcast %cst_27 : f32 to vector<8x1xf32>
      %50 = arith.addf %46, %49 : vector<8x1xf32>
      %51 = math.rsqrt %50 : vector<8x1xf32>
      %52 = vector.broadcast %51 : vector<8x1xf32> to vector<8x32xf32>
      %53 = arith.mulf %48, %52 : vector<8x32xf32>
      %c0_28 = arith.constant 0 : index
      %c0_29 = arith.constant 0 : index
      %54 = vector.load %arg4[%c0_28, %c0_29] : memref<1x32xf32, #tpu.memory_space<vmem>>, vector<1x32xf32>
      %55 = vector.broadcast %54 : vector<1x32xf32> to vector<8x32xf32>
      %56 = arith.mulf %53, %55 : vector<8x32xf32>
      %c0_30 = arith.constant 0 : index
      %c0_31 = arith.constant 0 : index
      %57 = vector.load %arg5[%c0_30, %c0_31] : memref<1x32xf32, #tpu.memory_space<vmem>>, vector<1x32xf32>
      %58 = vector.broadcast %57 : vector<1x32xf32> to vector<8x32xf32>
      %59 = arith.addf %56, %58 : vector<8x32xf32>
      %60 = arith.truncf %59 : vector<8x32xf32> to vector<8x32xbf16>
      %c0_32 = arith.constant 0 : index
      %c0_33 = arith.constant 0 : index
      %61 = vector.load %arg12[%c0_32, %c0_33] : memref<8x32xbf16, #tpu.memory_space<vmem>>, vector<8x32xbf16>
      tpu.vector_store %arg12[%c0_32, %c0_33], %60 {strides = array<i32>} : memref<8x32xbf16, #tpu.memory_space<vmem>>, vector<8x32xbf16>,
      %c0_34 = arith.constant 0 : index
      %c0_35 = arith.constant 0 : index
      %62 = vector.load %arg9[%c0_34, %c0_35] : memref<1x32xf32, #tpu.memory_space<vmem>>, vector<1x32xf32>
      %63 = vector.broadcast %62 : vector<1x32xf32> to vector<8x32xf32>
      %64 = arith.addf %35, %63 : vector<8x32xf32>
      %c0_36 = arith.constant 0 : index
      %c0_37 = arith.constant 0 : index
      %65 = vector.load %arg11[%c0_36, %c0_37] : memref<8x32xf32, #tpu.memory_space<vmem>>, vector<8x32xf32>
      tpu.vector_store %arg11[%c0_36, %c0_37], %64 {strides = array<i32>} : memref<8x32xf32, #tpu.memory_space<vmem>>, vector<8x32xf32>,
    } else {
    }
    %c0 = arith.constant 0 : index
    %c0_1 = arith.constant 0 : index
    %3 = vector.load %arg12[%c0, %c0_1] : memref<8x32xbf16, #tpu.memory_space<vmem>>, vector<8x32xbf16>
    %c0_2 = arith.constant 0 : index
    %c0_3 = arith.constant 0 : index
    %4 = vector.load %arg6[%c0_2, %c0_3] : memref<32x128xbf16, #tpu.memory_space<vmem>>, vector<32x128xbf16>
    %cst = arith.constant dense<0.000000e+00> : vector<8x128xf32>
    %5 = tpu.matmul %3, %4, %cst {dimension_numbers = #tpu.dot_dimension_numbers<[1], [0], [0], [1], [0, 0, 1, 1], [], []>} : vector<8x32xbf16>, vector<32x128xbf16>, vector<8x128xf32> -> vector<8x128xf32>
    %c0_4 = arith.constant 0 : index
    %c0_5 = arith.constant 0 : index
    %6 = vector.load %arg7[%c0_4, %c0_5] : memref<1x128xf32, #tpu.memory_space<vmem>>, vector<1x128xf32>
    %7 = vector.broadcast %6 : vector<1x128xf32> to vector<8x128xf32>
    %8 = arith.addf %5, %7 : vector<8x128xf32>
    %9 = arith.mulf %8, %8 : vector<8x128xf32>
    %10 = arith.mulf %8, %9 : vector<8x128xf32>
    %cst_6 = arith.constant 4.471500e-02 : f32
    %11 = vector.broadcast %cst_6 : f32 to vector<8x128xf32>
    %12 = arith.mulf %11, %10 : vector<8x128xf32>
    %13 = arith.addf %8, %12 : vector<8x128xf32>
    %cst_7 = arith.constant 0.797884583 : f32
    %14 = vector.broadcast %cst_7 : f32 to vector<8x128xf32>
    %15 = arith.mulf %14, %13 : vector<8x128xf32>
    %16 = math.tanh %15 : vector<8x128xf32>
    %cst_8 = arith.constant 1.000000e+00 : f32
    %17 = vector.broadcast %cst_8 : f32 to vector<8x128xf32>
    %18 = arith.addf %17, %16 : vector<8x128xf32>
    %cst_9 = arith.constant 5.000000e-01 : f32
    %19 = vector.broadcast %cst_9 : f32 to vector<8x128xf32>
    %20 = arith.mulf %19, %18 : vector<8x128xf32>
    %21 = arith.mulf %8, %20 : vector<8x128xf32>
    %c0_10 = arith.constant 0 : index
    %c0_11 = arith.constant 0 : index
    %22 = vector.load %arg11[%c0_10, %c0_11] : memref<8x32xf32, #tpu.memory_space<vmem>>, vector<8x32xf32>
    %23 = arith.truncf %21 : vector<8x128xf32> to vector<8x128xbf16>
    %c0_12 = arith.constant 0 : index
    %c0_13 = arith.constant 0 : index
    %24 = vector.load %arg8[%c0_12, %c0_13] : memref<128x32xbf16, #tpu.memory_space<vmem>>, vector<128x32xbf16>
    %cst_14 = arith.constant dense<0.000000e+00> : vector<8x32xf32>
    %25 = tpu.matmul %23, %24, %cst_14 {dimension_numbers = #tpu.dot_dimension_numbers<[1], [0], [0], [1], [0, 0, 1, 1], [], []>} : vector<8x128xbf16>, vector<128x32xbf16>, vector<8x32xf32> -> vector<8x32xf32>
    %26 = arith.addf %22, %25 : vector<8x32xf32>
    %c0_15 = arith.constant 0 : index
    %c0_16 = arith.constant 0 : index
    %27 = vector.load %arg11[%c0_15, %c0_16] : memref<8x32xf32, #tpu.memory_space<vmem>>, vector<8x32xf32>
    tpu.vector_store %arg11[%c0_15, %c0_16], %26 {strides = array<i32>} : memref<8x32xf32, #tpu.memory_space<vmem>>, vector<8x32xf32>,
    %c0_i32_17 = arith.constant 0 : i32
    %28 = arith.cmpi eq, %arg1, %c0_i32_17 : i32
    %29 = arith.extui %28 : i1 to i32
    %c0_i32_18 = arith.constant 0 : i32
    %30 = arith.cmpi ne, %29, %c0_i32_18 : i32
    scf.if %30 {
      %c0_19 = arith.constant 0 : index
      %c0_20 = arith.constant 0 : index
      %31 = vector.load %arg11[%c0_19, %c0_20] : memref<8x32xf32, #tpu.memory_space<vmem>>, vector<8x32xf32>
      %32 = arith.truncf %31 : vector<8x32xf32> to vector<8x32xbf16>
      %c0_21 = arith.constant 0 : index
      %c0_22 = arith.constant 0 : index
      %33 = vector.load %arg10[%c0_21, %c0_22] : memref<8x32xbf16, #tpu.memory_space<vmem>>, vector<8x32xbf16>
      tpu.vector_store %arg10[%c0_21, %c0_22], %32 {strides = array<i32>} : memref<8x32xbf16, #tpu.memory_space<vmem>>, vector<8x32xbf16>,
    } else {
    }
    return
  }
  func.func @transform_0(%arg0: i32, %arg1: i32) -> (i32, i32) {
    %c0_i32 = arith.constant 0 : i32
    %c0_i32_0 = arith.constant 0 : i32
    return %arg0, %c0_i32 : i32, i32
  }
  func.func @transform_1(%arg0: i32, %arg1: i32) -> (i32, i32) {
    %c0_i32 = arith.constant 0 : i32
    %c0_i32_0 = arith.constant 0 : i32
    return %arg0, %c0_i32 : i32, i32
  }
  func.func @transform_2(%arg0: i32, %arg1: i32) -> (i32, i32) {
    %c0_i32 = arith.constant 0 : i32
    %c0_i32_0 = arith.constant 0 : i32
    %c0_i32_1 = arith.constant 0 : i32
    return %c0_i32, %c0_i32_0 : i32, i32
  }
  func.func @transform_3(%arg0: i32, %arg1: i32) -> (i32, i32) {
    %c0_i32 = arith.constant 0 : i32
    %c0_i32_0 = arith.constant 0 : i32
    %c0_i32_1 = arith.constant 0 : i32
    return %c0_i32, %c0_i32_0 : i32, i32
  }
  func.func @transform_4(%arg0: i32, %arg1: i32) -> (i32, i32) {
    %c0_i32 = arith.constant 0 : i32
    %c0_i32_0 = arith.constant 0 : i32
    return %c0_i32, %arg1 : i32, i32
  }
  func.func @transform_5(%arg0: i32, %arg1: i32) -> (i32, i32) {
    %c0_i32 = arith.constant 0 : i32
    %c0_i32_0 = arith.constant 0 : i32
    return %c0_i32, %arg1 : i32, i32
  }
  func.func @transform_6(%arg0: i32, %arg1: i32) -> (i32, i32) {
    %c0_i32 = arith.constant 0 : i32
    %c0_i32_0 = arith.constant 0 : i32
    return %arg1, %c0_i32 : i32, i32
  }
  func.func @transform_7(%arg0: i32, %arg1: i32) -> (i32, i32) {
    %c0_i32 = arith.constant 0 : i32
    %c0_i32_0 = arith.constant 0 : i32
    %c0_i32_1 = arith.constant 0 : i32
    return %c0_i32, %c0_i32_0 : i32, i32
  }
  func.func @transform_8(%arg0: i32, %arg1: i32) -> (i32, i32) {
    %c0_i32 = arith.constant 0 : i32
    %c0_i32_0 = arith.constant 0 : i32
    return %arg0, %c0_i32 : i32, i32
  }
}

module attributes {stable_mosaic.version = 11 : i64} {
  func.func @_pool_ln_head_kernel(%arg0: i32, %arg1: memref<2x4x32xbf16, #tpu.memory_space<vmem>>, %arg2: memref<1x32xf32, #tpu.memory_space<vmem>>, %arg3: memref<1x32xf32, #tpu.memory_space<vmem>>, %arg4: memref<32x10xbf16, #tpu.memory_space<vmem>>, %arg5: memref<1x10xf32, #tpu.memory_space<vmem>>, %arg6: memref<2x10xf32, #tpu.memory_space<vmem>>) attributes {dimension_semantics = [#tpu.dimension_semantics<arbitrary>], iteration_bounds = array<i64: 1>, scalar_prefetch = 0 : i64, scratch_operands = 0 : i64, tpu.core_type = #tpu.core_type<tc>, window_params = [{pipeline_mode = #tpu.pipeline_mode<synchronous>, transform_indices = @transform_0, window_bounds = array<i64: 2, 4, 32>}, {pipeline_mode = #tpu.pipeline_mode<synchronous>, transform_indices = @transform_1, window_bounds = array<i64: 1, 32>}, {pipeline_mode = #tpu.pipeline_mode<synchronous>, transform_indices = @transform_2, window_bounds = array<i64: 1, 32>}, {pipeline_mode = #tpu.pipeline_mode<synchronous>, transform_indices = @transform_3, window_bounds = array<i64: 32, 10>}, {pipeline_mode = #tpu.pipeline_mode<synchronous>, transform_indices = @transform_4, window_bounds = array<i64: 1, 10>}, {pipeline_mode = #tpu.pipeline_mode<synchronous>, transform_indices = @transform_5, window_bounds = array<i64: 2, 10>}]} {
    %c0 = arith.constant 0 : index
    %c0_0 = arith.constant 0 : index
    %c0_1 = arith.constant 0 : index
    %0 = vector.load %arg1[%c0, %c0_0, %c0_1] : memref<2x4x32xbf16, #tpu.memory_space<vmem>>, vector<2x4x32xbf16>
    %1 = arith.extf %0 : vector<2x4x32xbf16> to vector<2x4x32xf32>
    %cst = arith.constant dense<0.000000e+00> : vector<2x32xf32>
    %2 = vector.multi_reduction <add>, %1, %cst [1] : vector<2x4x32xf32> to vector<2x32xf32>
    %cst_2 = arith.constant 4.000000e+00 : f32
    %3 = vector.broadcast %cst_2 : f32 to vector<2x32xf32>
    %4 = arith.divf %2, %3 : vector<2x32xf32>
    %cst_3 = arith.constant dense<0.000000e+00> : vector<2xf32>
    %5 = vector.multi_reduction <add>, %4, %cst_3 [1] : vector<2x32xf32> to vector<2xf32>
    %6 = vector.shape_cast %5 : vector<2xf32> to vector<2x1xf32>
    %cst_4 = arith.constant 3.200000e+01 : f32
    %7 = vector.broadcast %cst_4 : f32 to vector<2x1xf32>
    %8 = arith.divf %6, %7 : vector<2x1xf32>
    %9 = vector.broadcast %8 : vector<2x1xf32> to vector<2x32xf32>
    %10 = arith.subf %4, %9 : vector<2x32xf32>
    %11 = arith.mulf %10, %10 : vector<2x32xf32>
    %cst_5 = arith.constant dense<0.000000e+00> : vector<2xf32>
    %12 = vector.multi_reduction <add>, %11, %cst_5 [1] : vector<2x32xf32> to vector<2xf32>
    %13 = vector.shape_cast %12 : vector<2xf32> to vector<2x1xf32>
    %cst_6 = arith.constant 3.200000e+01 : f32
    %14 = vector.broadcast %cst_6 : f32 to vector<2x1xf32>
    %15 = arith.divf %13, %14 : vector<2x1xf32>
    %16 = vector.broadcast %8 : vector<2x1xf32> to vector<2x32xf32>
    %17 = arith.subf %4, %16 : vector<2x32xf32>
    %cst_7 = arith.constant 9.99999974E-6 : f32
    %18 = vector.broadcast %cst_7 : f32 to vector<2x1xf32>
    %19 = arith.addf %15, %18 : vector<2x1xf32>
    %20 = math.rsqrt %19 : vector<2x1xf32>
    %21 = vector.broadcast %20 : vector<2x1xf32> to vector<2x32xf32>
    %22 = arith.mulf %17, %21 : vector<2x32xf32>
    %c0_8 = arith.constant 0 : index
    %c0_9 = arith.constant 0 : index
    %23 = vector.load %arg2[%c0_8, %c0_9] : memref<1x32xf32, #tpu.memory_space<vmem>>, vector<1x32xf32>
    %24 = vector.broadcast %23 : vector<1x32xf32> to vector<2x32xf32>
    %25 = arith.mulf %22, %24 : vector<2x32xf32>
    %c0_10 = arith.constant 0 : index
    %c0_11 = arith.constant 0 : index
    %26 = vector.load %arg3[%c0_10, %c0_11] : memref<1x32xf32, #tpu.memory_space<vmem>>, vector<1x32xf32>
    %27 = vector.broadcast %26 : vector<1x32xf32> to vector<2x32xf32>
    %28 = arith.addf %25, %27 : vector<2x32xf32>
    %29 = arith.truncf %28 : vector<2x32xf32> to vector<2x32xbf16>
    %c0_12 = arith.constant 0 : index
    %c0_13 = arith.constant 0 : index
    %30 = vector.load %arg4[%c0_12, %c0_13] : memref<32x10xbf16, #tpu.memory_space<vmem>>, vector<32x10xbf16>
    %cst_14 = arith.constant dense<0.000000e+00> : vector<2x10xf32>
    %31 = tpu.matmul %29, %30, %cst_14 {dimension_numbers = #tpu.dot_dimension_numbers<[1], [0], [0], [1], [0, 0, 1, 1], [], []>} : vector<2x32xbf16>, vector<32x10xbf16>, vector<2x10xf32> -> vector<2x10xf32>
    %c0_15 = arith.constant 0 : index
    %c0_16 = arith.constant 0 : index
    %32 = vector.load %arg5[%c0_15, %c0_16] : memref<1x10xf32, #tpu.memory_space<vmem>>, vector<1x10xf32>
    %33 = vector.broadcast %32 : vector<1x10xf32> to vector<2x10xf32>
    %34 = arith.addf %31, %33 : vector<2x10xf32>
    %c0_17 = arith.constant 0 : index
    %c0_18 = arith.constant 0 : index
    %35 = vector.load %arg6[%c0_17, %c0_18] : memref<2x10xf32, #tpu.memory_space<vmem>>, vector<2x10xf32>
    tpu.vector_store %arg6[%c0_17, %c0_18], %34 {strides = array<i32>} : memref<2x10xf32, #tpu.memory_space<vmem>>, vector<2x10xf32>,
    return
  }
  func.func @transform_0(%arg0: i32) -> (i32, i32, i32) {
    %c0_i32 = arith.constant 0 : i32
    %c0_i32_0 = arith.constant 0 : i32
    %c0_i32_1 = arith.constant 0 : i32
    %c0_i32_2 = arith.constant 0 : i32
    return %c0_i32, %c0_i32_0, %c0_i32_1 : i32, i32, i32
  }
  func.func @transform_1(%arg0: i32) -> (i32, i32) {
    %c0_i32 = arith.constant 0 : i32
    %c0_i32_0 = arith.constant 0 : i32
    %c0_i32_1 = arith.constant 0 : i32
    return %c0_i32, %c0_i32_0 : i32, i32
  }
  func.func @transform_2(%arg0: i32) -> (i32, i32) {
    %c0_i32 = arith.constant 0 : i32
    %c0_i32_0 = arith.constant 0 : i32
    %c0_i32_1 = arith.constant 0 : i32
    return %c0_i32, %c0_i32_0 : i32, i32
  }
  func.func @transform_3(%arg0: i32) -> (i32, i32) {
    %c0_i32 = arith.constant 0 : i32
    %c0_i32_0 = arith.constant 0 : i32
    %c0_i32_1 = arith.constant 0 : i32
    return %c0_i32, %c0_i32_0 : i32, i32
  }
  func.func @transform_4(%arg0: i32) -> (i32, i32) {
    %c0_i32 = arith.constant 0 : i32
    %c0_i32_0 = arith.constant 0 : i32
    %c0_i32_1 = arith.constant 0 : i32
    return %c0_i32, %c0_i32_0 : i32, i32
  }
  func.func @transform_5(%arg0: i32) -> (i32, i32) {
    %c0_i32 = arith.constant 0 : i32
    %c0_i32_0 = arith.constant 0 : i32
    %c0_i32_1 = arith.constant 0 : i32
    return %c0_i32, %c0_i32_0 : i32, i32
  }
}

</mosaic_0001>

<bundles_post_ra>
// kernel: swin_forward.15
= control target key start
LH: loop header
LB: loop body
LE: loop exit
PB: predicated region body
PF: predicated region fallthrough
CT: control target
= control target key end

     0   :  { %s404_s12 = smov 0   ;;  %s433_s0 = inlined_call_operand.vmem [shape: bf16[32,48], index: 0, kind: input, shape index: {}]   ;;  %s434_s1 = inlined_call_operand.vmem [shape: bf16[48,16], index: 1, kind: input, shape index: {}]   ;;  %s435_s2 = inlined_call_operand.vmem [shape: f32[1,16], index: 2, kind: input, shape index: {}]   ;;  %s436_s3 = inlined_call_operand.vmem [shape: bf16[32,16], index: 3, kind: output, shape index: {}]  }
   0x1 LB: > { %s325_s13 = sadd.s32 4294967295, %s380_s12   ;;  %p329_p0 = scmp.ge.s32.totalorder %s380_s12, 1  ;;  %s380_s12 = sphi %s404_s12, %s13_s12  }
   0x2   : > { %p138_p1 = scmp.lt.s32.totalorder %s380_s12, 3 }
   0x4   : > { %p139_p2 = pnand %p329_p0, %p138_p1 }
   0x5   : > { %v370_v0 = vld [vmem:[%s434_s1] sm:$0xff] (!%p139_p2)   ;;  %v382_v1 = vmov (!%p139_p2), 0.0   ;;  %v371_v2 = vld [vmem:[%s434_s1 + $0x8] sm:$0xff] (!%p139_p2)   ;;  %vm383_vm0 = vmmov (!%p139_p2), 0   ;;  %s330_s18 = sshll.u32 (!%p139_p2), %s325_s13, 1  ;;  %v372_v3 = vld [vmem:[%s434_s1 + $0x10] sm:$0xff] (!%p139_p2)  }
   0x6   : > { %142 = sbr.rel (%p139_p2) target bundleno = 237 (0xed), region = 32  ;;  %350 = vmatprep.subr.bf16.mxu0 (!%p139_p2), %v382_v1  ;;  %356 = vmatprep.mubr.msk.bf16.mxu0 (!%p139_p2), %vm383_vm0, %v382_v1  ;;  %p163_p3 = scmp.lt.s32.totalorder (!%p139_p2), %s330_s18, 3  ;;  %vm213_vm1 = vcmask (!%p139_p2), 392192   ;;  %v334_v5 = vld [vmem:[%s435_s2] ss:$0 sm:$0xff] (!%p139_p2)  ;;  %vm266_vm2 = vcmask (!%p139_p2), 125952  }
   0x7   : > { %351 = vmatpush3.bf16.msra.mxu0 (!%p139_p2), %v370_v0 }
   0x8   : > { %352 = vmatprep.subr.bf16.mxu0 (!%p139_p2), %v382_v1 }
   0xb   : > { %353 = vmatpush3.bf16.msra.mxu0 (!%p139_p2), %v371_v2 }
   0xc   : > { %354 = vmatprep.subr.bf16.mxu0 (!%p139_p2), %v382_v1 }
   0xd   : > { %s438_s18 = smov (!%p163_p3, %s330_s18), 3 }
   0xe   : > { %s331_s21 = sshll.u32 %s438_s18, 2 }
   0xf   : > { %s166_s24 = scalar_lea.vmem %s433_s0, %s331_s21  ;;  %355 = vmatpush3.bf16.msra.mxu0 %v372_v3  ;;  %s172_s29 = scalar_lea.vmem %s436_s3, %s331_s21 }
  0x10   : > { %v373_v4 = vld [vmem:[%s166_s24] sm:$0xff]  }
  0x12   : > { %357 = vmatmul.mubr.msk.bf16.vlgmr.msra.gmra.mrb[0].mxu0 %vm213_vm1, %v373_v4 }
  0xe5   : > { %v251_v6 = vpop.f32.mrb[0].mxu0 }
  0xe6   : > { %v252_v7 = vadd.f32 %v334_v5, %v251_v6  ;;  %v358_v8 = vpop.f32.mrb[1].mxu0 }
  0xe7   : > { %v254_v9 = vpop.f32.mrb[2].mxu0 }
  0xe8   : > { %v344_v10 = vpack.c.bf16 %v252_v7, %v252_v7  ;;  %v255_v11 = vadd.f32 %v334_v5, %v254_v9  ;;  %v359_v12 = vpop.f32.mrb[3].mxu0 }
  0xea   : > { %267 = vst.msk [vmem:[%s172_s29] sm:$0xf] %vm266_vm2, %v344_v10  ;;  %v345_v13 = vpack.c.bf16 %v255_v11, %v255_v11 }
  0xec   : > { %268 = vst.msk [vmem:[%s172_s29 + $0x4] sm:$0xf] %vm266_vm2, %v345_v13 }
  0xed PF: > { %s13_s12 = sadd.s32 1, %s380_s12  }
  0xee   : > { %p10_p4 = scmp.ge.s32.totalorder %s13_s12, 4  }
  0xf0   :  { %12 = sbr.rel (!%p10_p4) target bundleno = 1 (0x1), region = 62 }

// kernel: swin_forward.16
= control target key start
LH: loop header
LB: loop body
LE: loop exit
PB: predicated region body
PF: predicated region fallthrough
CT: control target
= control target key end

     0   :  { %s708_s18 = smov 0   ;;  %s812_s0 = inlined_call_operand.vmem [shape: bf16[128,16], index: 0, kind: input, shape index: {}]   ;;  %s813_s1 = inlined_call_operand.vmem [shape: f32[1,16], index: 1, kind: input, shape index: {}]   ;;  %s814_s2 = inlined_call_operand.vmem [shape: f32[1,16], index: 2, kind: input, shape index: {}]   ;;  %s815_s3 = inlined_call_operand.vmem [shape: bf16[16,48], index: 3, kind: input, shape index: {}]   ;;  %s816_s4 = inlined_call_operand.vmem [shape: f32[1,48], index: 4, kind: input, shape index: {}]   ;;  %s817_s5 = inlined_call_operand.vmem [shape: bf16[128,48], index: 5, kind: output, shape index: {}]  }
   0x1 LB: > { %s574_s19 = sadd.s32 4294967295, %s676_s18   ;;  %p578_p0 = scmp.ge.s32.totalorder %s676_s18, 1  ;;  %s676_s18 = sphi %s708_s18, %s15_s18  }
   0x2   : > { %p188_p1 = scmp.lt.s32.totalorder %s676_s18, 3 }
   0x4   : > { %p189_p2 = pnand %p578_p0, %p188_p1 }
   0x5   : > { %s579_s20 = sshll.u32 (!%p189_p2), %s574_s19, 3  ;;  %vm245_vm0 = vcmask (!%p189_p2), 130048   ;;  %v653_v60 = vld [vmem:[%s815_s3] sm:$0xff] (!%p189_p2)   ;;  %vm509_vm1 = vcmask (!%p189_p2), 388096  }
   0x6   : > { %192 = sbr.rel (%p189_p2) target bundleno = 570 (0x23a), region = 40  ;;  %p217_p3 = scmp.lt.s32.totalorder (!%p189_p2), %s579_s20, 15  ;;  %633 = vmatprep.subr.bf16.mxu0 (!%p189_p2), %v653_v60  ;;  %643 = vmatprep.subr.bf16.mxu1 (!%p189_p2), %v653_v60 }
   0x7   : > { %634 = vmatpush3.bf16.msra.mxu0 (!%p189_p2), %v653_v60  ;;  %644 = vmatpush3.bf16.msra.mxu1 (!%p189_p2), %v653_v60 }
   0xd   : > { %s819_s20 = smov (!%p217_p3, %s579_s20), 15 }
   0xe   : > { %s580_s21 = sshll.u32 %s819_s20, 2 }
   0xf   : > { %s220_s24 = scalar_lea.vmem %s812_s0, %s580_s21  ;;  %s226_s10 = scalar_lea.vmem %s817_s5, %s580_s21 }
  0x10   : > { %v610_v0 = vld [vmem:[%s220_s24] sm:$0xff]   ;;  %v626_v1 = vld [vmem:[%s220_s24 + $0x10] sm:$0xff]   ;;  %v625_v6 = vld [vmem:[%s220_s24 + $0x8] sm:$0xff]  }
  0x11   : > { %v611_v2 = vunpack.c.l.bf16 %v610_v0  ;;  %v619_v3 = vunpack.c.l.bf16 %v626_v1  ;;  %v612_v4 = vunpack.c.h.bf16 %v610_v0  ;;  %v620_v5 = vunpack.c.h.bf16 %v626_v1  ;;  %v627_v13 = vld [vmem:[%s220_s24 + $0x18] sm:$0xff]  }
  0x12   : > { %v615_v11 = vunpack.c.l.bf16 %v625_v6  ;;  %v616_v12 = vunpack.c.h.bf16 %v625_v6  ;;  %v623_v16 = vunpack.c.l.bf16 %v627_v13  ;;  %v624_v17 = vunpack.c.h.bf16 %v627_v13 }
  0x13   : > { %v246_v7 = vsel %vm245_vm0, %v611_v2, 0.0  ;;  %v258_v8 = vsel %vm245_vm0, %v619_v3, 0.0  ;;  %v249_v9 = vsel %vm245_vm0, %v612_v4, 0.0  ;;  %v261_v10 = vsel %vm245_vm0, %v620_v5, 0.0 }
  0x14   : > { %247 = vadd.xlane.f32.xlu0 %v246_v7  ;;  %259 = vadd.xlane.f32.xlu1 %v258_v8  ;;  %v252_v14 = vsel %vm245_vm0, %v615_v11, 0.0  ;;  %v255_v15 = vsel %vm245_vm0, %v616_v12, 0.0  ;;  %v264_v18 = vsel %vm245_vm0, %v623_v16, 0.0  ;;  %v267_v19 = vsel %vm245_vm0, %v624_v17, 0.0 }
  0x18   : > { %250 = vadd.xlane.f32.xlu0 %v249_v9  ;;  %262 = vadd.xlane.f32.xlu1 %v261_v10 }
  0x1c   : > { %253 = vadd.xlane.f32.xlu0 %v252_v14  ;;  %256 = vadd.xlane.f32.xlu1 %v255_v15 }
  0x20   : > { %265 = vadd.xlane.f32.xlu0 %v264_v18  ;;  %268 = vadd.xlane.f32.xlu1 %v267_v19 }
  0xa1   : > { %v248_v20 = vpop.xlane.xlu0 %247  ;;  %v260_v21 = vpop.xlane.xlu1 %259 }
  0xa2   : > { %v271_v22 = vmul.f32 0.0625, %v248_v20  ;;  %v275_v23 = vmul.f32 0.0625, %v260_v21 }
  0xa4   : > { %v732_v24 = vsub.f32 %v611_v2, %v271_v22  ;;  %v734_v25 = vsub.f32 %v619_v3, %v275_v23  ;;  %v583_v22 = vld [vmem:[%s813_s1] ss:$0 sm:$0xff] }
  0xa5   : > { %v251_v26 = vpop.xlane.xlu0 %250  ;;  %v263_v27 = vpop.xlane.xlu1 %262 }
  0xa6   : > { %v272_v28 = vmul.f32 0.0625, %v251_v26  ;;  %v276_v29 = vmul.f32 0.0625, %v263_v27  ;;  %v287_v30 = vmul.f32 %v732_v24, %v732_v24  ;;  %v291_v31 = vmul.f32 %v734_v25, %v734_v25 }
  0xa8   : > { %v740_v32 = vsub.f32 %v612_v4, %v272_v28  ;;  %v742_v33 = vsub.f32 %v620_v5, %v276_v29  ;;  %v295_v34 = vsel %vm245_vm0, %v287_v30, 0.0  ;;  %v307_v37 = vsel %vm245_vm0, %v291_v31, 0.0  ;;  %v584_v30 = vld [vmem:[%s814_s2] ss:$0 sm:$0xff] }
  0xa9   : > { %296 = vadd.xlane.f32.xlu0 %v295_v34  ;;  %v254_v35 = vpop.xlane.xlu0 %253  ;;  %v257_v36 = vpop.xlane.xlu1 %256 }
  0xaa   : > { %v273_v38 = vmul.f32 0.0625, %v254_v35  ;;  %v274_v39 = vmul.f32 0.0625, %v257_v36  ;;  %v288_v40 = vmul.f32 %v740_v32, %v740_v32  ;;  %v292_v41 = vmul.f32 %v742_v33, %v742_v33 }
  0xac   : > { %v750_v42 = vsub.f32 %v615_v11, %v273_v38  ;;  %v752_v43 = vsub.f32 %v616_v12, %v274_v39  ;;  %v298_v44 = vsel %vm245_vm0, %v288_v40, 0.0  ;;  %v310_v47 = vsel %vm245_vm0, %v292_v41, 0.0 }
  0xad   : > { %308 = vadd.xlane.f32.xlu0 %v307_v37  ;;  %299 = vadd.xlane.f32.xlu1 %v298_v44  ;;  %v266_v45 = vpop.xlane.xlu0 %265  ;;  %v269_v46 = vpop.xlane.xlu1 %268 }
  0xae   : > { %v277_v48 = vmul.f32 0.0625, %v266_v45  ;;  %v278_v49 = vmul.f32 0.0625, %v269_v46  ;;  %v289_v50 = vmul.f32 %v750_v42, %v750_v42  ;;  %v290_v51 = vmul.f32 %v752_v43, %v752_v43 }
  0xb0   : > { %v760_v52 = vsub.f32 %v623_v16, %v277_v48  ;;  %v762_v53 = vsub.f32 %v624_v17, %v278_v49  ;;  %v301_v54 = vsel %vm245_vm0, %v289_v50, 0.0  ;;  %v304_v55 = vsel %vm245_vm0, %v290_v51, 0.0 }
  0xb1   : > { %311 = vadd.xlane.f32.xlu1 %v310_v47  ;;  %302 = vadd.xlane.f32.xlu0 %v301_v54 }
  0xb2   : > { %v293_v56 = vmul.f32 %v760_v52, %v760_v52  ;;  %v294_v57 = vmul.f32 %v762_v53, %v762_v53 }
  0xb4   : > { %v313_v58 = vsel %vm245_vm0, %v293_v56, 0.0  ;;  %v316_v59 = vsel %vm245_vm0, %v294_v57, 0.0 }
  0xb5   : > { %305 = vadd.xlane.f32.xlu1 %v304_v55  ;;  %314 = vadd.xlane.f32.xlu0 %v313_v58 }
  0xb9   : > { %317 = vadd.xlane.f32.xlu1 %v316_v59 }
 0x136   : > { %v297_v61 = vpop.xlane.xlu0 %296 }
 0x137   : > { %v319_v62 = vmul.f32 0.0625, %v297_v61 }
 0x139   : > { %v327_v63 = vadd.f32 1e-05, %v319_v62 }
 0x13a   : > { %v300_v0 = vpop.xlane.xlu1 %299  ;;  %v309_v1 = vpop.xlane.xlu0 %308 }
 0x13b   : > { %654 = vrsqrt.f32 %v327_v63  ;;  %v320_v2 = vmul.f32 0.0625, %v300_v0  ;;  %v323_v3 = vmul.f32 0.0625, %v309_v1 }
 0x13d   : > { %v328_v4 = vadd.f32 1e-05, %v320_v2  ;;  %v331_v5 = vadd.f32 1e-05, %v323_v3 }
 0x13e   : > { %v312_v6 = vpop.xlane.xlu1 %311  ;;  %v303_v7 = vpop.xlane.xlu0 %302 }
 0x13f   : > { %656 = vrsqrt.f32 %v328_v4  ;;  %v324_v8 = vmul.f32 0.0625, %v312_v6  ;;  %v321_v9 = vmul.f32 0.0625, %v303_v7 }
 0x140   : > { %658 = vrsqrt.f32 %v331_v5 }
 0x141   : > { %v332_v10 = vadd.f32 1e-05, %v324_v8  ;;  %v329_v11 = vadd.f32 1e-05, %v321_v9 }
 0x142   : > { %v306_v12 = vpop.xlane.xlu1 %305  ;;  %v315_v13 = vpop.xlane.xlu0 %314 }
 0x143   : > { %660 = vrsqrt.f32 %v332_v10  ;;  %v322_v14 = vmul.f32 0.0625, %v306_v12  ;;  %v325_v15 = vmul.f32 0.0625, %v315_v13 }
 0x144   : > { %662 = vrsqrt.f32 %v329_v11 }
 0x145   : > { %v655_v16 = vpop.eup %654  ;;  %v330_v17 = vadd.f32 1e-05, %v322_v14  ;;  %v333_v18 = vadd.f32 1e-05, %v325_v15 }
 0x146   : > { %v318_v19 = vpop.xlane.xlu1 %317  ;;  %v343_v20 = vmul.f32 %v655_v16, %v732_v24 }
 0x147   : > { %664 = vrsqrt.f32 %v330_v17  ;;  %v326_v21 = vmul.f32 0.0625, %v318_v19 }
 0x148   : > { %666 = vrsqrt.f32 %v333_v18  ;;  %v358_v29 = vmul.f32 %v583_v22, %v343_v20 }
 0x149   : > { %v657_v23 = vpop.eup %656  ;;  %v334_v26 = vadd.f32 1e-05, %v326_v21 }
 0x14a   : > { %v659_v27 = vpop.eup %658  ;;  %v344_v28 = vmul.f32 %v657_v23, %v740_v32  ;;  %v373_v36 = vadd.f32 %v584_v30, %v358_v29 }
 0x14b   : > { %668 = vrsqrt.f32 %v334_v26  ;;  %v347_v24 = vmul.f32 %v659_v27, %v734_v25 }
 0x14c   : > { %v359_v31 = vmul.f32 %v583_v22, %v344_v28 }
 0x14d   : > { %v661_v34 = vpop.eup %660  ;;  %v362_v39 = vmul.f32 %v583_v22, %v347_v24 }
 0x14e   : > { %v663_v35 = vpop.eup %662  ;;  %v374_v37 = vadd.f32 %v584_v30, %v359_v31  ;;  %v348_v38 = vmul.f32 %v661_v34, %v742_v33 }
 0x14f   : > { %v345_v40 = vmul.f32 %v663_v35, %v750_v42  ;;  %v377_v47 = vadd.f32 %v584_v30, %v362_v39 }
 0x150   : > { %v381_v41 = vpack.c.bf16 %v374_v37, %v373_v36  ;;  %v363_v32 = vmul.f32 %v583_v22, %v348_v38 }
 0x151   : > { %v665_v44 = vpop.eup %664  ;;  %v360_v48 = vmul.f32 %v583_v22, %v345_v40 }
 0x152   : > { %v667_v45 = vpop.eup %666  ;;  %v346_v46 = vmul.f32 %v665_v44, %v752_v43  ;;  %635 = vmatprep.mubr.msk.bf16.mxu0 %vm245_vm0, %v381_v41  ;;  %v378_v25 = vadd.f32 %v584_v30, %v363_v32 }
 0x153   : > { %v349_v49 = vmul.f32 %v667_v45, %v760_v52  ;;  %v375_v42 = vadd.f32 %v584_v30, %v360_v48  ;;  %v585_v52 = vld [vmem:[%s816_s4] ss:$0 sm:$0xff] }
 0x154   : > { %v383_v50 = vpack.c.bf16 %v378_v25, %v377_v47  ;;  %v361_v51 = vmul.f32 %v583_v22, %v346_v46 }
 0x155   : > { %v669_v54 = vpop.eup %668  ;;  %v364_v56 = vmul.f32 %v583_v22, %v349_v49 }
 0x156   : > { %v350_v33 = vmul.f32 %v669_v54, %v762_v53  ;;  %639 = vmatprep.mubr.msk.bf16.mxu1 %vm245_vm0, %v383_v50  ;;  %v376_v55 = vadd.f32 %v584_v30, %v361_v51 }
 0x157   : > { %v379_v58 = vadd.f32 %v584_v30, %v364_v56 }
 0x158   : > { %v382_v57 = vpack.c.bf16 %v376_v55, %v375_v42  ;;  %v365_v43 = vmul.f32 %v583_v22, %v350_v33 }
 0x15a   : > { %636 = vmatmul.mubr.msk.bf16.vlgmr.msra.gmra.mrb[0].mxu0 %vm245_vm0, %v382_v57  ;;  %v380_v59 = vadd.f32 %v584_v30, %v365_v43 }
 0x15c   : > { %v384_v60 = vpack.c.bf16 %v380_v59, %v379_v58 }
 0x15e   : > { %640 = vmatmul.mubr.msk.bf16.vlgmr.msra.gmra.mrb[0].mxu1 %vm245_vm0, %v384_v60 }
 0x22d   : > { %v637_v53 = vpop.f32.mrb[0].mxu0 }
 0x22e   : > { %v455_v61 = vadd.f32 %v637_v53, %v585_v52  ;;  %v446_v62 = vpop.f32.mrb[1].mxu0 }
 0x22f   : > { %v447_v63 = vadd.f32 %v585_v52, %v446_v62  ;;  %v638_v0 = vpop.f32.mrb[2].mxu0 }
 0x230   : > { %v603_v1 = vpack.c.bf16 %v455_v61, %v455_v61  ;;  %v458_v2 = vadd.f32 %v638_v0, %v585_v52  ;;  %v449_v3 = vpop.f32.mrb[3].mxu0 }
 0x231   : > { %v601_v4 = vpack.c.bf16 %v447_v63, %v447_v63  ;;  %v450_v5 = vadd.f32 %v585_v52, %v449_v3  ;;  %v641_v6 = vpop.f32.mrb[0].mxu1 }
 0x232   : > { %512 = vst.msk [vmem:[%s226_s10 + $0x8] sm:$0xf] %vm509_vm1, %v603_v1  ;;  %v604_v7 = vpack.c.bf16 %v458_v2, %v458_v2  ;;  %v471_v8 = vadd.f32 %v641_v6, %v585_v52  ;;  %v462_v9 = vpop.f32.mrb[1].mxu1 }
 0x233   : > { %510 = vst.msk [vmem:[%s226_s10] sm:$0xf] %vm509_vm1, %v601_v4  ;;  %v602_v10 = vpack.c.bf16 %v450_v5, %v450_v5  ;;  %v463_v11 = vadd.f32 %v585_v52, %v462_v9  ;;  %v642_v12 = vpop.f32.mrb[2].mxu1 }
 0x234   : > { %513 = vst.msk [vmem:[%s226_s10 + $0xc] sm:$0xf] %vm509_vm1, %v604_v7  ;;  %v607_v13 = vpack.c.bf16 %v471_v8, %v471_v8  ;;  %v474_v14 = vadd.f32 %v642_v12, %v585_v52  ;;  %v465_v15 = vpop.f32.mrb[3].mxu1 }
 0x235   : > { %511 = vst.msk [vmem:[%s226_s10 + $0x4] sm:$0xf] %vm509_vm1, %v602_v10  ;;  %v605_v16 = vpack.c.bf16 %v463_v11, %v463_v11  ;;  %v466_v17 = vadd.f32 %v585_v52, %v465_v15 }
 0x236   : > { %516 = vst.msk [vmem:[%s226_s10 + $0x18] sm:$0xf] %vm509_vm1, %v607_v13  ;;  %v608_v18 = vpack.c.bf16 %v474_v14, %v474_v14 }
 0x237   : > { %514 = vst.msk [vmem:[%s226_s10 + $0x10] sm:$0xf] %vm509_vm1, %v605_v16  ;;  %v606_v19 = vpack.c.bf16 %v466_v17, %v466_v17 }
 0x238   : > { %517 = vst.msk [vmem:[%s226_s10 + $0x1c] sm:$0xf] %vm509_vm1, %v608_v18 }
 0x239   : > { %515 = vst.msk [vmem:[%s226_s10 + $0x14] sm:$0xf] %vm509_vm1, %v606_v19 }
 0x23a PF: > { %s15_s18 = sadd.s32 1, %s676_s18  }
 0x23b   : > { %p12_p4 = scmp.ge.s32.totalorder %s15_s18, 4  }
 0x23d   :  { %14 = sbr.rel (!%p12_p4) target bundleno = 1 (0x1), region = 70 }

// kernel: swin_forward.17
= control target key start
LH: loop header
LB: loop body
LE: loop exit
PB: predicated region body
PF: predicated region fallthrough
CT: control target
= control target key end

     0   :  { %s1989_s18 = smov 0   ;;  %s2294_s0 = inlined_call_operand.vmem [shape: bf16[8,16,48], index: 0, kind: input, shape index: {}]   ;;  %s2295_s1 = inlined_call_operand.vmem [shape: bf16[2,16,16], index: 1, kind: input, shape index: {}]   ;;  %s2296_s2 = inlined_call_operand.vmem [shape: bf16[4,16,16], index: 2, kind: input, shape index: {}]   ;;  %s2297_s3 = inlined_call_operand.vmem [shape: bf16[16,16], index: 3, kind: input, shape index: {}]   ;;  %s2298_s4 = inlined_call_operand.vmem [shape: f32[1,16], index: 4, kind: input, shape index: {}]   ;;  %s2299_s5 = inlined_call_operand.vmem [shape: bf16[8,16,16], index: 5, kind: output, shape index: {}]  }
   0x1 LB: > { %s1587_s19 = sadd.s32 4294967295, %s1950_s18   ;;  %p1591_p0 = scmp.ge.s32.totalorder %s1950_s18, 1  ;;  %s1950_s18 = sphi %s1989_s18, %s15_s18  }
   0x2   : > { %p189_p1 = scmp.lt.s32.totalorder %s1950_s18, 3 }
   0x4   : > { %p190_p2 = pnand %p1591_p0, %p189_p1 }
   0x5   : > { %s1592_s20 = sshll.u32 (!%p190_p2), %s1587_s19, 2  ;;  %v1952_v0 = vmov (!%p190_p2), 0.0   ;;  %vm1953_vm0 = vmmov (!%p190_p2), 0   ;;  %s1954_s25 = smov (!%p190_p2), 112   ;;  %vm277_vm1 = vcmask (!%p190_p2), 64512   ;;  %v1670_v13 = vld [vmem:[%s2295_s1] sm:$0xff] (!%p190_p2)  }
   0x6   : > { %193 = sbr.rel (%p190_p2) target bundleno = 1951 (0x79f), region = 40  ;;  %p220_p3 = scmp.lt.s32.totalorder (!%p190_p2), %s1592_s20, 7  ;;  %1723 = vmatprep.subr.bf16.mxu1 (!%p190_p2), %v1952_v0  ;;  %1735 = vmatprep.subr.bf16.mxu0 (!%p190_p2), %v1952_v0  ;;  %v2059_v14 = vld [vmem:[%s2296_s2] sm:$0xff] (!%p190_p2)   ;;  %v1671_v15 = vunpack.c.l.bf16 (!%p190_p2), %v1670_v13  ;;  %v2064_v16 = vld [vmem:[%s2296_s2 + $0x10] sm:$0xff] (!%p190_p2)   ;;  %v1672_v17 = vunpack.c.h.bf16 (!%p190_p2), %v1670_v13  ;;  %vm495_vm2 = vcmask (!%p190_p2), 130048   ;;  %v2074_v33 = vld [vmem:[%s2296_s2 + $0x8] sm:$0xff] (!%p190_p2)  }
   0x7   : > { %1725 = vmatprep.mubr.msk.bf16.mxu1 (!%p190_p2), %vm1953_vm0, %v1952_v0  ;;  %1737 = vmatprep.mubr.msk.bf16.mxu0 (!%p190_p2), %vm1953_vm0, %v1952_v0  ;;  %v1655_v18 = vunpack.c.l.bf16 (!%p190_p2), %v2059_v14  ;;  %v1656_v23 = vunpack.c.h.bf16 (!%p190_p2), %v2059_v14  ;;  %v1663_v24 = vunpack.c.l.bf16 (!%p190_p2), %v2064_v16  ;;  %v1659_v38 = vunpack.c.l.bf16 (!%p190_p2), %v2074_v33  ;;  %v2090_v48 = vld [vmem:[%s2296_s2 + $0x18] sm:$0xff] (!%p190_p2)   ;;  %s1955_s11 = smov (!%p190_p2), 96   ;;  %s1956_s12 = smov (!%p190_p2), 120  }
   0x8   : > { %v1660_v43 = vunpack.c.h.bf16 (!%p190_p2), %v2074_v33  ;;  %v1664_v52 = vunpack.c.h.bf16 (!%p190_p2), %v2064_v16  ;;  %v1667_v53 = vunpack.c.l.bf16 (!%p190_p2), %v2090_v48  ;;  %v1668_v59 = vunpack.c.h.bf16 (!%p190_p2), %v2090_v48  ;;  %s1957_s13 = smov (!%p190_p2), 104   ;;  %s1958_s19 = smov (!%p190_p2), 88  }
   0x9   : > { %vm793_vm3 = vcmask (!%p190_p2), 1043456   ;;  %vm1520_vm4 = vcmask (!%p190_p2), 125952  }
   0xd   : > { %s2301_s20 = smov (!%p220_p3, %s1592_s20), 7 }
   0xe   : > { %s1643_s21 = sshll.u32 %s2301_s20, 3 }
   0xf   : > { %s2011_s24 = scalar_lea.vmem %s2294_s0, %s1643_s21  ;;  %s231_s28 = scalar_lea.vmem %s2299_s5, %s1643_s21 }
  0x10   : > { %v2014_v1 = vld [vmem:[%s2011_s24] sm:$0xff]   ;;  %v2017_v2 = vld [vmem:[%s2011_s24 + $0x10] sm:$0xff]   ;;  %v2021_v3 = vld [vmem:[%s2011_s24 + $0x8] sm:$0xff]  }
  0x11   : > { %275 = vrot.lane.b32.xlu0 %v2014_v1, %s1954_s25  ;;  %384 = vrot.lane.b32.xlu1 %v2017_v2, %s1954_s25  ;;  %v2025_v4 = vld [vmem:[%s2011_s24 + $0x18] sm:$0xff]  }
  0x15   : > { %330 = vrot.lane.b32.xlu0 %v2021_v3, %s1954_s25  ;;  %438 = vrot.lane.b32.xlu1 %v2025_v4, %s1954_s25 }
  0x83   : > { %v276_v5 = vpop.permute.xlu0 %275  ;;  %v385_v7 = vpop.permute.xlu1 %384 }
  0x84   : > { %v282_v6 = vsel %vm277_vm1, %v276_v5, 0  ;;  %v390_v8 = vsel %vm277_vm1, %v385_v7, 0 }
  0x85   : > { %1724 = vmatpush3.bf16.xpose.msra.mxu1 %v282_v6  ;;  %1736 = vmatpush3.bf16.xpose.msra.mxu0 %v390_v8 }
  0x86   : > { %1729 = vmatprep.subr.bf16.mxu1 %v1952_v0  ;;  %1747 = vmatprep.subr.bf16.mxu0 %v1952_v0 }
  0x87   : > { %v331_v9 = vpop.permute.xlu0 %330  ;;  %v439_v11 = vpop.permute.xlu1 %438 }
  0x88   : > { %v336_v10 = vsel %vm277_vm1, %v331_v9, 0  ;;  %v444_v12 = vsel %vm277_vm1, %v439_v11, 0 }
  0x8c   : > { %1726 = vmatmul.mubr.msk.bf16.vlgmr.msra.gmra.mrb[0].mxu1 %vm277_vm1, %v2014_v1  ;;  %1738 = vmatmul.mubr.msk.bf16.vlgmr.msra.gmra.mrb[0].mxu0 %vm277_vm1, %v2017_v2 }
  0x8d   : > { %1730 = vmatpush3.bf16.xpose.msra.mxu1 %v336_v10  ;;  %1731 = vmatprep.mubr.msk.bf16.mxu1 %vm1953_vm0, %v1952_v0 }
  0x8e   : > { %1741 = vmatprep.subr.bf16.mxu1 %v1952_v0  ;;  %1749 = vmatprep.mubr.msk.bf16.mxu0 %vm1953_vm0, %v1952_v0 }
  0x94   : > { %1732 = vmatmul.mubr.msk.bf16.vlgmr.msra.gmra.mrb[4].mxu1 %vm277_vm1, %v2021_v3 }
  0x95   : > { %1742 = vmatpush3.bf16.xpose.msra.mxu1 %v444_v12  ;;  %1743 = vmatprep.mubr.msk.bf16.mxu1 %vm1953_vm0, %v1952_v0 }
  0x96   : > { %1753 = vmatprep.subr.bf16.mxu1 %v1952_v0 }
  0x9c   : > { %1744 = vmatmul.mubr.msk.bf16.vlgmr.msra.gmra.mrb[8].mxu1 %vm277_vm1, %v2025_v4 }
  0x9d   : > { %1755 = vmatprep.mubr.msk.bf16.mxu1 %vm1953_vm0, %v1952_v0 }
 0x15f   : > { %v318_v19 = vpop.f32.mrb[0].mxu1  ;;  %v426_v22 = vpop.f32.mrb[0].mxu0 }
 0x160   : > { %v319_v20 = vadd.f32 %v1671_v15, %v318_v19  ;;  %v1727_v21 = vpop.f32.mrb[1].mxu1  ;;  %v427_v26 = vadd.f32 %v1671_v15, %v426_v22  ;;  %v1739_v27 = vpop.f32.mrb[1].mxu0 }
 0x161   : > { %v321_v25 = vpop.f32.mrb[2].mxu1  ;;  %v429_v31 = vpop.f32.mrb[2].mxu0 }
 0x162   : > { %v322_v28 = vadd.f32 %v1672_v17, %v321_v25  ;;  %v1728_v29 = vpop.f32.mrb[3].mxu1  ;;  %v487_v30 = vadd.f32 %v1655_v18, %v319_v20  ;;  %v1740_v32 = vpop.f32.mrb[3].mxu0  ;;  %v491_v36 = vadd.f32 %v1663_v24, %v427_v26  ;;  %v430_v49 = vadd.f32 %v1672_v17, %v429_v31 }
 0x164   : > { %v496_v34 = vsel %vm495_vm2, %v487_v30, -inf  ;;  %v488_v35 = vadd.f32 %v1656_v23, %v322_v28  ;;  %v508_v42 = vsel %vm495_vm2, %v491_v36, -inf  ;;  %v492_v58 = vadd.f32 %v1664_v52, %v430_v49 }
 0x165   : > { %497 = vmax.xlane.f32.xlu0 %v496_v34 }
 0x166   : > { %v499_v37 = vsel %vm495_vm2, %v488_v35, -inf  ;;  %v511_v5 = vsel %vm495_vm2, %v492_v58, -inf }
 0x167   : > { %500 = vmax.xlane.f32.xlu1 %v499_v37  ;;  %v372_v39 = vpop.f32.mrb[4].mxu1 }
 0x168   : > { %v373_v40 = vadd.f32 %v1671_v15, %v372_v39  ;;  %v1733_v41 = vpop.f32.mrb[5].mxu1 }
 0x169   : > { %v375_v44 = vpop.f32.mrb[6].mxu1 }
 0x16a   : > { %v376_v45 = vadd.f32 %v1672_v17, %v375_v44  ;;  %v1734_v46 = vpop.f32.mrb[7].mxu1  ;;  %v489_v47 = vadd.f32 %v1659_v38, %v373_v40 }
 0x16b   : > { %509 = vmax.xlane.f32.xlu1 %v508_v42 }
 0x16c   : > { %v502_v50 = vsel %vm495_vm2, %v489_v47, -inf  ;;  %v490_v51 = vadd.f32 %v1660_v43, %v376_v45 }
 0x16d   : > { %503 = vmax.xlane.f32.xlu0 %v502_v50 }
 0x16e   : > { %v505_v56 = vsel %vm495_vm2, %v490_v51, -inf }
 0x16f   : > { %v480_v54 = vpop.f32.mrb[8].mxu1 }
 0x170   : > { %v481_v55 = vadd.f32 %v1671_v15, %v480_v54  ;;  %v1745_v57 = vpop.f32.mrb[9].mxu1 }
 0x171   : > { %506 = vmax.xlane.f32.xlu0 %v505_v56  ;;  %v483_v60 = vpop.f32.mrb[10].mxu1 }
 0x172   : > { %v484_v61 = vadd.f32 %v1672_v17, %v483_v60  ;;  %v493_v62 = vadd.f32 %v1667_v53, %v481_v55  ;;  %v1746_v63 = vpop.f32.mrb[11].mxu1 }
 0x174   : > { %v514_v6 = vsel %vm495_vm2, %v493_v62, -inf  ;;  %v494_v7 = vadd.f32 %v1668_v59, %v484_v61  ;;  %v2142_v61 = vld [vmem:[%s2011_s24] sm:$0xff]  }
 0x175   : > { %512 = vmax.xlane.f32.xlu0 %v511_v5  ;;  %515 = vmax.xlane.f32.xlu1 %v514_v6 }
 0x176   : > { %v517_v8 = vsel %vm495_vm2, %v494_v7, -inf }
 0x179   : > { %518 = vmax.xlane.f32.xlu0 %v517_v8 }
 0x186   : > { %588 = vrot.lane.b32.xlu1 %v2014_v1, %s1955_s11 }
 0x1f2   : > { %v498_v9 = vpop.xlane.xlu0 %497 }
 0x1f3   : > { %v520_v10 = vsub.f32 %v487_v30, %v498_v9 }
 0x1f4   : > { %v501_v11 = vpop.xlane.xlu1 %500 }
 0x1f5   : > { %v528_v12 = vmul.f32 1.442695, %v520_v10  ;;  %v521_v13 = vsub.f32 %v488_v35, %v501_v11 }
 0x1f7   : > { %1880 = vpow2.f32 %v528_v12  ;;  %v530_v15 = vmul.f32 1.442695, %v521_v13 }
 0x1f8   : > { %v510_v17 = vpop.xlane.xlu1 %509 }
 0x1f9   : > { %1882 = vpow2.f32 %v530_v15  ;;  %v524_v19 = vsub.f32 %v491_v36, %v510_v17 }
 0x1fa   : > { %v504_v20 = vpop.xlane.xlu0 %503 }
 0x1fb   : > { %v536_v21 = vmul.f32 1.442695, %v524_v19  ;;  %v522_v22 = vsub.f32 %v489_v47, %v504_v20 }
 0x1fd   : > { %1884 = vpow2.f32 %v536_v21  ;;  %v532_v25 = vmul.f32 1.442695, %v522_v22 }
 0x1fe   : > { %v507_v26 = vpop.xlane.xlu0 %506 }
 0x1ff   : > { %1886 = vpow2.f32 %v532_v25  ;;  %v523_v1 = vsub.f32 %v490_v51, %v507_v26 }
 0x201   : > { %v2110_v27 = vpop.eup %1880  ;;  %v534_v39 = vmul.f32 1.442695, %v523_v1 }
 0x202   : > { %v516_v28 = vpop.xlane.xlu1 %515  ;;  %v513_v29 = vpop.xlane.xlu0 %512  ;;  %v544_v30 = vsel %vm495_vm2, %v2110_v27, 0.0 }
 0x203   : > { %v2114_v31 = vpop.eup %1882  ;;  %v526_v32 = vsub.f32 %v493_v62, %v516_v28  ;;  %v525_v34 = vsub.f32 %v492_v58, %v513_v29  ;;  %545 = vadd.xlane.f32.xlu1 %v544_v30  ;;  %v2149_v62 = vld [vmem:[%s2011_s24 + $0x8] sm:$0xff]  }
 0x204   : > { %v547_v35 = vsel %vm495_vm2, %v2114_v31, 0.0 }
 0x205   : > { %v540_v36 = vmul.f32 1.442695, %v526_v32  ;;  %v538_v37 = vmul.f32 1.442695, %v525_v34  ;;  %548 = vadd.xlane.f32.xlu0 %v547_v35 }
 0x206   : > { %v519_v40 = vpop.xlane.xlu0 %518  ;;  %v589_v41 = vpop.permute.xlu1 %588 }
 0x207   : > { %v2118_v42 = vpop.eup %1884  ;;  %1888 = vpow2.f32 %v540_v36  ;;  %v527_v44 = vsub.f32 %v494_v7, %v519_v40  ;;  %1748 = vmatpush3.bf16.msra.mxu0 %v589_v41 }
 0x208   : > { %1890 = vpow2.f32 %v538_v37  ;;  %v556_v45 = vsel %vm495_vm2, %v2118_v42, 0.0  ;;  %1759 = vmatprep.subr.bf16.mxu0 %v1952_v0 }
 0x209   : > { %v2123_v46 = vpop.eup %1886  ;;  %557 = vadd.xlane.f32.xlu1 %v556_v45  ;;  %1892 = vpow2.f32 %v534_v39  ;;  %v542_v47 = vmul.f32 1.442695, %v527_v44 }
 0x20a   : > { %v550_v49 = vsel %vm495_vm2, %v2123_v46, 0.0 }
 0x20b   : > { %1894 = vpow2.f32 %v542_v47  ;;  %v780_v47 = vld [vmem:[%s2297_s3] sm:$0xf] }
 0x20d   : > { %551 = vadd.xlane.f32.xlu1 %v550_v49  ;;  %v795_v49 = vsel %vm793_vm3, %v780_v47, 0 }
 0x211   : > { %v2127_v50 = vpop.eup %1888 }
 0x212   : > { %v1891_v51 = vpop.eup %1890  ;;  %v562_v54 = vsel %vm495_vm2, %v2127_v50, 0.0 }
 0x213   : > { %563 = vadd.xlane.f32.xlu1 %v562_v54  ;;  %v559_v55 = vsel %vm495_vm2, %v1891_v51, 0.0  ;;  %v1893_v56 = vpop.eup %1892 }
 0x214   : > { %560 = vadd.xlane.f32.xlu0 %v559_v55  ;;  %v553_v57 = vsel %vm495_vm2, %v1893_v56, 0.0 }
 0x215   : > { %v2133_v58 = vpop.eup %1894 }
 0x216   : > { %v565_v60 = vsel %vm495_vm2, %v2133_v58, 0.0 }
 0x218   : > { %554 = vadd.xlane.f32.xlu0 %v553_v57 }
 0x21c   : > { %566 = vadd.xlane.f32.xlu0 %v565_v60 }
 0x224   : > { %682 = vrot.lane.b32.xlu1 %v2017_v2, %s1955_s11  ;;  %v2154_v2 = vld [vmem:[%s2011_s24 + $0x10] sm:$0xff]  }
 0x228   : > { %729 = vrot.lane.b32.xlu1 %v2025_v4, %s1955_s11  ;;  %v2158_v4 = vld [vmem:[%s2011_s24 + $0x18] sm:$0xff]  }
 0x22c   : > { %888 = vrot.lane.b32.xlu1 %v2142_v61, %s1956_s12 }
 0x230   : > { %1002 = vrot.lane.b32.xlu1 %v2154_v2, %s1957_s13 }
 0x232   : > { %635 = vrot.lane.b32.xlu0 %v2021_v3, %s1955_s11 }
 0x234   : > { %1058 = vrot.lane.b32.xlu1 %v2158_v4, %s1957_s13 }
 0x236   : > { %890 = vrot.lane.b32.xlu0 %v2142_v61, %s1957_s13 }
 0x238   : > { %1056 = vrot.lane.b32.xlu1 %v2158_v4, %s1956_s12 }
 0x23a   : > { %946 = vrot.lane.b32.xlu0 %v2149_v62, %s1957_s13 }
 0x23e   : > { %944 = vrot.lane.b32.xlu0 %v2149_v62, %s1956_s12 }
 0x242   : > { %1000 = vrot.lane.b32.xlu0 %v2154_v2, %s1956_s12 }
 0x290   : > { %v546_v3 = vpop.xlane.xlu1 %545 }
 0x291   : > { %1896 = vrcp.f32 %v546_v3 }
 0x292   : > { %v549_v63 = vpop.xlane.xlu0 %548 }
 0x293   : > { %1898 = vrcp.f32 %v549_v63 }
 0x296   : > { %v558_v5 = vpop.xlane.xlu1 %557 }
 0x297   : > { %1900 = vrcp.f32 %v558_v5 }
 0x29a   : > { %v552_v7 = vpop.xlane.xlu1 %551 }
 0x29b   : > { %v1897_v6 = vpop.eup %1896 }
 0x29c   : > { %v576_v9 = vmul.f32 %v1897_v6, %v2110_v27 }
 0x29d   : > { %v1899_v8 = vpop.eup %1898 }
 0x29e   : > { %v577_v10 = vmul.f32 %v1899_v8, %v2114_v31 }
 0x2a0   : > { %v564_v11 = vpop.xlane.xlu1 %563  ;;  %v584_v12 = vpack.c.bf16 %v577_v10, %v576_v9 }
 0x2a1   : > { %v561_v13 = vpop.xlane.xlu0 %560  ;;  %v1901_v20 = vpop.eup %1900 }
 0x2a2   : > { %1902 = vrcp.f32 %v561_v13  ;;  %1750 = vmatmul.mubr.msk.bf16.vlgmr.msra.gmra.mrb[4].mxu0 %vm495_vm2, %v584_v12  ;;  %v580_v22 = vmul.f32 %v1901_v20, %v2118_v42 }
 0x2a3   : > { %1761 = vmatprep.mubr.msk.bf16.mxu0 %vm1953_vm0, %v1952_v0  ;;  %1904 = vrcp.f32 %v552_v7 }
 0x2a4   : > { %v683_v15 = vpop.permute.xlu1 %682 }
 0x2a5   : > { %v555_v17 = vpop.xlane.xlu0 %554  ;;  %1760 = vmatpush3.bf16.msra.mxu0 %v683_v15 }
 0x2a6   : > { %1906 = vrcp.f32 %v555_v17  ;;  %1855 = vmatprep.subr.msk.bf16.mxu0 %vm793_vm3, %v780_v47 }
 0x2a8   : > { %v730_v31 = vpop.permute.xlu1 %729 }
 0x2a9   : > { %v567_v19 = vpop.xlane.xlu0 %566 }
 0x2aa   : > { %1908 = vrcp.f32 %v567_v19 }
 0x2ab   : > { %1910 = vrcp.f32 %v564_v11 }
 0x2ac   : > { %v1903_v21 = vpop.eup %1902  ;;  %v889_v44 = vpop.permute.xlu1 %888 }
 0x2ad   : > { %v581_v25 = vmul.f32 %v1903_v21, %v1891_v51  ;;  %v636_v26 = vpop.permute.xlu0 %635  ;;  %v1905_v27 = vpop.eup %1904 }
 0x2ae   : > { %1754 = vmatpush3.bf16.msra.mxu1 %v636_v26  ;;  %v578_v29 = vmul.f32 %v1905_v27, %v2123_v46 }
 0x2af   : > { %v586_v1 = vpack.c.bf16 %v581_v25, %v580_v22  ;;  %1765 = vmatprep.subr.bf16.mxu1 %v1952_v0  ;;  %v1680_v25 = vld [vmem:[%s2295_s1 + $0x8] sm:$0xff]  }
 0x2b0   : > { %v1907_v28 = vpop.eup %1906  ;;  %v1675_v26 = vunpack.c.l.bf16 %v1680_v25  ;;  %v1676_v27 = vunpack.c.h.bf16 %v1680_v25 }
 0x2b1   : > { %v579_v30 = vmul.f32 %v1907_v28, %v1893_v56  ;;  %1762 = vmatmul.mubr.msk.bf16.vlgmr.msra.gmra.mrb[8].mxu0 %vm495_vm2, %v586_v1  ;;  %v891_v39 = vpop.permute.xlu0 %890 }
 0x2b2   : > { %v896_v41 = vsel %vm277_vm1, %v891_v39, 0  ;;  %1772 = vmatpush3.bf16.msra.mxu0 %v795_v49 }
 0x2b3   : > { %v585_v32 = vpack.c.bf16 %v579_v30, %v578_v29  ;;  %1793 = vmatprep.subr.bf16.mxu0 %v1952_v0 }
 0x2b4   : > { %v1909_v34 = vpop.eup %1908 }
 0x2b5   : > { %1756 = vmatmul.mubr.msk.bf16.vlgmr.msra.gmra.mrb[12].mxu1 %vm495_vm2, %v585_v32  ;;  %v1911_v35 = vpop.eup %1910  ;;  %v583_v36 = vmul.f32 %v1909_v34, %v2133_v58  ;;  %v947_v42 = vpop.permute.xlu0 %946 }
 0x2b6   : > { %1766 = vmatpush3.bf16.msra.mxu1 %v730_v31  ;;  %1767 = vmatprep.mubr.msk.bf16.mxu1 %vm1953_vm0, %v1952_v0  ;;  %v582_v37 = vmul.f32 %v1911_v35, %v2127_v50  ;;  %v952_v45 = vsel %vm277_vm1, %v947_v42, 0  ;;  %v1003_v50 = vpop.permute.xlu1 %1002 }
 0x2b7   : > { %1781 = vmatprep.subr.bf16.mxu1 %v1952_v0  ;;  %v1008_v15 = vsel %vm277_vm1, %v1003_v50, 0 }
 0x2b8   : > { %v587_v40 = vpack.c.bf16 %v583_v36, %v582_v37 }
 0x2b9   : > { %v945_v46 = vpop.permute.xlu0 %944 }
 0x2ba   : > { %v1059_v51 = vpop.permute.xlu1 %1058 }
 0x2bb   : > { %v1064_v54 = vsel %vm277_vm1, %v1059_v51, 0 }
 0x2bd   : > { %1768 = vmatmul.mubr.msk.bf16.vlgmr.msra.gmra.mrb[16].mxu1 %vm495_vm2, %v587_v40  ;;  %v1001_v28 = vpop.permute.xlu0 %1000 }
 0x2be   : > { %1783 = vmatprep.mubr.msk.bf16.mxu1 %vm1953_vm0, %v1952_v0  ;;  %v1057_v55 = vpop.permute.xlu1 %1056 }
 0x2bf   : > { %1782 = vmatpush3.bf16.xpose.msra.mxu1 %v896_v41 }
 0x2c0   : > { %1787 = vmatprep.subr.bf16.mxu1 %v1952_v0 }
 0x2c6   : > { %1784 = vmatmul.mubr.msk.bf16.vlgmr.msra.gmra.mrb[20].mxu1 %vm277_vm1, %v889_v44 }
 0x2c7   : > { %1788 = vmatpush3.bf16.xpose.msra.mxu1 %v952_v45  ;;  %1789 = vmatprep.mubr.msk.bf16.mxu1 %vm1953_vm0, %v1952_v0 }
 0x2c8   : > { %1799 = vmatprep.subr.bf16.mxu1 %v1952_v0 }
 0x2ce   : > { %1790 = vmatmul.mubr.msk.bf16.vlgmr.msra.gmra.mrb[24].mxu1 %vm277_vm1, %v945_v46 }
 0x2cf   : > { %1801 = vmatprep.mubr.msk.bf16.mxu1 %vm1953_vm0, %v1952_v0  ;;  %1800 = vmatpush3.bf16.xpose.msra.mxu1 %v1064_v54 }
 0x2d0   : > { %1811 = vmatprep.subr.bf16.mxu1 %v1952_v0 }
 0x2d6   : > { %1802 = vmatmul.mubr.msk.bf16.vlgmr.msra.gmra.mrb[28].mxu1 %vm277_vm1, %v1057_v55 }
 0x2d7   : > { %1813 = vmatprep.mubr.msk.bf16.mxu1 %vm1953_vm0, %v1952_v0 }
 0x375   : > { %v628_v56 = vpop.f32.mrb[4].mxu0 }
 0x376   : > { %v1751_v57 = vpop.f32.mrb[5].mxu0 }
 0x377   : > { %v631_v58 = vpop.f32.mrb[6].mxu0 }
 0x378   : > { %v776_v60 = vpack.c.bf16 %v631_v58, %v628_v56  ;;  %v1752_v3 = vpop.f32.mrb[7].mxu0 }
 0x37a   : > { %1773 = vmatprep.mubr.msk.bf16.mxu0 %vm277_vm1, %v776_v60 }
 0x384   : > { %v722_v63 = vpop.f32.mrb[8].mxu0 }
 0x385   : > { %v1763_v5 = vpop.f32.mrb[9].mxu0 }
 0x386   : > { %v725_v6 = vpop.f32.mrb[10].mxu0 }
 0x387   : > { %v778_v7 = vpack.c.bf16 %v725_v6, %v722_v63  ;;  %v1764_v8 = vpop.f32.mrb[11].mxu0 }
 0x388   : > { %v675_v9 = vpop.f32.mrb[12].mxu1 }
 0x389   : > { %v1757_v10 = vpop.f32.mrb[13].mxu1 }
 0x38a   : > { %v678_v11 = vpop.f32.mrb[14].mxu1 }
 0x38b   : > { %v777_v12 = vpack.c.bf16 %v678_v11, %v675_v9  ;;  %v1758_v13 = vpop.f32.mrb[15].mxu1 }
 0x38d   : > { %1774 = vmatmul.mubr.msk.bf16.vlgmr.msra.gmra.mrb[12].mxu0 %vm277_vm1, %v777_v12 }
 0x38e   : > { %1777 = vmatprep.mubr.msk.bf16.mxu0 %vm277_vm1, %v778_v7  ;;  %1794 = vmatpush3.bf16.xpose.msra.mxu0 %v1008_v15 }
 0x38f   : > { %1805 = vmatprep.subr.bf16.mxu0 %v1952_v0 }
 0x390   : > { %v769_v17 = vpop.f32.mrb[16].mxu1 }
 0x391   : > { %v1769_v19 = vpop.f32.mrb[17].mxu1 }
 0x392   : > { %v772_v20 = vpop.f32.mrb[18].mxu1 }
 0x393   : > { %v779_v21 = vpack.c.bf16 %v772_v20, %v769_v17  ;;  %v1770_v22 = vpop.f32.mrb[19].mxu1 }
 0x395   : > { %1778 = vmatmul.mubr.msk.bf16.gmra.mrb[16].mxu0 %vm277_vm1, %v779_v21 }
 0x396   : > { %1795 = vmatprep.mubr.msk.bf16.mxu0 %vm1953_vm0, %v1952_v0 }
 0x399   : > { %v932_v1 = vpop.f32.mrb[20].mxu1 }
 0x39a   : > { %v933_v29 = vadd.f32 %v1675_v26, %v932_v1  ;;  %v1785_v30 = vpop.f32.mrb[21].mxu1 }
 0x39b   : > { %v935_v31 = vpop.f32.mrb[22].mxu1 }
 0x39c   : > { %v936_v32 = vadd.f32 %v1676_v27, %v935_v31  ;;  %v1107_v34 = vadd.f32 %v1655_v18, %v933_v29  ;;  %v1786_v35 = vpop.f32.mrb[23].mxu1 }
 0x39d   : > { %1796 = vmatmul.mubr.msk.bf16.vlgmr.msra.gmra.mrb[20].mxu0 %vm277_vm1, %v1001_v28 }
 0x39e   : > { %v1115_v36 = vsel %vm495_vm2, %v1107_v34, -inf  ;;  %v1108_v37 = vadd.f32 %v1656_v23, %v936_v32  ;;  %1807 = vmatprep.mubr.msk.bf16.mxu0 %vm1953_vm0, %v1952_v0 }
 0x39f   : > { %1116 = vmax.xlane.f32.xlu0 %v1115_v36 }
 0x3a0   : > { %v1118_v39 = vsel %vm495_vm2, %v1108_v37, -inf }
 0x3a1   : > { %1119 = vmax.xlane.f32.xlu1 %v1118_v39  ;;  %v988_v40 = vpop.f32.mrb[24].mxu1 }
 0x3a2   : > { %v989_v41 = vadd.f32 %v1675_v26, %v988_v40  ;;  %v1791_v42 = vpop.f32.mrb[25].mxu1 }
 0x3a3   : > { %v991_v44 = vpop.f32.mrb[26].mxu1 }
 0x3a4   : > { %v992_v18 = vadd.f32 %v1676_v27, %v991_v44  ;;  %v1109_v45 = vadd.f32 %v1659_v38, %v989_v41  ;;  %v1792_v46 = vpop.f32.mrb[27].mxu1 }
 0x3a6   : > { %v1121_v47 = vsel %vm495_vm2, %v1109_v45, -inf  ;;  %v1110_v14 = vadd.f32 %v1660_v43, %v992_v18 }
 0x3a7   : > { %1122 = vmax.xlane.f32.xlu0 %v1121_v47 }
 0x3a8   : > { %v1124_v23 = vsel %vm495_vm2, %v1110_v14, -inf }
 0x3a9   : > { %v1100_v49 = vpop.f32.mrb[28].mxu1 }
 0x3aa   : > { %v1803_v50 = vpop.f32.mrb[29].mxu1  ;;  %v1101_v43 = vadd.f32 %v1675_v26, %v1100_v49 }
 0x3ab   : > { %1125 = vmax.xlane.f32.xlu0 %v1124_v23  ;;  %v1103_v51 = vpop.f32.mrb[30].mxu1 }
 0x3ac   : > { %v1804_v54 = vpop.f32.mrb[31].mxu1  ;;  %v1104_v15 = vadd.f32 %v1676_v27, %v1103_v51  ;;  %v1113_v19 = vadd.f32 %v1667_v53, %v1101_v43 }
 0x3ae   : > { %v1133_v25 = vsel %vm495_vm2, %v1113_v19, -inf }
 0x42c   : > { %v1117_v55 = vpop.xlane.xlu0 %1116 }
 0x42d   : > { %v1139_v58 = vsub.f32 %v1107_v34, %v1117_v55 }
 0x42e   : > { %v1120_v57 = vpop.xlane.xlu1 %1119 }
 0x42f   : > { %v1140_v60 = vsub.f32 %v1108_v37, %v1120_v57  ;;  %v1147_v63 = vmul.f32 1.442695, %v1139_v58 }
 0x431   : > { %v1149_v5 = vmul.f32 1.442695, %v1140_v60  ;;  %1912 = vpow2.f32 %v1147_v63 }
 0x433   : > { %1914 = vpow2.f32 %v1149_v5 }
 0x434   : > { %v1123_v56 = vpop.xlane.xlu0 %1122 }
 0x435   : > { %v1141_v38 = vsub.f32 %v1109_v45, %v1123_v56 }
 0x437   : > { %v1151_v6 = vmul.f32 1.442695, %v1141_v38 }
 0x438   : > { %v1126_v3 = vpop.xlane.xlu0 %1125 }
 0x439   : > { %v1142_v33 = vsub.f32 %v1110_v14, %v1126_v3  ;;  %1916 = vpow2.f32 %v1151_v6 }
 0x43b   : > { %v1153_v10 = vmul.f32 1.442695, %v1142_v33 }
 0x43d   : > { %1918 = vpow2.f32 %v1153_v10 }
 0x470   : > { %v1044_v7 = vpop.f32.mrb[20].mxu0 }
 0x471   : > { %v1045_v8 = vadd.f32 %v1675_v26, %v1044_v7  ;;  %v1797_v9 = vpop.f32.mrb[21].mxu0  ;;  %v1114_v26 = vadd.f32 %v1668_v59, %v1104_v15 }
 0x472   : > { %v1047_v11 = vpop.f32.mrb[22].mxu0 }
 0x473   : > { %v1048_v12 = vadd.f32 %v1676_v27, %v1047_v11  ;;  %v1798_v13 = vpop.f32.mrb[23].mxu0  ;;  %v1111_v17 = vadd.f32 %v1663_v24, %v1045_v8  ;;  %v1913_v27 = vpop.eup %1912  ;;  %v1136_v53 = vsel %vm495_vm2, %v1114_v26, -inf }
 0x474   : > { %v1915_v24 = vpop.eup %1914  ;;  %v1163_v16 = vsel %vm495_vm2, %v1913_v27, 0.0 }
 0x475   : > { %v1127_v20 = vsel %vm495_vm2, %v1111_v17, -inf  ;;  %v1112_v21 = vadd.f32 %v1664_v52, %v1048_v12  ;;  %v2240_v1 = vpop.eup %1916  ;;  %v1166_v52 = vsel %vm495_vm2, %v1915_v24, 0.0 }
 0x476   : > { %1128 = vmax.xlane.f32.xlu1 %v1127_v20  ;;  %v1169_v28 = vsel %vm495_vm2, %v2240_v1, 0.0  ;;  %v1919_v29 = vpop.eup %1918 }
 0x477   : > { %v1130_v22 = vsel %vm495_vm2, %v1112_v21, -inf  ;;  %v1172_v48 = vsel %vm495_vm2, %v1919_v29, 0.0 }
 0x478   : > { %1131 = vmax.xlane.f32.xlu0 %v1130_v22  ;;  %v1399_v22 = vld [vmem:[%s2297_s3 + $0x4] sm:$0xf] }
 0x47a   : > { %1134 = vmax.xlane.f32.xlu1 %v1133_v25  ;;  %v1413_v25 = vsel %vm793_vm3, %v1399_v22, 0 }
 0x47c   : > { %1137 = vmax.xlane.f32.xlu0 %v1136_v53 }
 0x47e   : > { %1164 = vadd.xlane.f32.xlu1 %v1163_v16 }
 0x480   : > { %1167 = vadd.xlane.f32.xlu0 %v1166_v52 }
 0x482   : > { %1170 = vadd.xlane.f32.xlu1 %v1169_v28 }
 0x484   : > { %1173 = vadd.xlane.f32.xlu0 %v1172_v48 }
 0x503   : > { %v1129_v59 = vpop.xlane.xlu1 %1128 }
 0x504   : > { %v1143_v47 = vsub.f32 %v1111_v17, %v1129_v59 }
 0x505   : > { %v1132_v30 = vpop.xlane.xlu0 %1131 }
 0x506   : > { %v1144_v32 = vsub.f32 %v1112_v21, %v1132_v30  ;;  %v1155_v14 = vmul.f32 1.442695, %v1143_v47 }
 0x507   : > { %v1135_v31 = vpop.xlane.xlu1 %1134 }
 0x508   : > { %v1145_v34 = vsub.f32 %v1113_v19, %v1135_v31  ;;  %v1157_v39 = vmul.f32 1.442695, %v1144_v32 }
 0x509   : > { %v1138_v35 = vpop.xlane.xlu0 %1137 }
 0x50a   : > { %v1159_v36 = vmul.f32 1.442695, %v1145_v34  ;;  %v1146_v37 = vsub.f32 %v1114_v26, %v1138_v35 }
 0x50b   : > { %v1165_v51 = vpop.xlane.xlu1 %1164 }
 0x50c   : > { %1920 = vpow2.f32 %v1159_v36  ;;  %v1161_v40 = vmul.f32 1.442695, %v1146_v37 }
 0x50d   : > { %v1168_v50 = vpop.xlane.xlu0 %1167 }
 0x50e   : > { %1922 = vpow2.f32 %v1161_v40 }
 0x50f   : > { %1924 = vpow2.f32 %v1157_v39  ;;  %v1171_v55 = vpop.xlane.xlu1 %1170 }
 0x510   : > { %1926 = vpow2.f32 %v1155_v14 }
 0x511   : > { %1928 = vrcp.f32 %v1168_v50  ;;  %v1174_v54 = vpop.xlane.xlu0 %1173 }
 0x512   : > { %1930 = vrcp.f32 %v1165_v51 }
 0x513   : > { %1932 = vrcp.f32 %v1174_v54 }
 0x514   : > { %1934 = vrcp.f32 %v1171_v55 }
 0x516   : > { %v1921_v41 = vpop.eup %1920 }
 0x517   : > { %v1181_v42 = vsel %vm495_vm2, %v1921_v41, 0.0 }
 0x518   : > { %v1923_v44 = vpop.eup %1922  ;;  %1182 = vadd.xlane.f32.xlu1 %v1181_v42 }
 0x519   : > { %v1184_v18 = vsel %vm495_vm2, %v1923_v44, 0.0  ;;  %v1925_v45 = vpop.eup %1924 }
 0x51a   : > { %1185 = vadd.xlane.f32.xlu0 %v1184_v18  ;;  %v1178_v46 = vsel %vm495_vm2, %v1925_v45, 0.0  ;;  %v1927_v23 = vpop.eup %1926 }
 0x51b   : > { %v1175_v49 = vsel %vm495_vm2, %v1927_v23, 0.0 }
 0x51e   : > { %1179 = vadd.xlane.f32.xlu0 %v1178_v46 }
 0x529   : > { %1207 = vrot.lane.b32.xlu1 %v2142_v61, %s1958_s19  ;;  %v1929_v61 = vpop.eup %1928 }
 0x52a   : > { %v1931_v56 = vpop.eup %1930  ;;  %v1196_v57 = vmul.f32 %v1929_v61, %v1915_v24 }
 0x52b   : > { %v1195_v60 = vmul.f32 %v1931_v56, %v1913_v27  ;;  %v1933_v3 = vpop.eup %1932 }
 0x52c   : > { %v1198_v5 = vmul.f32 %v1933_v3, %v1919_v29 }
 0x52d   : > { %v1203_v63 = vpack.c.bf16 %v1196_v57, %v1195_v60 }
 0x534   : > { %1254 = vrot.lane.b32.xlu0 %v2149_v62, %s1958_s19 }
 0x54d   : > { %1176 = vadd.xlane.f32.xlu1 %v1175_v49 }
 0x55e   : > { %1301 = vrot.lane.b32.xlu1 %v2154_v2, %s1958_s19 }
 0x562   : > { %1348 = vrot.lane.b32.xlu1 %v2158_v4, %s1958_s19  ;;  %v1935_v4 = vpop.eup %1934 }
 0x563   : > { %v1197_v6 = vmul.f32 %v1935_v4, %v2240_v1 }
 0x565   : > { %v1204_v43 = vpack.c.bf16 %v1198_v5, %v1197_v6 }
 0x5a5   : > { %v1183_v62 = vpop.xlane.xlu1 %1182 }
 0x5a7   : > { %v1186_v58 = vpop.xlane.xlu0 %1185 }
 0x5a8   : > { %1936 = vrcp.f32 %v1186_v58 }
 0x5a9   : > { %v1208_v38 = vpop.permute.xlu1 %1207  ;;  %1938 = vrcp.f32 %v1183_v62 }
 0x5aa   : > { %1806 = vmatpush3.bf16.msra.mxu0 %v1208_v38 }
 0x5ab   : > { %v1180_v2 = vpop.xlane.xlu0 %1179  ;;  %1817 = vmatprep.subr.bf16.mxu0 %v1952_v0 }
 0x5ac   : > { %1940 = vrcp.f32 %v1180_v2 }
 0x5ad   : > { %1808 = vmatmul.mubr.msk.bf16.vlgmr.msra.gmra.mrb[24].mxu0 %vm495_vm2, %v1203_v63 }
 0x5ae   : > { %1819 = vmatprep.mubr.msk.bf16.mxu0 %vm1953_vm0, %v1952_v0 }
 0x5af   : > { %v1255_v33 = vpop.permute.xlu0 %1254 }
 0x5b0   : > { %1812 = vmatpush3.bf16.msra.mxu1 %v1255_v33 }
 0x5b1   : > { %1823 = vmatprep.subr.bf16.mxu1 %v1952_v0 }
 0x5b2   : > { %v1937_v8 = vpop.eup %1936 }
 0x5b3   : > { %1814 = vmatmul.mubr.msk.bf16.vlgmr.msra.gmra.mrb[32].mxu1 %vm495_vm2, %v1204_v43  ;;  %v1939_v10 = vpop.eup %1938  ;;  %v1202_v11 = vmul.f32 %v1937_v8, %v1923_v44 }
 0x5b4   : > { %1825 = vmatprep.mubr.msk.bf16.mxu1 %vm1953_vm0, %v1952_v0  ;;  %v1201_v12 = vmul.f32 %v1939_v10, %v1921_v41  ;;  %v1598_v41 = vld [vmem:[%s2298_s4] ss:$0 sm:$0xff] }
 0x5b6   : > { %v1941_v15 = vpop.eup %1940  ;;  %v1206_v17 = vpack.c.bf16 %v1202_v11, %v1201_v12 }
 0x5b7   : > { %v1200_v20 = vmul.f32 %v1941_v15, %v1925_v45 }
 0x5da   : > { %v1177_v7 = vpop.xlane.xlu1 %1176 }
 0x5db   : > { %1942 = vrcp.f32 %v1177_v7 }
 0x5de   : > { %v1302_v9 = vpop.permute.xlu1 %1301 }
 0x5df   : > { %1818 = vmatpush3.bf16.msra.mxu0 %v1302_v9 }
 0x5e0   : > { %1856 = vmatprep.subr.msk.bf16.mxu0 %vm793_vm3, %v1399_v22 }
 0x5e2   : > { %v1349_v13 = vpop.permute.xlu1 %1348 }
 0x5e3   : > { %1824 = vmatpush3.bf16.msra.mxu1 %v1349_v13 }
 0x5e5   : > { %v1943_v19 = vpop.eup %1942 }
 0x5e6   : > { %v1199_v21 = vmul.f32 %v1943_v19, %v1927_v23  ;;  %1826 = vmatmul.mubr.msk.bf16.vlgmr.msra.gmra.mrb[36].mxu1 %vm495_vm2, %v1206_v17 }
 0x5e8   : > { %v1205_v0 = vpack.c.bf16 %v1200_v20, %v1199_v21 }
 0x5ea   : > { %1820 = vmatmul.mubr.msk.bf16.vlgmr.msra.gmra.mrb[28].mxu0 %vm495_vm2, %v1205_v0 }
 0x5eb   : > { %1830 = vmatpush3.bf16.msra.mxu0 %v1413_v25 }
 0x680   : > { %v1247_v26 = vpop.f32.mrb[24].mxu0 }
 0x681   : > { %v1809_v27 = vpop.f32.mrb[25].mxu0 }
 0x682   : > { %v1250_v24 = vpop.f32.mrb[26].mxu0 }
 0x683   : > { %v1395_v53 = vpack.c.bf16 %v1250_v24, %v1247_v26  ;;  %v1810_v1 = vpop.f32.mrb[27].mxu0 }
 0x685   : > { %1831 = vmatprep.mubr.msk.bf16.mxu0 %vm277_vm1, %v1395_v53 }
 0x686   : > { %v1294_v16 = vpop.f32.mrb[32].mxu1 }
 0x687   : > { %v1815_v52 = vpop.f32.mrb[33].mxu1 }
 0x688   : > { %v1297_v28 = vpop.f32.mrb[34].mxu1 }
 0x689   : > { %v1396_v29 = vpack.c.bf16 %v1297_v28, %v1294_v16  ;;  %v1816_v48 = vpop.f32.mrb[35].mxu1 }
 0x68b   : > { %1832 = vmatmul.mubr.msk.bf16.vlgmr.msra.gmra.mrb[12].mxu0 %vm277_vm1, %v1396_v29 }
 0x6b9   : > { %v1388_v59 = vpop.f32.mrb[36].mxu1 }
 0x6ba   : > { %v1827_v30 = vpop.f32.mrb[37].mxu1 }
 0x6bb   : > { %v1391_v31 = vpop.f32.mrb[38].mxu1 }
 0x6bc   : > { %v1398_v32 = vpack.c.bf16 %v1391_v31, %v1388_v59  ;;  %v1828_v34 = vpop.f32.mrb[39].mxu1 }
 0x6bd   : > { %v1341_v35 = vpop.f32.mrb[28].mxu0 }
 0x6be   : > { %v1821_v36 = vpop.f32.mrb[29].mxu0 }
 0x6bf   : > { %v1344_v37 = vpop.f32.mrb[30].mxu0 }
 0x6c0   : > { %v1397_v39 = vpack.c.bf16 %v1344_v37, %v1341_v35  ;;  %v1822_v40 = vpop.f32.mrb[31].mxu0 }
 0x6c2   : > { %1835 = vmatprep.mubr.msk.bf16.mxu0 %vm277_vm1, %v1397_v39 }
 0x6c3   : > { %1836 = vmatmul.mubr.msk.bf16.gmra.mrb[16].mxu0 %vm277_vm1, %v1398_v32 }
 0x75e   : > { %v1833_v42 = vpop.f32.mrb[12].mxu0 }
 0x75f   : > { %v1839_v44 = vadd.f32 %v1833_v42, %v1598_v41  ;;  %v1449_v18 = vpop.f32.mrb[13].mxu0 }
 0x760   : > { %v1840_v45 = vadd.f32 %v1598_v41, %v1449_v18  ;;  %v1834_v46 = vpop.f32.mrb[14].mxu0 }
 0x761   : > { %v1841_v47 = vadd.f32 %v1834_v46, %v1598_v41  ;;  %v1452_v14 = vpop.f32.mrb[15].mxu0  ;;  %v1647_v50 = vpack.c.bf16 %v1839_v44, %v1839_v44 }
 0x762   : > { %v1645_v23 = vpack.c.bf16 %v1840_v45, %v1840_v45  ;;  %v1842_v49 = vadd.f32 %v1598_v41, %v1452_v14 }
 0x763   : > { %1523 = vst.msk [vmem:[%s231_s28 + $0x8] sm:$0xf] %vm1520_vm4, %v1647_v50  ;;  %v1648_v54 = vpack.c.bf16 %v1841_v47, %v1841_v47 }
 0x764   : > { %1521 = vst.msk [vmem:[%s231_s28] sm:$0xf] %vm1520_vm4, %v1645_v23  ;;  %v1646_v51 = vpack.c.bf16 %v1842_v49, %v1842_v49 }
 0x765   : > { %1524 = vst.msk [vmem:[%s231_s28 + $0xc] sm:$0xf] %vm1520_vm4, %v1648_v54 }
 0x766   : > { %1522 = vst.msk [vmem:[%s231_s28 + $0x4] sm:$0xf] %vm1520_vm4, %v1646_v51 }
 0x796   : > { %v1837_v55 = vpop.f32.mrb[16].mxu0 }
 0x797   : > { %v1843_v61 = vadd.f32 %v1837_v55, %v1598_v41  ;;  %v1465_v62 = vpop.f32.mrb[17].mxu0 }
 0x798   : > { %v1844_v56 = vadd.f32 %v1598_v41, %v1465_v62  ;;  %v1838_v57 = vpop.f32.mrb[18].mxu0 }
 0x799   : > { %v1845_v58 = vadd.f32 %v1838_v57, %v1598_v41  ;;  %v1468_v60 = vpop.f32.mrb[19].mxu0  ;;  %v1651_v2 = vpack.c.bf16 %v1843_v61, %v1843_v61 }
 0x79a   : > { %v1649_v38 = vpack.c.bf16 %v1844_v56, %v1844_v56  ;;  %v1846_v3 = vadd.f32 %v1598_v41, %v1468_v60 }
 0x79b   : > { %1527 = vst.msk [vmem:[%s231_s28 + $0x18] sm:$0xf] %vm1520_vm4, %v1651_v2  ;;  %v1652_v4 = vpack.c.bf16 %v1845_v58, %v1845_v58 }
 0x79c   : > { %1525 = vst.msk [vmem:[%s231_s28 + $0x10] sm:$0xf] %vm1520_vm4, %v1649_v38  ;;  %v1650_v63 = vpack.c.bf16 %v1846_v3, %v1846_v3 }
 0x79d   : > { %1528 = vst.msk [vmem:[%s231_s28 + $0x1c] sm:$0xf] %vm1520_vm4, %v1652_v4 }
 0x79e   : > { %1526 = vst.msk [vmem:[%s231_s28 + $0x14] sm:$0xf] %vm1520_vm4, %v1650_v63 }
 0x79f PF: > { %s15_s18 = sadd.s32 1, %s1950_s18  }
 0x7a0   : > { %p12_p4 = scmp.ge.s32.totalorder %s15_s18, 4  }
 0x7a2   :  { %14 = sbr.rel (!%p12_p4) target bundleno = 1 (0x1), region = 71 }

// kernel: swin_forward.18
= control target key start
LH: loop header
LB: loop body
LE: loop exit
PB: predicated region body
PF: predicated region fallthrough
CT: control target
= control target key end

     0   :  { %s942_s27 = smov 0   ;;  %s944_s28 = smov 0   ;;  %s1020_s0 = inlined_call_operand.vmem [shape: bf16[32,16], index: 0, kind: input, shape index: {}, may-alias: {0,8}]   ;;  %s1021_s1 = inlined_call_operand.vmem [shape: bf16[32,16], index: 1, kind: input, shape index: {}]   ;;  %s1022_s2 = inlined_call_operand.vmem [shape: f32[1,16], index: 2, kind: input, shape index: {}]   ;;  %s1023_s3 = inlined_call_operand.vmem [shape: f32[1,16], index: 3, kind: input, shape index: {}, may-alias: {3,7}]   ;;  %s1024_s4 = inlined_call_operand.vmem [shape: bf16[16,64], index: 4, kind: input, shape index: {}]   ;;  %s1025_s5 = inlined_call_operand.vmem [shape: f32[1,64], index: 5, kind: input, shape index: {}]   ;;  %s1026_s6 = inlined_call_operand.vmem [shape: bf16[64,16], index: 6, kind: input, shape index: {}]   ;;  %s1027_s7 = inlined_call_operand.vmem [shape: f32[1,16], index: 7, kind: input, shape index: {}, may-alias: {3,7}]   ;;  %s1028_s8 = inlined_call_operand.vmem [shape: bf16[32,16], index: 8, kind: output, shape index: {}, may-alias: {0,8}]  }
   0x1   :  { %s946_s29 = smov 0  }
   0x2 LB: > { %s30_s30 = sadd.s32 1, %s889_s28  ;;  %p775_p0 = scmp.ge.s32.totalorder %s893_s29, 1  ;;  %s893_s29 = sphi %s946_s29, %s18_s29   ;;  %s889_s28 = sphi %s944_s28, %s1030_s28   ;;  %s885_s27 = sphi %s942_s27, %s1029_s27  }
   0x3   : > { %p32_p1 = scmp.ge.s32.totalorder %s30_s30, 2  ;;  %p314_p2 = scmp.lt.s32.totalorder %s893_s29, 3 }
   0x5   : > { %s1032_s30 = smov (%p32_p1, %s30_s30), 0  ;;  %p315_p3 = pnand %p775_p0, %p314_p2 }
   0x6   : > { %s776_s9 = sshll.u32 (!%p315_p3), %s885_s27, 1  ;;  %vm411_vm0 = vcmask (!%p315_p3), 130048   ;;  %v784_v6 = vld [vmem:[%s1027_s7] ss:$0 sm:$0xff] (!%p315_p3)  ;;  %v895_v24 = vmov (!%p315_p3), 0.0   ;;  %vm896_vm1 = vmmov (!%p315_p3), 0  }
   0x7   : > { %318 = sbr.rel (%p315_p3) target bundleno = 822 (0x336), region = 52  ;;  %p366_p4 = scmp.lt.s32.totalorder (!%p315_p3), %s776_s9, 3  ;;  %v858_v23 = vld [vmem:[%s1024_s4] sm:$0xff] (!%p315_p3)   ;;  %814 = vmatprep.subr.bf16.mxu0 (!%p315_p3), %v895_v24  ;;  %816 = vmatprep.mubr.msk.bf16.mxu0 (!%p315_p3), %vm896_vm1, %v895_v24  ;;  %v860_v44 = vld [vmem:[%s1026_s6 + $0x8] sm:$0xff] (!%p315_p3)   ;;  %v861_v45 = vld [vmem:[%s1026_s6 + $0x10] sm:$0xff] (!%p315_p3)   ;;  %vm584_vm2 = vcmask (!%p315_p3), 523264  }
   0x8   : > { %815 = vmatpush3.bf16.msra.mxu0 (!%p315_p3), %v858_v23  ;;  %820 = vmatprep.subr.bf16.mxu1 (!%p315_p3), %v895_v24  ;;  %v782_v33 = vld [vmem:[%s1022_s2] ss:$0 sm:$0xff] (!%p315_p3)  ;;  %v862_v46 = vld [vmem:[%s1026_s6 + $0x18] sm:$0xff] (!%p315_p3)   ;;  %vm646_vm3 = vcmask (!%p315_p3), 125952  }
   0x9   : > { %828 = vmatprep.mubr.msk.bf16.mxu1 (!%p315_p3), %vm896_vm1, %v895_v24  ;;  %v783_v37 = vld [vmem:[%s1023_s3] ss:$0 sm:$0xff] (!%p315_p3) }
   0xa   : > { %v859_v43 = vld [vmem:[%s1026_s6] sm:$0xff] (!%p315_p3)  }
   0xb   : > { %821 = vmatpush3.bf16.msra.mxu1 (!%p315_p3), %v859_v43  ;;  %v785_v47 = vld [vmem:[%s1025_s5] ss:$0 sm:$0xff] (!%p315_p3) }
   0xc   : > { %822 = vmatprep.subr.bf16.mxu1 (!%p315_p3), %v895_v24 }
   0xe   : > { %s1034_s9 = smov (!%p366_p4, %s776_s9), 3 }
   0xf   : > { %s960_s10 = sshll.u32 %s1034_s9, 2  ;;  %823 = vmatpush3.bf16.msra.mxu1 %v860_v44 }
  0x10   : > { %s369_s13 = scalar_lea.vmem %s1020_s0, %s960_s10  ;;  %s375_s16 = scalar_lea.vmem %s1021_s1, %s960_s10  ;;  %824 = vmatprep.subr.bf16.mxu1 %v895_v24 }
  0x11   : > { %v800_v0 = vld [vmem:[%s369_s13] sm:$0xff]   ;;  %s394_s19 = scalar_lea.vmem %s1028_s8, %s960_s10 }
  0x12   : > { %v804_v1 = vld [vmem:[%s375_s16] sm:$0xff]   ;;  %v801_v2 = vunpack.c.l.bf16 %v800_v0  ;;  %v802_v4 = vunpack.c.h.bf16 %v800_v0 }
  0x13   : > { %v805_v3 = vunpack.c.l.bf16 %v804_v1  ;;  %v806_v5 = vunpack.c.h.bf16 %v804_v1  ;;  %825 = vmatpush3.bf16.msra.mxu1 %v861_v45 }
  0x14   : > { %826 = vmatprep.subr.bf16.mxu1 %v895_v24 }
  0x15   : > { %v409_v7 = vadd.f32 %v805_v3, %v801_v2  ;;  %v410_v8 = vadd.f32 %v806_v5, %v802_v4 }
  0x17   : > { %v412_v9 = vsel %vm411_vm0, %v409_v7, 0.0  ;;  %v466_v10 = vadd.f32 %v784_v6, %v409_v7  ;;  %v467_v11 = vadd.f32 %v784_v6, %v410_v8  ;;  %v415_v12 = vsel %vm411_vm0, %v410_v8, 0.0  ;;  %827 = vmatpush3.bf16.msra.mxu1 %v862_v46 }
  0x18   : > { %413 = vadd.xlane.f32.xlu0 %v412_v9 }
  0x19   : > { %468 = vst.msk [vmem:[#allocation2] sm:$0xff] %vm411_vm0, %v466_v10  ;;  %469 = vst.msk [vmem:[#allocation2 + $0x8] sm:$0xff] %vm411_vm0, %v467_v11 }
  0x1c   : > { %416 = vadd.xlane.f32.xlu0 %v415_v12 }
  0x20   : > { %v549_v9 = vld [vmem:[#allocation2] sm:$0xff]  ;;  %v550_v11 = vld [vmem:[#allocation2 + $0x8] sm:$0xff] }
  0xa5   : > { %v414_v13 = vpop.xlane.xlu0 %413 }
  0xa6   : > { %v419_v14 = vmul.f32 0.0625, %v414_v13 }
  0xa8   : > { %v421_v15 = vsub.f32 %v409_v7, %v419_v14 }
  0xa9   : > { %v417_v16 = vpop.xlane.xlu0 %416 }
  0xaa   : > { %v420_v17 = vmul.f32 0.0625, %v417_v16  ;;  %v423_v18 = vmul.f32 %v421_v15, %v421_v15 }
  0xac   : > { %v422_v19 = vsub.f32 %v410_v8, %v420_v17  ;;  %v425_v20 = vsel %vm411_vm0, %v423_v18, 0.0 }
  0xad   : > { %426 = vadd.xlane.f32.xlu1 %v425_v20 }
  0xae   : > { %v424_v21 = vmul.f32 %v422_v19, %v422_v19 }
  0xb0   : > { %v428_v22 = vsel %vm411_vm0, %v424_v21, 0.0 }
  0xb1   : > { %429 = vadd.xlane.f32.xlu1 %v428_v22 }
 0x13a   : > { %v427_v25 = vpop.xlane.xlu1 %426 }
 0x13b   : > { %v431_v26 = vmul.f32 0.0625, %v427_v25 }
 0x13d   : > { %v433_v27 = vadd.f32 1e-05, %v431_v26 }
 0x13e   : > { %v430_v28 = vpop.xlane.xlu1 %429 }
 0x13f   : > { %863 = vrsqrt.f32 %v433_v27  ;;  %v432_v29 = vmul.f32 0.0625, %v430_v28 }
 0x141   : > { %v434_v30 = vadd.f32 1e-05, %v432_v29 }
 0x143   : > { %865 = vrsqrt.f32 %v434_v30 }
 0x149   : > { %v864_v31 = vpop.eup %863 }
 0x14a   : > { %v437_v32 = vmul.f32 %v864_v31, %v421_v15 }
 0x14c   : > { %v446_v35 = vmul.f32 %v782_v33, %v437_v32 }
 0x14d   : > { %v866_v34 = vpop.eup %865 }
 0x14e   : > { %v438_v36 = vmul.f32 %v866_v34, %v422_v19  ;;  %v455_v39 = vadd.f32 %v783_v37, %v446_v35 }
 0x150   : > { %v447_v38 = vmul.f32 %v782_v33, %v438_v36 }
 0x152   : > { %v456_v40 = vadd.f32 %v783_v37, %v447_v38 }
 0x154   : > { %v457_v41 = vpack.c.bf16 %v456_v40, %v455_v39 }
 0x156   : > { %458 = vst.msk [vmem:[#allocation3] sm:$0xff] %vm411_vm0, %v457_v41 }
 0x15d   : > { %v470_v42 = vld [vmem:[#allocation3] sm:$0xff] }
 0x15e   : > { %817 = vmatmul.mubr.msk.bf16.vlgmr.msra.gmra.mrb[0].mxu0 %vm411_vm0, %v470_v42 }
 0x231   : > { %v524_v48 = vpop.f32.mrb[0].mxu0 }
 0x232   : > { %v525_v49 = vadd.f32 %v785_v47, %v524_v48  ;;  %v818_v50 = vpop.f32.mrb[1].mxu0 }
 0x233   : > { %v527_v51 = vpop.f32.mrb[2].mxu0 }
 0x234   : > { %v531_v52 = vmul.f32 %v525_v49, %v525_v49  ;;  %v528_v53 = vadd.f32 %v785_v47, %v527_v51  ;;  %v819_v54 = vpop.f32.mrb[3].mxu0 }
 0x236   : > { %v533_v55 = vmul.f32 %v531_v52, %v525_v49  ;;  %v532_v56 = vmul.f32 %v528_v53, %v528_v53 }
 0x238   : > { %v535_v57 = vmul.f32 0.044715, %v533_v55  ;;  %v534_v58 = vmul.f32 %v532_v56, %v528_v53 }
 0x23a   : > { %v537_v59 = vadd.f32 %v535_v57, %v525_v49  ;;  %v536_v60 = vmul.f32 0.044715, %v534_v58 }
 0x23c   : > { %v539_v61 = vmul.f32 0.7978846, %v537_v59  ;;  %v538_v62 = vadd.f32 %v536_v60, %v528_v53 }
 0x23e   : > { %867 = vtanh.f32 %v539_v61  ;;  %v540_v63 = vmul.f32 0.7978846, %v538_v62 }
 0x240   : > { %869 = vtanh.f32 %v540_v63 }
 0x248   : > { %v868_v0 = vpop.eup %867 }
 0x249   : > { %v543_v1 = vadd.f32 1.0, %v868_v0 }
 0x24a   : > { %v870_v2 = vpop.eup %869 }
 0x24b   : > { %v545_v3 = vmul.f32 0.5, %v543_v1  ;;  %v544_v4 = vadd.f32 1.0, %v870_v2 }
 0x24d   : > { %v546_v5 = vmul.f32 0.5, %v544_v4  ;;  %v547_v6 = vmul.f32 %v545_v3, %v525_v49 }
 0x24f   : > { %v548_v7 = vmul.f32 %v546_v5, %v528_v53 }
 0x251   : > { %v551_v8 = vpack.c.bf16 %v548_v7, %v547_v6 }
 0x253   : > { %829 = vmatmul.mubr.msk.bf16.vlgmr.msra.gmra.mrb[0].mxu1 %vm584_vm2, %v551_v8 }
 0x326   : > { %v622_v10 = vpop.f32.mrb[0].mxu1 }
 0x327   : > { %v629_v12 = vadd.f32 %v622_v10, %v549_v9  ;;  %v830_v13 = vpop.f32.mrb[1].mxu1 }
 0x328   : > { %v625_v14 = vpop.f32.mrb[2].mxu1 }
 0x329   : > { %631 = vst.msk [vmem:[#allocation2] sm:$0xff] %vm411_vm0, %v629_v12  ;;  %v630_v15 = vadd.f32 %v625_v14, %v550_v11  ;;  %v831_v16 = vpop.f32.mrb[3].mxu1 }
 0x32b   : > { %632 = vst.msk [vmem:[#allocation2 + $0x8] sm:$0xff] %vm411_vm0, %v630_v15 }
 0x330   : > { %v636_v17 = vld [vmem:[#allocation2] sm:$0xff] }
 0x331   : > { %v797_v18 = vpack.c.bf16 %v636_v17, %v636_v17 }
 0x332   : > { %v637_v19 = vld [vmem:[#allocation2 + $0x8] sm:$0xff] }
 0x333   : > { %647 = vst.msk [vmem:[%s394_s19] sm:$0xf] %vm646_vm3, %v797_v18  ;;  %v798_v20 = vpack.c.bf16 %v637_v19, %v637_v19 }
 0x335   : > { %648 = vst.msk [vmem:[%s394_s19 + $0x4] sm:$0xf] %vm646_vm3, %v798_v20 }
 0x336 PF: > { %s18_s29 = sadd.s32 1, %s893_s29   ;;  %s1029_s27 = smov %s889_s28 }
 0x337   : > { %p15_p5 = scmp.ge.s32.totalorder %s18_s29, 4   ;;  %s1030_s28 = smov %s1032_s30 }
 0x339   :  { %17 = sbr.rel (!%p15_p5) target bundleno = 2 (0x2), region = 102 }

// kernel: swin_forward.22
= control target key start
LH: loop header
LB: loop body
LE: loop exit
PB: predicated region body
PF: predicated region fallthrough
CT: control target
= control target key end

     0   :  { %vm23_vm0 = vcmask 523264   ;;  %v177_v9 = vmov 0.0   ;;  %vm178_vm1 = vmmov 0   ;;  %vm138_vm2 = vcmask 257024   ;;  %s239_s0 = inlined_call_operand.vmem [shape: bf16[8,64], index: 0, kind: input, shape index: {}]   ;;  %s240_s3 = inlined_call_operand.vmem [shape: bf16[64,32], index: 3, kind: input, shape index: {}]   ;;  %s241_s1 = inlined_call_operand.vmem [shape: f32[1,64], index: 1, kind: input, shape index: {}]   ;;  %s242_s2 = inlined_call_operand.vmem [shape: f32[1,64], index: 2, kind: input, shape index: {}]   ;;  %s243_s4 = inlined_call_operand.vmem [shape: f32[1,32], index: 4, kind: input, shape index: {}]   ;;  %s244_s5 = inlined_call_operand.vmem [shape: bf16[8,32], index: 5, kind: output, shape index: {}]  }
   0x1   :  { %v21_v0 = vld [vmem:[%s239_s0] sm:$0xf]  ;;  %157 = vmatprep.subr.bf16.mxu0 %v177_v9  ;;  %v172_v10 = vld [vmem:[%s240_s3 + $0x8] sm:$0xff]   ;;  %v173_v11 = vld [vmem:[%s240_s3 + $0x10] sm:$0xff]   ;;  %165 = vmatprep.mubr.msk.bf16.mxu0 %vm178_vm1, %v177_v9 }
   0x2   :  { %v22_v1 = vunpack.c.l.bf16 %v21_v0  ;;  %v171_v8 = vld [vmem:[%s240_s3] sm:$0xff]   ;;  %v174_v12 = vld [vmem:[%s240_s3 + $0x18] sm:$0xff]  }
   0x3   :  { %158 = vmatpush3.bf16.msra.mxu0 %v171_v8  ;;  %v144_v17 = vld [vmem:[%s241_s1] ss:$0 sm:$0xff] }
   0x4   :  { %v24_v2 = vsel %vm23_vm0, %v22_v1, 0.0  ;;  %159 = vmatprep.subr.bf16.mxu0 %v177_v9  ;;  %v145_v19 = vld [vmem:[%s242_s2] ss:$0 sm:$0xff] }
   0x5   :  { %25 = vadd.xlane.f32.xlu0 %v24_v2  ;;  %v146_v23 = vld [vmem:[%s243_s4] ss:$0 sm:$0xff] }
   0x7   :  { %160 = vmatpush3.bf16.msra.mxu0 %v172_v10 }
   0x8   :  { %161 = vmatprep.subr.bf16.mxu0 %v177_v9 }
   0xb   :  { %162 = vmatpush3.bf16.msra.mxu0 %v173_v11 }
   0xc   :  { %163 = vmatprep.subr.bf16.mxu0 %v177_v9 }
   0xf   :  { %164 = vmatpush3.bf16.msra.mxu0 %v174_v12 }
  0x92   :  { %v26_v3 = vpop.xlane.xlu0 %25 }
  0x93   :  { %v28_v4 = vmul.f32 0.015625, %v26_v3 }
  0x95   :  { %v29_v5 = vsub.f32 %v22_v1, %v28_v4 }
  0x97   :  { %v30_v6 = vmul.f32 %v29_v5, %v29_v5 }
  0x99   :  { %v31_v7 = vsel %vm23_vm0, %v30_v6, 0.0 }
  0x9a   :  { %32 = vadd.xlane.f32.xlu0 %v31_v7 }
 0x127   :  { %v33_v13 = vpop.xlane.xlu0 %32 }
 0x128   :  { %v34_v14 = vmul.f32 0.015625, %v33_v13 }
 0x12a   :  { %v35_v15 = vadd.f32 1e-05, %v34_v14 }
 0x12c   :  { %175 = vrsqrt.f32 %v35_v15 }
 0x136   :  { %v176_v16 = vpop.eup %175 }
 0x137   :  { %v37_v18 = vmul.f32 %v176_v16, %v29_v5 }
 0x139   :  { %v45_v20 = vmul.f32 %v144_v17, %v37_v18 }
 0x13b   :  { %v53_v21 = vadd.f32 %v145_v19, %v45_v20 }
 0x13d   :  { %v54_v22 = vpack.c.bf16 %v53_v21, %v53_v21 }
 0x13f   :  { %166 = vmatmul.mubr.msk.bf16.vlgmr.msra.gmra.mrb[0].mxu0 %vm23_vm0, %v54_v22 }
 0x212   :  { %v131_v24 = vpop.f32.mrb[0].mxu0 }
 0x213   :  { %v132_v25 = vadd.f32 %v146_v23, %v131_v24  ;;  %v167_v26 = vpop.f32.mrb[1].mxu0 }
 0x214   :  { %v134_v27 = vpop.f32.mrb[2].mxu0 }
 0x215   :  { %v137_v28 = vpack.c.bf16 %v132_v25, %v132_v25  ;;  %v168_v29 = vpop.f32.mrb[3].mxu0 }
 0x217   :  { %139 = vst.msk [vmem:[%s244_s5] sm:$0xf] %vm138_vm2, %v137_v28 }

// kernel: swin_forward.23
= control target key start
LH: loop header
LB: loop body
LE: loop exit
PB: predicated region body
PF: predicated region fallthrough
CT: control target
= control target key end

     0   :  { %s506_s18 = smov 0   ;;  %s550_s0 = inlined_call_operand.vmem [shape: bf16[32,32], index: 0, kind: input, shape index: {}]   ;;  %s551_s1 = inlined_call_operand.vmem [shape: f32[1,32], index: 1, kind: input, shape index: {}]   ;;  %s552_s2 = inlined_call_operand.vmem [shape: f32[1,32], index: 2, kind: input, shape index: {}]   ;;  %s553_s3 = inlined_call_operand.vmem [shape: bf16[32,96], index: 3, kind: input, shape index: {}]   ;;  %s554_s4 = inlined_call_operand.vmem [shape: f32[1,96], index: 4, kind: input, shape index: {}]   ;;  %s555_s5 = inlined_call_operand.vmem [shape: bf16[32,96], index: 5, kind: output, shape index: {}]  }
   0x1 LB: > { %s414_s19 = sadd.s32 4294967295, %s472_s18   ;;  %p418_p0 = scmp.ge.s32.totalorder %s472_s18, 1  ;;  %s472_s18 = sphi %s506_s18, %s15_s18  }
   0x2   : > { %p188_p1 = scmp.lt.s32.totalorder %s472_s18, 3 }
   0x4   : > { %p189_p2 = pnand %p418_p0, %p188_p1 }
   0x5   : > { %s419_s20 = sshll.u32 (!%p189_p2), %s414_s19, 1  ;;  %vm233_vm0 = vcmask (!%p189_p2), 261120   ;;  %v460_v15 = vld [vmem:[%s553_s3] sm:$0xff] (!%p189_p2)   ;;  %v474_v16 = vmov (!%p189_p2), 0.0   ;;  %v461_v17 = vld [vmem:[%s553_s3 + $0x8] sm:$0xff] (!%p189_p2)   ;;  %vm475_vm1 = vmmov (!%p189_p2), 0  }
   0x6   : > { %192 = sbr.rel (%p189_p2) target bundleno = 557 (0x22d), region = 40  ;;  %p217_p3 = scmp.lt.s32.totalorder (!%p189_p2), %s419_s20, 3  ;;  %442 = vmatprep.subr.bf16.mxu0 (!%p189_p2), %v474_v16  ;;  %446 = vmatprep.mubr.msk.bf16.mxu0 (!%p189_p2), %vm475_vm1, %v474_v16  ;;  %v423_v26 = vld [vmem:[%s551_s1] ss:$0 sm:$0xff] (!%p189_p2)  ;;  %vm355_vm2 = vcmask (!%p189_p2), 781312  }
   0x7   : > { %443 = vmatpush3.bf16.msra.mxu0 (!%p189_p2), %v460_v15  ;;  %v424_v30 = vld [vmem:[%s552_s2] ss:$0 sm:$0xff] (!%p189_p2) }
   0x8   : > { %444 = vmatprep.subr.bf16.mxu0 (!%p189_p2), %v474_v16  ;;  %v425_v35 = vld [vmem:[%s554_s4] ss:$0 sm:$0xff] (!%p189_p2) }
   0xb   : > { %445 = vmatpush3.bf16.msra.mxu0 (!%p189_p2), %v461_v17 }
   0xd   : > { %s557_s20 = smov (!%p217_p3, %s419_s20), 3 }
   0xe   : > { %s420_s21 = sshll.u32 %s557_s20, 2 }
   0xf   : > { %s220_s24 = scalar_lea.vmem %s550_s0, %s420_s21  ;;  %s226_s12 = scalar_lea.vmem %s555_s5, %s420_s21 }
  0x10   : > { %v436_v0 = vld [vmem:[%s220_s24] sm:$0xff]  }
  0x11   : > { %v437_v1 = vunpack.c.l.bf16 %v436_v0  ;;  %v438_v2 = vunpack.c.h.bf16 %v436_v0 }
  0x13   : > { %v234_v3 = vsel %vm233_vm0, %v437_v1, 0.0  ;;  %v237_v4 = vsel %vm233_vm0, %v438_v2, 0.0 }
  0x14   : > { %235 = vadd.xlane.f32.xlu0 %v234_v3 }
  0x18   : > { %238 = vadd.xlane.f32.xlu0 %v237_v4 }
  0xa1   : > { %v236_v5 = vpop.xlane.xlu0 %235 }
  0xa2   : > { %v241_v6 = vmul.f32 0.03125, %v236_v5 }
  0xa4   : > { %v243_v7 = vsub.f32 %v437_v1, %v241_v6 }
  0xa5   : > { %v239_v8 = vpop.xlane.xlu0 %238 }
  0xa6   : > { %v242_v9 = vmul.f32 0.03125, %v239_v8  ;;  %v245_v10 = vmul.f32 %v243_v7, %v243_v7 }
  0xa8   : > { %v244_v11 = vsub.f32 %v438_v2, %v242_v9  ;;  %v247_v12 = vsel %vm233_vm0, %v245_v10, 0.0 }
  0xa9   : > { %248 = vadd.xlane.f32.xlu1 %v247_v12 }
  0xaa   : > { %v246_v13 = vmul.f32 %v244_v11, %v244_v11 }
  0xac   : > { %v250_v14 = vsel %vm233_vm0, %v246_v13, 0.0 }
  0xad   : > { %251 = vadd.xlane.f32.xlu1 %v250_v14 }
 0x136   : > { %v249_v18 = vpop.xlane.xlu1 %248 }
 0x137   : > { %v253_v19 = vmul.f32 0.03125, %v249_v18 }
 0x139   : > { %v255_v20 = vadd.f32 1e-05, %v253_v19 }
 0x13a   : > { %v252_v21 = vpop.xlane.xlu1 %251 }
 0x13b   : > { %462 = vrsqrt.f32 %v255_v20  ;;  %v254_v22 = vmul.f32 0.03125, %v252_v21 }
 0x13d   : > { %v256_v23 = vadd.f32 1e-05, %v254_v22 }
 0x13f   : > { %464 = vrsqrt.f32 %v256_v23 }
 0x145   : > { %v463_v24 = vpop.eup %462 }
 0x146   : > { %v259_v25 = vmul.f32 %v463_v24, %v243_v7 }
 0x148   : > { %v268_v29 = vmul.f32 %v423_v26, %v259_v25 }
 0x149   : > { %v465_v27 = vpop.eup %464 }
 0x14a   : > { %v260_v28 = vmul.f32 %v465_v27, %v244_v11  ;;  %v277_v32 = vadd.f32 %v424_v30, %v268_v29 }
 0x14c   : > { %v269_v31 = vmul.f32 %v423_v26, %v260_v28 }
 0x14e   : > { %v278_v33 = vadd.f32 %v424_v30, %v269_v31 }
 0x150   : > { %v279_v34 = vpack.c.bf16 %v278_v33, %v277_v32 }
 0x152   : > { %447 = vmatmul.mubr.msk.bf16.vlgmr.msra.gmra.mrb[0].mxu0 %vm233_vm0, %v279_v34 }
 0x225   : > { %v340_v36 = vpop.f32.mrb[0].mxu0 }
 0x226   : > { %v341_v37 = vadd.f32 %v425_v35, %v340_v36  ;;  %v448_v38 = vpop.f32.mrb[1].mxu0 }
 0x227   : > { %v343_v39 = vpop.f32.mrb[2].mxu0 }
 0x228   : > { %v433_v40 = vpack.c.bf16 %v341_v37, %v341_v37  ;;  %v344_v41 = vadd.f32 %v425_v35, %v343_v39  ;;  %v449_v42 = vpop.f32.mrb[3].mxu0 }
 0x22a   : > { %356 = vst.msk [vmem:[%s226_s12] sm:$0xf] %vm355_vm2, %v433_v40  ;;  %v434_v43 = vpack.c.bf16 %v344_v41, %v344_v41 }
 0x22c   : > { %357 = vst.msk [vmem:[%s226_s12 + $0x4] sm:$0xf] %vm355_vm2, %v434_v43 }
 0x22d PF: > { %s15_s18 = sadd.s32 1, %s472_s18  }
 0x22e   : > { %p12_p4 = scmp.ge.s32.totalorder %s15_s18, 4  }
 0x230   :  { %14 = sbr.rel (!%p12_p4) target bundleno = 1 (0x1), region = 70 }

// kernel: swin_forward.25
= control target key start
LH: loop header
LB: loop body
LE: loop exit
PB: predicated region body
PF: predicated region fallthrough
CT: control target
= control target key end

     0   :  { %vm39_vm0 = vcmask 261120   ;;  %v349_v14 = vmov 0.0   ;;  %vm350_vm1 = vmmov 0   ;;  %vm71_vm2 = vcmask 257024   ;;  %s454_s0 = inlined_call_operand.vmem [shape: bf16[8,32], index: 0, kind: input, shape index: {}, may-alias: {0,8}]   ;;  %s455_s1 = inlined_call_operand.vmem [shape: bf16[8,32], index: 1, kind: input, shape index: {}]   ;;  %s456_s7 = inlined_call_operand.vmem [shape: f32[1,32], index: 7, kind: input, shape index: {}, may-alias: {3,7}]   ;;  %s457_s4 = inlined_call_operand.vmem [shape: bf16[32,128], index: 4, kind: input, shape index: {}]   ;;  %s458_s2 = inlined_call_operand.vmem [shape: f32[1,32], index: 2, kind: input, shape index: {}]   ;;  %s459_s3 = inlined_call_operand.vmem [shape: f32[1,32], index: 3, kind: input, shape index: {}, may-alias: {3,7}]   ;;  %s460_s6 = inlined_call_operand.vmem [shape: bf16[128,32], index: 6, kind: input, shape index: {}]   ;;  %s461_s5 = inlined_call_operand.vmem [shape: f32[1,128], index: 5, kind: input, shape index: {}]   ;;  %s462_s8 = inlined_call_operand.vmem [shape: bf16[8,32], index: 8, kind: output, shape index: {}, may-alias: {0,8}]  }
   0x1   :  { %v34_v0 = vld [vmem:[%s454_s0] sm:$0xf]  ;;  %305 = vmatprep.subr.bf16.mxu0 %v349_v14  ;;  %313 = vmatprep.subr.bf16.mxu1 %v349_v14  ;;  %v336_v15 = vld [vmem:[%s457_s4 + $0x8] sm:$0xff]   ;;  %v339_v29 = vld [vmem:[%s460_s6 + $0x10] sm:$0xff]  }
   0x2   :  { %v36_v1 = vld [vmem:[%s455_s1] sm:$0xf]  ;;  %v35_v2 = vunpack.c.l.bf16 %v34_v0  ;;  %309 = vmatprep.mubr.msk.bf16.mxu0 %vm350_vm1, %v349_v14  ;;  %329 = vmatprep.mubr.msk.bf16.mxu1 %vm350_vm1, %v349_v14  ;;  %v338_v28 = vld [vmem:[%s460_s6 + $0x8] sm:$0xff]   ;;  %v340_v30 = vld [vmem:[%s460_s6 + $0x18] sm:$0xff]  }
   0x3   :  { %v37_v3 = vunpack.c.l.bf16 %v36_v1  ;;  %v280_v4 = vld [vmem:[%s456_s7] ss:$0 sm:$0xff]  ;;  %v342_v32 = vld [vmem:[%s460_s6 + $0x28] sm:$0xff]   ;;  %v343_v33 = vld [vmem:[%s460_s6 + $0x30] sm:$0xff]  }
   0x4   :  { %v335_v13 = vld [vmem:[%s457_s4] sm:$0xff]   ;;  %v344_v34 = vld [vmem:[%s460_s6 + $0x38] sm:$0xff]  }
   0x5   :  { %v38_v5 = vadd.f32 %v37_v3, %v35_v2  ;;  %306 = vmatpush3.bf16.msra.mxu0 %v335_v13  ;;  %v278_v20 = vld [vmem:[%s458_s2] ss:$0 sm:$0xff] }
   0x6   :  { %307 = vmatprep.subr.bf16.mxu0 %v349_v14  ;;  %v279_v22 = vld [vmem:[%s459_s3] ss:$0 sm:$0xff] }
   0x7   :  { %v40_v6 = vsel %vm39_vm0, %v38_v5, 0.0  ;;  %v80_v7 = vadd.f32 %v280_v4, %v38_v5  ;;  %v337_v27 = vld [vmem:[%s460_s6] sm:$0xff]  }
   0x8   :  { %41 = vadd.xlane.f32.xlu0 %v40_v6  ;;  %314 = vmatpush3.bf16.msra.mxu1 %v337_v27  ;;  %v341_v31 = vld [vmem:[%s460_s6 + $0x20] sm:$0xff]  }
   0x9   :  { %81 = vst.msk [vmem:[#allocation2] sm:$0xff] %vm39_vm0, %v80_v7  ;;  %308 = vmatpush3.bf16.msra.mxu0 %v336_v15  ;;  %315 = vmatprep.subr.bf16.mxu1 %v349_v14  ;;  %v281_v35 = vld [vmem:[%s461_s5] ss:$0 sm:$0xff] }
   0xc   :  { %316 = vmatpush3.bf16.msra.mxu1 %v338_v28 }
   0xd   :  { %317 = vmatprep.subr.bf16.mxu1 %v349_v14 }
  0x10   :  { %318 = vmatpush3.bf16.msra.mxu1 %v339_v29  ;;  %v159_v51 = vld [vmem:[#allocation2] sm:$0xff] }
  0x11   :  { %319 = vmatprep.subr.bf16.mxu1 %v349_v14 }
  0x14   :  { %320 = vmatpush3.bf16.msra.mxu1 %v340_v30 }
  0x15   :  { %321 = vmatprep.subr.bf16.mxu1 %v349_v14 }
  0x18   :  { %322 = vmatpush3.bf16.msra.mxu1 %v341_v31 }
  0x19   :  { %323 = vmatprep.subr.bf16.mxu1 %v349_v14 }
  0x1c   :  { %324 = vmatpush3.bf16.msra.mxu1 %v342_v32 }
  0x1d   :  { %325 = vmatprep.subr.bf16.mxu1 %v349_v14 }
  0x20   :  { %326 = vmatpush3.bf16.msra.mxu1 %v343_v33 }
  0x21   :  { %327 = vmatprep.subr.bf16.mxu1 %v349_v14 }
  0x24   :  { %328 = vmatpush3.bf16.msra.mxu1 %v344_v34 }
  0x95   :  { %v42_v8 = vpop.xlane.xlu0 %41 }
  0x96   :  { %v44_v9 = vmul.f32 0.03125, %v42_v8 }
  0x98   :  { %v45_v10 = vsub.f32 %v38_v5, %v44_v9 }
  0x9a   :  { %v46_v11 = vmul.f32 %v45_v10, %v45_v10 }
  0x9c   :  { %v47_v12 = vsel %vm39_vm0, %v46_v11, 0.0 }
  0x9d   :  { %48 = vadd.xlane.f32.xlu0 %v47_v12 }
 0x12a   :  { %v49_v16 = vpop.xlane.xlu0 %48 }
 0x12b   :  { %v50_v17 = vmul.f32 0.03125, %v49_v16 }
 0x12d   :  { %v51_v18 = vadd.f32 1e-05, %v50_v17 }
 0x12f   :  { %345 = vrsqrt.f32 %v51_v18 }
 0x139   :  { %v346_v19 = vpop.eup %345 }
 0x13a   :  { %v53_v21 = vmul.f32 %v346_v19, %v45_v10 }
 0x13c   :  { %v61_v23 = vmul.f32 %v278_v20, %v53_v21 }
 0x13e   :  { %v69_v24 = vadd.f32 %v279_v22, %v61_v23 }
 0x140   :  { %v70_v25 = vpack.c.bf16 %v69_v24, %v69_v24 }
 0x142   :  { %72 = vst.msk [vmem:[#allocation3] sm:$0xf] %vm71_vm2, %v70_v25 }
 0x149   :  { %v82_v26 = vld [vmem:[#allocation3] sm:$0xf] }
 0x14a   :  { %310 = vmatmul.mubr.msk.bf16.vlgmr.msra.gmra.mrb[0].mxu0 %vm39_vm0, %v82_v26 }
 0x21d   :  { %v144_v36 = vpop.f32.mrb[0].mxu0 }
 0x21e   :  { %v145_v37 = vadd.f32 %v281_v35, %v144_v36  ;;  %v311_v38 = vpop.f32.mrb[1].mxu0 }
 0x21f   :  { %v147_v39 = vpop.f32.mrb[2].mxu0 }
 0x220   :  { %v150_v40 = vmul.f32 %v145_v37, %v145_v37  ;;  %v312_v41 = vpop.f32.mrb[3].mxu0 }
 0x222   :  { %v151_v42 = vmul.f32 %v150_v40, %v145_v37 }
 0x224   :  { %v152_v43 = vmul.f32 0.044715, %v151_v42 }
 0x226   :  { %v153_v44 = vadd.f32 %v152_v43, %v145_v37 }
 0x228   :  { %v154_v45 = vmul.f32 0.7978846, %v153_v44 }
 0x22a   :  { %347 = vtanh.f32 %v154_v45 }
 0x234   :  { %v348_v46 = vpop.eup %347 }
 0x235   :  { %v156_v47 = vadd.f32 1.0, %v348_v46 }
 0x237   :  { %v157_v48 = vmul.f32 0.5, %v156_v47 }
 0x239   :  { %v158_v49 = vmul.f32 %v157_v48, %v145_v37 }
 0x23b   :  { %v160_v50 = vpack.c.bf16 %v158_v49, %v158_v49 }
 0x23d   :  { %330 = vmatmul.mubr.bf16.vlgmr.msra.gmra.mrb[0].mxu1 %v160_v50 }
 0x310   :  { %v259_v52 = vpop.f32.mrb[0].mxu1 }
 0x311   :  { %v265_v53 = vadd.f32 %v259_v52, %v159_v51  ;;  %v331_v54 = vpop.f32.mrb[1].mxu1 }
 0x312   :  { %v262_v55 = vpop.f32.mrb[2].mxu1 }
 0x313   :  { %266 = vst.msk [vmem:[#allocation2] sm:$0xff] %vm39_vm0, %v265_v53  ;;  %v332_v56 = vpop.f32.mrb[3].mxu1 }
 0x31a   :  { %v270_v57 = vld [vmem:[#allocation2] sm:$0xff] }
 0x31b   :  { %v271_v58 = vpack.c.bf16 %v270_v57, %v270_v57 }
 0x31d   :  { %273 = vst.msk [vmem:[%s462_s8] sm:$0xf] %vm71_vm2, %v271_v58 }

// kernel: swin_forward.24
= control target key start
LH: loop header
LB: loop body
LE: loop exit
PB: predicated region body
PF: predicated region fallthrough
CT: control target
= control target key end

     0   :  { %s1329_s18 = smov 0   ;;  %s1488_s0 = inlined_call_operand.vmem [shape: bf16[2,16,96], index: 0, kind: input, shape index: {}]   ;;  %s1489_s1 = inlined_call_operand.vmem [shape: bf16[4,16,16], index: 1, kind: input, shape index: {}]   ;;  %s1490_s2 = inlined_call_operand.vmem [shape: bf16[1,16,16], index: 2, kind: input, shape index: {}]   ;;  %s1491_s3 = inlined_call_operand.vmem [shape: bf16[32,32], index: 3, kind: input, shape index: {}]   ;;  %s1492_s4 = inlined_call_operand.vmem [shape: f32[1,32], index: 4, kind: input, shape index: {}]   ;;  %s1493_s5 = inlined_call_operand.vmem [shape: bf16[2,16,32], index: 5, kind: output, shape index: {}]  }
   0x1 LB: > { %s1048_s19 = sadd.s32 4294967295, %s1284_s18   ;;  %p1052_p0 = scmp.ge.s32.totalorder %s1284_s18, 1  ;;  %s1284_s18 = sphi %s1329_s18, %s15_s18  }
   0x2   : > { %p187_p1 = scmp.lt.s32.totalorder %s1284_s18, 3 }
   0x4   : > { %p188_p2 = pnand %p1052_p0, %p187_p1 }
   0x5   : > { %p215_p3 = scmp.lt.s32.totalorder (!%p188_p2), %s1048_s19, 1  ;;  %v1286_v0 = vmov (!%p188_p2), 0.0   ;;  %vm1287_vm0 = vmmov (!%p188_p2), 0   ;;  %s1288_s24 = smov (!%p188_p2), 96   ;;  %vm251_vm1 = vcmask (!%p188_p2), 64512   ;;  %v1093_v4 = vld [vmem:[%s1489_s1] sm:$0xff] (!%p188_p2)  }
   0x6   : > { %191 = sbr.rel (%p188_p2) target bundleno = 2207 (0x89f), region = 40  ;;  %1135 = vmatprep.subr.bf16.mxu0 (!%p188_p2), %v1286_v0  ;;  %1137 = vmatprep.mubr.msk.bf16.mxu0 (!%p188_p2), %vm1287_vm0, %v1286_v0  ;;  %v1089_v5 = vld [vmem:[%s1490_s2] sm:$0xff] (!%p188_p2)   ;;  %v1094_v6 = vunpack.c.l.bf16 (!%p188_p2), %v1093_v4  ;;  %v1095_v7 = vunpack.c.h.bf16 (!%p188_p2), %v1093_v4  ;;  %vm301_vm2 = vcmask (!%p188_p2), 130048   ;;  %s1289_s29 = smov (!%p188_p2), 64   ;;  %vm377_vm3 = vcmask (!%p188_p2), 1043456   ;;  %v1108_v51 = vld [vmem:[%s1489_s1 + $0x8] sm:$0xff] (!%p188_p2)  }
   0x7   : > { %1147 = vmatprep.subr.bf16.mxu1 (!%p188_p2), %v1286_v0  ;;  %1149 = vmatprep.mubr.msk.bf16.mxu1 (!%p188_p2), %vm1287_vm0, %v1286_v0  ;;  %v1365_v8 = vunpack.c.l.bf16 (!%p188_p2), %v1089_v5  ;;  %v1367_v12 = vunpack.c.h.bf16 (!%p188_p2), %v1089_v5  ;;  %s1290_s30 = smov (!%p188_p2), 80   ;;  %s1291_s6 = smov (!%p188_p2), 88   ;;  %v373_v46 = vld [vmem:[%s1491_s3] sm:$0xf] (!%p188_p2)  ;;  %v1098_v54 = vunpack.c.l.bf16 (!%p188_p2), %v1108_v51  ;;  %v1109_v59 = vld [vmem:[%s1489_s1 + $0x10] sm:$0xff] (!%p188_p2)   ;;  %vm990_vm4 = vcmask (!%p188_p2), 257024  }
   0x8   : > { %s1292_s7 = smov (!%p188_p2), 120   ;;  %s1293_s8 = smov (!%p188_p2), 112   ;;  %v379_v47 = vsel (!%p188_p2), %vm377_vm3, %v373_v46, 0  ;;  %v1102_v61 = vunpack.c.l.bf16 (!%p188_p2), %v1109_v59  ;;  %v1103_v62 = vunpack.c.h.bf16 (!%p188_p2), %v1109_v59 }
   0x9   : > { %1148 = vmatpush3.bf16.msra.mxu1 (!%p188_p2), %v379_v47  ;;  %s1294_s15 = smov (!%p188_p2), 72   ;;  %s1295_s16 = smov (!%p188_p2), 48  }
   0xa   : > { %1159 = vmatprep.subr.bf16.mxu1 (!%p188_p2), %v1286_v0  ;;  %s1296_s17 = smov (!%p188_p2), 104   ;;  %s1297_s21 = smov (!%p188_p2), 56  }
   0xb   : > { %s1298_s26 = smov (!%p188_p2), 40  }
   0xd   : > { %s1495_s19 = smov (!%p215_p3, %s1048_s19), 1 }
   0xe   : > { %s1084_s20 = sshll.u32 %s1495_s19, 3 }
   0xf   : > { %s1351_s23 = scalar_lea.vmem %s1488_s0, %s1084_s20  ;;  %s224_s10 = scalar_lea.vmem %s1493_s5, %s1084_s20 }
  0x10   : > { %v1242_v1 = vld [vmem:[%s1351_s23] sm:$0xff]  }
  0x11   : > { %249 = vrot.lane.b32.xlu0 %v1242_v1, %s1288_s24  ;;  %v1374_v20 = vld [vmem:[%s1351_s23] sm:$0xff]  }
  0x12   : > { %v1381_v32 = vld [vmem:[%s1351_s23] sm:$0xff]  }
  0x83   : > { %v250_v2 = vpop.permute.xlu0 %249 }
  0x84   : > { %v256_v3 = vsel %vm251_vm1, %v250_v2, 0 }
  0x85   : > { %1136 = vmatpush3.bf16.xpose.msra.mxu0 %v256_v3 }
  0x86   : > { %1141 = vmatprep.subr.bf16.mxu0 %v1286_v0 }
  0x8c   : > { %1138 = vmatmul.mubr.msk.bf16.vlgmr.msra.gmra.mrb[0].mxu0 %vm251_vm1, %v1242_v1 }
  0x8d   : > { %1143 = vmatprep.mubr.msk.bf16.mxu0 %vm1287_vm0, %v1286_v0 }
 0x15f   : > { %v292_v9 = vpop.f32.mrb[0].mxu0 }
 0x160   : > { %v293_v10 = vadd.f32 %v1094_v6, %v292_v9  ;;  %v1139_v11 = vpop.f32.mrb[1].mxu0 }
 0x161   : > { %v295_v13 = vpop.f32.mrb[2].mxu0  ;;  %v1418_v11 = vld [vmem:[%s1351_s23] sm:$0xff]  }
 0x162   : > { %v296_v14 = vadd.f32 %v1095_v7, %v295_v13  ;;  %v1140_v15 = vpop.f32.mrb[3].mxu0  ;;  %v299_v16 = vadd.f32 %v1365_v8, %v293_v10  ;;  %v1099_v13 = vunpack.c.h.bf16 %v1108_v51 }
 0x164   : > { %v302_v17 = vsel %vm301_vm2, %v299_v16, -inf  ;;  %v300_v18 = vadd.f32 %v1367_v12, %v296_v14 }
 0x165   : > { %303 = vmax.xlane.f32.xlu0 %v302_v17 }
 0x166   : > { %v305_v19 = vsel %vm301_vm2, %v300_v18, -inf }
 0x167   : > { %306 = vmax.xlane.f32.xlu1 %v305_v19 }
 0x178   : > { %325 = vrot.lane.b32.xlu1 %v1242_v1, %s1289_s29 }
 0x17b   : > { %624 = vrot.lane.b32.xlu0 %v1374_v20, %s1290_s30 }
 0x1f2   : > { %v304_v21 = vpop.xlane.xlu0 %303 }
 0x1f3   : > { %v308_v22 = vsub.f32 %v299_v16, %v304_v21 }
 0x1f4   : > { %v307_v23 = vpop.xlane.xlu1 %306 }
 0x1f5   : > { %v310_v24 = vmul.f32 1.442695, %v308_v22  ;;  %v309_v25 = vsub.f32 %v300_v18, %v307_v23 }
 0x1f6   : > { %v625_v42 = vpop.permute.xlu0 %624 }
 0x1f7   : > { %1246 = vpow2.f32 %v310_v24  ;;  %v312_v26 = vmul.f32 1.442695, %v309_v25  ;;  %v630_v44 = vsel %vm251_vm1, %v625_v42, 0 }
 0x1f8   : > { %v326_v27 = vpop.permute.xlu1 %325 }
 0x1f9   : > { %1248 = vpow2.f32 %v312_v26  ;;  %1142 = vmatpush3.bf16.msra.mxu0 %v326_v27 }
 0x1fa   : > { %1153 = vmatprep.subr.bf16.mxu0 %v1286_v0 }
 0x201   : > { %v1247_v28 = vpop.eup %1246 }
 0x202   : > { %v314_v29 = vsel %vm301_vm2, %v1247_v28, 0.0 }
 0x203   : > { %v1249_v30 = vpop.eup %1248  ;;  %315 = vadd.xlane.f32.xlu1 %v314_v29 }
 0x204   : > { %v317_v31 = vsel %vm301_vm2, %v1249_v30, 0.0 }
 0x207   : > { %318 = vadd.xlane.f32.xlu1 %v317_v31 }
 0x218   : > { %438 = vrot.lane.b32.xlu1 %v1381_v32, %s1291_s6 }
 0x21c   : > { %436 = vrot.lane.b32.xlu1 %v1381_v32, %s1292_s7 }
 0x220   : > { %622 = vrot.lane.b32.xlu1 %v1374_v20, %s1293_s8 }
 0x290   : > { %v316_v33 = vpop.xlane.xlu1 %315 }
 0x291   : > { %1250 = vrcp.f32 %v316_v33 }
 0x294   : > { %v319_v34 = vpop.xlane.xlu1 %318 }
 0x295   : > { %1252 = vrcp.f32 %v319_v34 }
 0x298   : > { %v439_v37 = vpop.permute.xlu1 %438 }
 0x299   : > { %v444_v40 = vsel %vm251_vm1, %v439_v37, 0 }
 0x29b   : > { %v1251_v35 = vpop.eup %1250 }
 0x29c   : > { %v322_v38 = vmul.f32 %v1251_v35, %v1247_v28  ;;  %v437_v43 = vpop.permute.xlu1 %436 }
 0x29f   : > { %v1253_v36 = vpop.eup %1252 }
 0x2a0   : > { %v323_v39 = vmul.f32 %v1253_v36, %v1249_v30  ;;  %v623_v45 = vpop.permute.xlu1 %622 }
 0x2a2   : > { %v324_v41 = vpack.c.bf16 %v323_v39, %v322_v38 }
 0x2a4   : > { %1144 = vmatmul.mubr.msk.bf16.vlgmr.msra.gmra.mrb[4].mxu0 %vm301_vm2, %v324_v41 }
 0x2a5   : > { %1154 = vmatpush3.bf16.xpose.msra.mxu0 %v444_v40  ;;  %1155 = vmatprep.mubr.msk.bf16.mxu0 %vm1287_vm0, %v1286_v0 }
 0x2a6   : > { %1171 = vmatprep.subr.bf16.mxu0 %v1286_v0 }
 0x2ac   : > { %1156 = vmatmul.mubr.msk.bf16.vlgmr.msra.gmra.mrb[8].mxu0 %vm251_vm1, %v437_v43 }
 0x2ad   : > { %1172 = vmatpush3.bf16.xpose.msra.mxu0 %v630_v44  ;;  %1173 = vmatprep.mubr.msk.bf16.mxu0 %vm1287_vm0, %v1286_v0 }
 0x2ae   : > { %1177 = vmatprep.subr.bf16.mxu0 %v1286_v0 }
 0x2b4   : > { %1174 = vmatmul.mubr.msk.bf16.vlgmr.msra.gmra.mrb[12].mxu0 %vm251_vm1, %v623_v45 }
 0x2b5   : > { %1179 = vmatprep.mubr.msk.bf16.mxu0 %vm1287_vm0, %v1286_v0 }
 0x377   : > { %v365_v48 = vpop.f32.mrb[4].mxu0 }
 0x378   : > { %v1145_v49 = vpop.f32.mrb[5].mxu0 }
 0x379   : > { %v368_v50 = vpop.f32.mrb[6].mxu0 }
 0x37a   : > { %v372_v52 = vpack.c.bf16 %v368_v50, %v365_v48  ;;  %v1146_v53 = vpop.f32.mrb[7].mxu0 }
 0x37c   : > { %1150 = vmatmul.mubr.msk.bf16.vlgmr.msra.gmra.mrb[0].mxu1 %vm251_vm1, %v372_v52 }
 0x37d   : > { %1161 = vmatprep.mubr.msk.bf16.mxu1 %vm1287_vm0, %v1286_v0 }
 0x37f   : > { %v480_v55 = vpop.f32.mrb[8].mxu0 }
 0x380   : > { %v481_v56 = vadd.f32 %v1098_v54, %v480_v55  ;;  %v1157_v57 = vpop.f32.mrb[9].mxu0 }
 0x381   : > { %v483_v58 = vpop.f32.mrb[10].mxu0 }
 0x382   : > { %v1158_v60 = vpop.f32.mrb[11].mxu0  ;;  %v484_v14 = vadd.f32 %v1099_v13, %v483_v58  ;;  %v487_v33 = vadd.f32 %v1365_v8, %v481_v56 }
 0x384   : > { %v488_v15 = vadd.f32 %v1367_v12, %v484_v14  ;;  %v489_v34 = vsel %vm301_vm2, %v487_v33, -inf }
 0x386   : > { %v492_v16 = vsel %vm301_vm2, %v488_v15, -inf }
 0x387   : > { %v666_v63 = vpop.f32.mrb[12].mxu0 }
 0x388   : > { %v667_v1 = vadd.f32 %v1102_v61, %v666_v63  ;;  %v1175_v2 = vpop.f32.mrb[13].mxu0 }
 0x389   : > { %v669_v3 = vpop.f32.mrb[14].mxu0 }
 0x38a   : > { %v670_v4 = vadd.f32 %v1103_v62, %v669_v3  ;;  %v1176_v5 = vpop.f32.mrb[15].mxu0  ;;  %v673_v6 = vadd.f32 %v1365_v8, %v667_v1 }
 0x38c   : > { %v675_v7 = vsel %vm301_vm2, %v673_v6, -inf  ;;  %v674_v9 = vadd.f32 %v1367_v12, %v670_v4 }
 0x38d   : > { %676 = vmax.xlane.f32.xlu1 %v675_v7 }
 0x38e   : > { %v678_v10 = vsel %vm301_vm2, %v674_v9, -inf }
 0x38f   : > { %679 = vmax.xlane.f32.xlu0 %v678_v10 }
 0x3a5   : > { %810 = vrot.lane.b32.xlu0 %v1418_v11, %s1294_s15 }
 0x3c4   : > { %493 = vmax.xlane.f32.xlu0 %v492_v16  ;;  %v560_v16 = vld [vmem:[%s1491_s3 + $0x4] sm:$0xf] }
 0x41a   : > { %v677_v17 = vpop.xlane.xlu1 %676 }
 0x41b   : > { %v681_v18 = vsub.f32 %v673_v6, %v677_v17  ;;  %v565_v17 = vsel %vm377_vm3, %v560_v16, 0 }
 0x41c   : > { %v680_v19 = vpop.xlane.xlu0 %679 }
 0x41d   : > { %v683_v21 = vmul.f32 1.442695, %v681_v18  ;;  %v682_v22 = vsub.f32 %v674_v9, %v680_v19 }
 0x41f   : > { %1254 = vpow2.f32 %v683_v21  ;;  %v685_v23 = vmul.f32 1.442695, %v682_v22 }
 0x420   : > { %v811_v28 = vpop.permute.xlu0 %810 }
 0x421   : > { %1256 = vpow2.f32 %v685_v23  ;;  %v816_v43 = vsel %vm251_vm1, %v811_v28, 0  ;;  %v746_v28 = vld [vmem:[%s1491_s3 + $0x8] sm:$0xf] }
 0x429   : > { %v1255_v24 = vpop.eup %1254 }
 0x42a   : > { %v687_v25 = vsel %vm301_vm2, %v1255_v24, 0.0 }
 0x42b   : > { %v1257_v26 = vpop.eup %1256  ;;  %688 = vadd.xlane.f32.xlu1 %v687_v25 }
 0x42c   : > { %v690_v27 = vsel %vm301_vm2, %v1257_v26, 0.0 }
 0x42f   : > { %691 = vadd.xlane.f32.xlu1 %v690_v27 }
 0x440   : > { %698 = vrot.lane.b32.xlu1 %v1374_v20, %s1295_s16 }
 0x444   : > { %808 = vrot.lane.b32.xlu1 %v1418_v11, %s1296_s17 }
 0x451   : > { %v494_v29 = vpop.xlane.xlu0 %493 }
 0x452   : > { %v496_v30 = vsub.f32 %v488_v15, %v494_v29 }
 0x454   : > { %v499_v31 = vmul.f32 1.442695, %v496_v30 }
 0x456   : > { %1258 = vpow2.f32 %v499_v31 }
 0x460   : > { %v1259_v35 = vpop.eup %1258 }
 0x461   : > { %v504_v36 = vsel %vm301_vm2, %v1259_v35, 0.0 }
 0x468   : > { %490 = vmax.xlane.f32.xlu1 %v489_v34  ;;  %v751_v34 = vsel %vm377_vm3, %v746_v28, 0 }
 0x46c   : > { %505 = vadd.xlane.f32.xlu1 %v504_v36 }
 0x4b8   : > { %v689_v37 = vpop.xlane.xlu1 %688 }
 0x4b9   : > { %1260 = vrcp.f32 %v689_v37 }
 0x4bc   : > { %v692_v20 = vpop.xlane.xlu1 %691 }
 0x4bd   : > { %1262 = vrcp.f32 %v692_v20 }
 0x4c0   : > { %v699_v38 = vpop.permute.xlu1 %698 }
 0x4c1   : > { %1178 = vmatpush3.bf16.msra.mxu0 %v699_v38  ;;  %v932_v38 = vld [vmem:[%s1491_s3 + $0xc] sm:$0xf] }
 0x4c2   : > { %1189 = vmatprep.subr.bf16.mxu0 %v1286_v0 }
 0x4c3   : > { %v1261_v39 = vpop.eup %1260 }
 0x4c4   : > { %v695_v41 = vmul.f32 %v1261_v39, %v1255_v24  ;;  %v809_v45 = vpop.permute.xlu1 %808 }
 0x4c7   : > { %v1263_v40 = vpop.eup %1262 }
 0x4c8   : > { %v696_v42 = vmul.f32 %v1263_v40, %v1257_v26 }
 0x4ca   : > { %v697_v44 = vpack.c.bf16 %v696_v42, %v695_v41  ;;  %v937_v42 = vsel %vm377_vm3, %v932_v38, 0 }
 0x4cc   : > { %1180 = vmatmul.mubr.msk.bf16.vlgmr.msra.gmra.mrb[16].mxu0 %vm301_vm2, %v697_v44 }
 0x4cd   : > { %1190 = vmatpush3.bf16.xpose.msra.mxu0 %v816_v43  ;;  %1191 = vmatprep.mubr.msk.bf16.mxu0 %vm1287_vm0, %v1286_v0 }
 0x4d4   : > { %1192 = vmatmul.mubr.msk.bf16.vlgmr.msra.gmra.mrb[20].mxu0 %vm251_vm1, %v809_v45 }
 0x4f5   : > { %v491_v46 = vpop.xlane.xlu1 %490 }
 0x4f6   : > { %v495_v47 = vsub.f32 %v487_v33, %v491_v46 }
 0x4f8   : > { %v497_v48 = vmul.f32 1.442695, %v495_v47 }
 0x4f9   : > { %v506_v51 = vpop.xlane.xlu1 %505 }
 0x4fa   : > { %1264 = vpow2.f32 %v497_v48  ;;  %v1057_v48 = vld [vmem:[%s1492_s4] ss:$0 sm:$0xff] }
 0x4fb   : > { %1266 = vrcp.f32 %v506_v51 }
 0x504   : > { %v1265_v49 = vpop.eup %1264 }
 0x505   : > { %v501_v50 = vsel %vm301_vm2, %v1265_v49, 0.0  ;;  %v1267_v54 = vpop.eup %1266 }
 0x506   : > { %502 = vadd.xlane.f32.xlu0 %v501_v50  ;;  %v510_v56 = vmul.f32 %v1267_v54, %v1259_v35 }
 0x51c   : > { %512 = vrot.lane.b32.xlu0 %v1381_v32, %s1297_s21  ;;  %v1110_v32 = vld [vmem:[%s1489_s1 + $0x18] sm:$0xff]  }
 0x51d   : > { %v1106_v1 = vunpack.c.l.bf16 %v1110_v32  ;;  %v1107_v2 = vunpack.c.h.bf16 %v1110_v32 }
 0x593   : > { %v503_v52 = vpop.xlane.xlu0 %502 }
 0x594   : > { %1268 = vrcp.f32 %v503_v52 }
 0x597   : > { %v513_v53 = vpop.permute.xlu0 %512 }
 0x598   : > { %1160 = vmatpush3.bf16.msra.mxu1 %v513_v53 }
 0x599   : > { %1165 = vmatprep.subr.bf16.mxu1 %v1286_v0 }
 0x59e   : > { %v1269_v55 = vpop.eup %1268 }
 0x59f   : > { %v509_v57 = vmul.f32 %v1269_v55, %v1265_v49  ;;  %v738_v58 = vpop.f32.mrb[16].mxu0 }
 0x5a0   : > { %v1181_v59 = vpop.f32.mrb[17].mxu0 }
 0x5a1   : > { %v741_v60 = vpop.f32.mrb[18].mxu0  ;;  %v511_v61 = vpack.c.bf16 %v510_v56, %v509_v57 }
 0x5a2   : > { %v745_v62 = vpack.c.bf16 %v741_v60, %v738_v58  ;;  %v1182_v63 = vpop.f32.mrb[19].mxu0 }
 0x5a3   : > { %1162 = vmatmul.mubr.msk.bf16.vlgmr.msra.gmra.mrb[4].mxu1 %vm301_vm2, %v511_v61 }
 0x5a4   : > { %1167 = vmatprep.mubr.msk.bf16.mxu1 %vm1287_vm0, %v1286_v0  ;;  %1166 = vmatpush3.bf16.msra.mxu1 %v565_v17 }
 0x5a5   : > { %1183 = vmatprep.subr.bf16.mxu1 %v1286_v0 }
 0x5a7   : > { %v852_v3 = vpop.f32.mrb[20].mxu0 }
 0x5a8   : > { %v853_v4 = vadd.f32 %v1106_v1, %v852_v3  ;;  %v1193_v5 = vpop.f32.mrb[21].mxu0 }
 0x5a9   : > { %v855_v6 = vpop.f32.mrb[22].mxu0 }
 0x5aa   : > { %v856_v7 = vadd.f32 %v1107_v2, %v855_v6  ;;  %v1194_v9 = vpop.f32.mrb[23].mxu0  ;;  %v859_v10 = vadd.f32 %v1365_v8, %v853_v4 }
 0x5ac   : > { %v861_v13 = vsel %vm301_vm2, %v859_v10, -inf  ;;  %v860_v14 = vadd.f32 %v1367_v12, %v856_v7 }
 0x5ad   : > { %862 = vmax.xlane.f32.xlu1 %v861_v13 }
 0x5ae   : > { %v864_v15 = vsel %vm301_vm2, %v860_v14, -inf }
 0x5b1   : > { %865 = vmax.xlane.f32.xlu1 %v864_v15 }
 0x63a   : > { %v863_v18 = vpop.xlane.xlu1 %862 }
 0x63b   : > { %v867_v19 = vsub.f32 %v859_v10, %v863_v18 }
 0x63d   : > { %v869_v8 = vmul.f32 1.442695, %v867_v19 }
 0x63e   : > { %v866_v21 = vpop.xlane.xlu1 %865 }
 0x63f   : > { %1270 = vpow2.f32 %v869_v8  ;;  %v868_v22 = vsub.f32 %v860_v14, %v866_v21 }
 0x641   : > { %v871_v12 = vmul.f32 1.442695, %v868_v22 }
 0x643   : > { %1272 = vpow2.f32 %v871_v12 }
 0x649   : > { %v1271_v23 = vpop.eup %1270 }
 0x64a   : > { %v873_v24 = vsel %vm301_vm2, %v1271_v23, 0.0 }
 0x64b   : > { %874 = vadd.xlane.f32.xlu1 %v873_v24 }
 0x64d   : > { %v1273_v25 = vpop.eup %1272 }
 0x64e   : > { %v876_v26 = vsel %vm301_vm2, %v1273_v25, 0.0 }
 0x64f   : > { %877 = vadd.xlane.f32.xlu1 %v876_v26 }
 0x660   : > { %884 = vrot.lane.b32.xlu1 %v1418_v11, %s1298_s26 }
 0x676   : > { %v552_v27 = vpop.f32.mrb[4].mxu1 }
 0x677   : > { %v1163_v29 = vpop.f32.mrb[5].mxu1 }
 0x678   : > { %v555_v30 = vpop.f32.mrb[6].mxu1 }
 0x679   : > { %v559_v31 = vpack.c.bf16 %v555_v30, %v552_v27  ;;  %v1164_v33 = vpop.f32.mrb[7].mxu1 }
 0x67b   : > { %1168 = vmatmul.mubr.msk.bf16.vlgmr.msra.gmra.mrb[0].mxu1 %vm251_vm1, %v559_v31 }
 0x67c   : > { %1184 = vmatpush3.bf16.msra.mxu1 %v751_v34  ;;  %1185 = vmatprep.mubr.msk.bf16.mxu1 %vm1287_vm0, %v1286_v0 }
 0x67d   : > { %1195 = vmatprep.subr.bf16.mxu1 %v1286_v0 }
 0x687   : > { %1186 = vmatmul.mubr.msk.bf16.vlgmr.msra.gmra.mrb[0].mxu1 %vm251_vm1, %v745_v62 }
 0x688   : > { %1197 = vmatprep.mubr.msk.bf16.mxu1 %vm1287_vm0, %v1286_v0 }
 0x6d8   : > { %v875_v11 = vpop.xlane.xlu1 %874 }
 0x6d9   : > { %1274 = vrcp.f32 %v875_v11 }
 0x6dc   : > { %v878_v35 = vpop.xlane.xlu1 %877 }
 0x6dd   : > { %1276 = vrcp.f32 %v878_v35 }
 0x6e0   : > { %v885_v36 = vpop.permute.xlu1 %884 }
 0x6e1   : > { %1196 = vmatpush3.bf16.msra.mxu1 %v885_v36 }
 0x6e2   : > { %1201 = vmatprep.subr.bf16.mxu1 %v1286_v0 }
 0x6e3   : > { %v1275_v37 = vpop.eup %1274 }
 0x6e4   : > { %v881_v39 = vmul.f32 %v1275_v37, %v1271_v23 }
 0x6e7   : > { %v1277_v20 = vpop.eup %1276 }
 0x6e8   : > { %v882_v40 = vmul.f32 %v1277_v20, %v1273_v25 }
 0x6ea   : > { %v883_v41 = vpack.c.bf16 %v882_v40, %v881_v39 }
 0x6ec   : > { %1198 = vmatmul.mubr.msk.bf16.vlgmr.msra.gmra.mrb[8].mxu1 %vm301_vm2, %v883_v41 }
 0x6ed   : > { %1202 = vmatpush3.bf16.msra.mxu1 %v937_v42  ;;  %1203 = vmatprep.mubr.msk.bf16.mxu1 %vm1287_vm0, %v1286_v0 }
 0x7bf   : > { %v924_v43 = vpop.f32.mrb[8].mxu1 }
 0x7c0   : > { %v1199_v44 = vpop.f32.mrb[9].mxu1 }
 0x7c1   : > { %v927_v45 = vpop.f32.mrb[10].mxu1 }
 0x7c2   : > { %v931_v46 = vpack.c.bf16 %v927_v45, %v924_v43  ;;  %v1200_v47 = vpop.f32.mrb[11].mxu1 }
 0x7c4   : > { %1204 = vmatmul.mubr.msk.bf16.vlgmr.msra.gmra.mrb[0].mxu1 %vm251_vm1, %v931_v46 }
 0x897   : > { %v973_v49 = vpop.f32.mrb[0].mxu1 }
 0x898   : > { %v1207_v50 = vadd.f32 %v1057_v48, %v973_v49  ;;  %v1205_v51 = vpop.f32.mrb[1].mxu1 }
 0x899   : > { %v976_v0 = vpop.f32.mrb[2].mxu1 }
 0x89a   : > { %v1086_v52 = vpack.c.bf16 %v1207_v50, %v1207_v50  ;;  %v1208_v53 = vadd.f32 %v1057_v48, %v976_v0  ;;  %v1206_v54 = vpop.f32.mrb[3].mxu1 }
 0x89c   : > { %991 = vst.msk [vmem:[%s224_s10] sm:$0xf] %vm990_vm4, %v1086_v52  ;;  %v1087_v55 = vpack.c.bf16 %v1208_v53, %v1208_v53 }
 0x89e   : > { %992 = vst.msk [vmem:[%s224_s10 + $0x4] sm:$0xf] %vm990_vm4, %v1087_v55 }
 0x89f PF: > { %s15_s18 = sadd.s32 1, %s1284_s18  }
 0x8a0   : > { %p12_p4 = scmp.ge.s32.totalorder %s15_s18, 4  }
 0x8a2   :  { %14 = sbr.rel (!%p12_p4) target bundleno = 1 (0x1), region = 73 }

// kernel: swin_forward.29
= control target key start
LH: loop header
LB: loop body
LE: loop exit
PB: predicated region body
PF: predicated region fallthrough
CT: control target
= control target key end

     0   :  { %vm26_vm0 = vcmask 257024   ;;  %s307_s0 = inlined_call_operand.vmem [shape: bf16[2,4,32], index: 0, kind: input, shape index: {}]   ;;  %s308_s1 = inlined_call_operand.vmem [shape: f32[1,32], index: 1, kind: input, shape index: {}]   ;;  %s309_s2 = inlined_call_operand.vmem [shape: f32[1,32], index: 2, kind: input, shape index: {}]   ;;  %s310_s3 = inlined_call_operand.vmem [shape: bf16[32,10], index: 3, kind: input, shape index: {}]   ;;  %s311_s4 = inlined_call_operand.vmem [shape: f32[1,10], index: 4, kind: input, shape index: {}]   ;;  %s312_s5 = inlined_call_operand.hbm [shape: f32[2,10], index: 5, kind: output, shape index: {}]  }
   0x1   :  { %v22_v0 = vld [vmem:[%s307_s0] sm:$0x3]  ;;  %v23_v1 = vld [vmem:[%s307_s0 + $0x2] sm:$0x3] }
   0x2   :  { %v24_v2 = vunpack.c.l.bf16 %v22_v0  ;;  %v25_v3 = vunpack.c.l.bf16 %v23_v1 }
   0x3   :  { %10 = vsyncpa [#allocation3], 0  ;;  %vm46_vm1 = vcmask 1041409   ;;  %vm49_vm2 = vcmask 254976   ;;  %v210_v32 = vld [vmem:[%s310_s3] sm:$0xff]   ;;  %v238_v33 = vmov 0.0  }
   0x4   :  { %v27_v4 = vsel %vm26_vm0, %v24_v2, 0.0  ;;  %v34_v5 = vsel %vm26_vm0, %v25_v3, 0.0  ;;  %199 = vmatprep.subr.bf16.mxu0 %v238_v33  ;;  %vm239_vm3 = vmmov 0   ;;  %v211_v34 = vld [vmem:[%s310_s3 + $0x8] sm:$0xff]   ;;  %v190_v39 = vld [vmem:[%s308_s1] ss:$0 sm:$0xff] }
   0x5   :  { %v28_v6 = vrot.slane %v27_v4, 4  ;;  %v35_v7 = vrot.slane %v34_v5, 4  ;;  %203 = vmatprep.mubr.msk.bf16.mxu0 %vm239_vm3, %v238_v33  ;;  %200 = vmatpush3.bf16.msra.mxu0 %v210_v32  ;;  %v191_v42 = vld [vmem:[%s309_s2] ss:$0 sm:$0xff]  ;;  %vm130_vm4 = vcmask 261120   ;;  %s240_s2 = smov [#allocation2]  }
   0x6   :  { %201 = vmatprep.subr.bf16.mxu0 %v238_v33  ;;  %v192_v55 = vld [vmem:[%s311_s4] ss:$0 sm:$0xff]  ;;  %s182_s29 = sshll.u32 %s240_s2, 4  ;;  %vm174_vm5 = vcmask 74752   ;;  %s183_s29 = int_to_ptr.vmem [resolvable:$true] %s182_s29 }
   0x7   :  { %v29_v8 = vadd.f32 %v28_v6, %v27_v4  ;;  %v36_v9 = vadd.f32 %v35_v7, %v34_v5  ;;  %s214_s30 = scalar_lea.vmem %s183_s29, 32  ;;  %p219_p1 = scmp.lt.s32.totalorder %s183_s29, %s183_s29 }
   0x8   :  { %p215_p0 = scmp.ne.s32.totalorder %s183_s29, %s214_s30  ;;  %p220_p2 = scmp.lt.s32.totalorder %s214_s30, %s214_s30 }
   0x9   :  { %v30_v10 = vrot.slane %v29_v8, 2  ;;  %v37_v11 = vrot.slane %v36_v9, 2  ;;  %202 = vmatpush3.bf16.msra.mxu0 %v211_v34 }
   0xa   :  { %p221_p3 = por %p220_p2, %p219_p1 }
   0xb   :  { %v31_v12 = vadd.f32 %v30_v10, %v29_v8  ;;  %v38_v13 = vadd.f32 %v37_v11, %v36_v9 }
   0xc   :  { %p222_p4 = pnand %p221_p3, %p215_p0 }
   0xd   :  { %v32_v14 = vrot.slane %v31_v12, 1  ;;  %v39_v15 = vrot.slane %v38_v13, 1 }
   0xf   :  { %v33_v16 = vadd.f32 %v32_v14, %v31_v12  ;;  %v40_v17 = vadd.f32 %v39_v15, %v38_v13 }
  0x11   :  { %v42_v18 = vmul.f32 0.25, %v33_v16  ;;  %v43_v19 = vmul.f32 0.25, %v40_v17 }
  0x13   :  { %v47_v20 = vsel %vm46_vm1, %v43_v19, %v42_v18 }
  0x14   :  { %v50_v21 = vsel %vm49_vm2, %v47_v20, 0.0 }
  0x15   :  { %51 = vadd.xlane.f32.xlu0 %v50_v21 }
  0xa2   :  { %v52_v22 = vpop.xlane.xlu0 %51 }
  0xa3   :  { %v54_v23 = vmul.f32 0.03125, %v52_v22 }
  0xa5   :  { %v56_v24 = vrot.slane %v54_v23, 1  ;;  %v59_v25 = vsub.f32 %v42_v18, %v54_v23 }
  0xa7   :  { %v60_v26 = vsub.f32 %v43_v19, %v56_v24  ;;  %v61_v28 = vmul.f32 %v59_v25, %v59_v25 }
  0xa9   :  { %v62_v27 = vmul.f32 %v60_v26, %v60_v26 }
  0xab   :  { %v65_v29 = vrot.slane %v62_v27, 7 }
  0xad   :  { %v66_v30 = vsel %vm46_vm1, %v65_v29, %v61_v28 }
  0xae   :  { %v68_v31 = vsel %vm49_vm2, %v66_v30, 0.0 }
  0xaf   :  { %69 = vadd.xlane.f32.xlu0 %v68_v31 }
 0x13c   :  { %v70_v35 = vpop.xlane.xlu0 %69 }
 0x13d   :  { %v71_v36 = vmul.f32 0.03125, %v70_v35 }
 0x13f   :  { %v72_v37 = vadd.f32 1e-05, %v71_v36 }
 0x141   :  { %212 = vrsqrt.f32 %v72_v37 }
 0x14b   :  { %v213_v38 = vpop.eup %212 }
 0x14c   :  { %v75_v40 = vrot.slane %v213_v38, 1  ;;  %v78_v41 = vmul.f32 %v213_v38, %v59_v25 }
 0x14e   :  { %v79_v43 = vmul.f32 %v75_v40, %v60_v26  ;;  %v87_v44 = vmul.f32 %v190_v39, %v78_v41 }
 0x150   :  { %v88_v45 = vmul.f32 %v190_v39, %v79_v43  ;;  %v96_v46 = vadd.f32 %v191_v42, %v87_v44 }
 0x152   :  { %v97_v47 = vadd.f32 %v191_v42, %v88_v45  ;;  %v98_v48 = vpack.c.bf16 %v96_v46, %v96_v46 }
 0x154   :  { %v99_v49 = vpack.c.bf16 %v97_v47, %v97_v47  ;;  %v113_v51 = vunpack.c.l.b16 %v98_v48 }
 0x156   :  { %v114_v50 = vunpack.c.l.b16 %v99_v49 }
 0x158   :  { %v115_v52 = vrot.slane %v114_v50, 7 }
 0x15a   :  { %v116_v53 = vsel %vm46_vm1, %v115_v52, %v113_v51 }
 0x15b   :  { %v117_v54 = vpack.c.b16 %v116_v53, %v116_v53 }
 0x15d   :  { %204 = vmatmul.mubr.msk.bf16.vlgmr.msra.gmra.mrb[0].mxu0 %vm130_vm4, %v117_v54 }
 0x230   :  { %v168_v56 = vpop.f32.mrb[0].mxu0 }
 0x231   :  { %v169_v57 = vadd.f32 %v192_v55, %v168_v56  ;;  %v205_v58 = vpop.f32.mrb[1].mxu0 }
 0x232   :  { %v171_v59 = vpop.f32.mrb[2].mxu0 }
 0x233   :  { %v206_v60 = vpop.f32.mrb[3].mxu0  ;;  %175 = vst.msk [vmem:[#allocation2] sm:$0x3] %vm174_vm5, %v169_v57 }
 0x234   :  { %225 = shalt.err (!%p222_p4)
}
 0x235   :  { %s226_s4 = scalar_lea.hbm %s312_s5, 32 }
 0x236   :  { %p227_p5 = scmp.ne.s32.totalorder %s312_s5, %s226_s4  ;;  %p230_p6 = scmp.lt.u32.totalorder %s226_s4, %s312_s5 }
 0x238   :  { %p232_p7 = pnand %p230_p6, %p227_p5 }
 0x23a   :  { %235 = shalt.err (!%p232_p7)
}
 0x23b   :  { %185 = dma.vmem_to_hbm [thread:$0]  %s183_s29, 32, %s312_s5, [#allocation3]  }
 0x23c   :  { %236 = dma.done.wait [#allocation3], 32  }
 0x23d   :  { %237 = vsyncadd [#allocation3], 4294967264 }
 0x23e   :  { %189 = vsyncpa [#allocation3], 1 }

</bundles_post_ra>
